<compile_context>
chip_gen: v7x
topology: tpu7x:2x2x1
jax: 0.10.0
libtpu: 0.0.40
codegen_flags: <defaults>
</compile_context>

<pallas_src>
import jax
import jax.numpy as jnp
from jax import lax
from jax.experimental import pallas as pl
from jax.experimental.pallas import tpu as pltpu

# ---- small, self-consistent hyperparameters implied by the module ----
B = 64         # batch
S = 8          # seq_len (token positions; original 35)
E = 32         # embedding_size / conv in_channels (original 50)
C = 32         # conv out_channels (module uses in_channels == out_channels)
K = 2          # kernel_lengths = [2]
STRIDE = 1
VOCAB = 64     # vocab_size (original 3000); padding_idx = 0


def compute_output_seq_len(seq_len, kernel_lengths=(2,), stride=1):
    """Same arithmetic as the PyTorch helper (valid conv followed by pool)."""
    out_pool_total = 0
    for kernel_len in kernel_lengths:
        out_conv = (seq_len - (kernel_len - 1) - 1) // stride + 1
        out_pool = (out_conv - (kernel_len - 1) - 1) // stride + 1
        out_pool_total += out_pool
    return out_pool_total


L_OUT = (S - (K - 1) - 1) // STRIDE + 1        # Conv1d output length (7)
L_POOL = (L_OUT - (K - 1) - 1) // STRIDE + 1   # MaxPool1d output length (6)
assert compute_output_seq_len(S, (K,), STRIDE) == L_POOL


def _pick_grid_steps():
    """v7x has 2 TensorCores/chip -> 2 'parallel' steps; v5e/v6e: 1 step (no per-step overhead)."""
    try:
        kind = jax.devices()[0].device_kind.lower()
    except Exception:
        return 1
    return 2 if ("v7" in kind or "7x" in kind) else 1


GRID_STEPS = _pick_grid_steps()
TB = B // GRID_STEPS                     # batch rows per grid step (64 or 32)
assert B % GRID_STEPS == 0 and TB % 8 == 0


# ----------------------------- Pallas kernel ---------------------------------
def cnn_kernel(idw_ref, emb_ref, wk_ref, cb_ref, lw_ref, lb_ref, out_ref):
    # idw_ref: (K+1, TB*S, 1) int32  token id at sequence offset l+j, row r = local_b*S + l
    # emb_ref: (VOCAB+1, E)   bf16   embedding table (row 0 = padding_idx = zeros)
    # wk_ref : (K, E, C)      bf16   conv weight, wk[k, e, c] == torch_w[c, e, k]
    # cb_ref : (1, C)         f32    conv bias
    # lw_ref : (S, C)         f32    linear weight in torch (B, C, L) flatten order,
    #                                rows l >= L_POOL zeroed (masks invalid tail positions)
    # lb_ref : (1,)           f32    linear bias (SMEM scalar)
    # out_ref: (TB, 1)        f32    sigmoid(logit) per batch row
    tbs = idw_ref.shape[1]
    vocab_iota = lax.broadcasted_iota(jnp.int32, (tbs, VOCAB + 1), 1)
    emb_t = emb_ref[...]                                   # (V+1, E) bf16

    def embed(j):
        # Embedding gather as one-hot compare (VPU) + MXU push; exact w.r.t. the
        # bf16 table because each row has a single 1.0 coefficient.
        # TODO(synk): at real vocab (3000+) switch to a per-row DMA gather from a
        # pl.ANY table (the one-hot contraction scales with vocab size).
        onehot = jnp.where(idw_ref[j] == vocab_iota, 1.0, 0.0).astype(jnp.bfloat16)
        return jnp.dot(onehot, emb_t,
                       preferred_element_type=jnp.float32).astype(jnp.bfloat16)

    # x_j[r, :] = embedding of the token at sequence position l + j (r = local_b*S + l).
    x0, x1, x2 = embed(0), embed(1), embed(2)              # (TBS, E) bf16 each

    w0 = wk_ref[0]                                         # (E, C) bf16, conv tap k = 0
    w1 = wk_ref[1]                                         # (E, C) bf16, conv tap k = 1
    cb = cb_ref[...]                                       # (1, C) f32

    def conv_relu(xa, xb):
        # Conv1d(K=2, valid, stride 1) as two 32-deep MXU accumulations + bias + ReLU (f32).
        acc = (jnp.dot(xa, w0, preferred_element_type=jnp.float32) +
               jnp.dot(xb, w1, preferred_element_type=jnp.float32) + cb)
        return jnp.maximum(acc, 0.0)                       # (TBS, C)

    z0 = conv_relu(x0, x1)        # conv + ReLU at position l      (valid for l < L_OUT)
    z1 = conv_relu(x1, x2)        # conv + ReLU at position l + 1  (valid for l < L_OUT - 1)
    p = jnp.maximum(z0, z1)       # MaxPool1d(2, 1): valid for l < L_POOL; tail masked below

    # dropout(p=0.2) is the identity in eval mode.
    # TODO(synk): training-mode dropout mask (pltpu.prng_*) not implemented.

    # Linear(C * L_POOL -> 1) in torch (B, C, L) flatten order: elementwise multiply with
    # the zero-padded weight grid (masks l >= L_POOL), then lane + sublane reductions.
    p3 = p.reshape(tbs // S, S, C)                         # free split of the sublane-major dim
    s = jnp.sum(p3 * lw_ref[...], axis=2)                  # (TB, S)
    s = jnp.sum(s, axis=1, keepdims=True)                  # (TB, 1)
    out_ref[...] = jax.nn.sigmoid(s + lb_ref[0])           # EUP exp; tiny (TB, 1) store


# ------------------------- parameter layout (one-time) ------------------------
def prepare_params(emb_table, conv_w, conv_b, lin_w, lin_b):
    """Torch layouts -> kernel layouts (one-time, outside the per-call path)."""
    emb_t = emb_table.astype(jnp.bfloat16)                           # (V+1, E); padding row stays 0
    wk = jnp.transpose(conv_w, (2, 1, 0)).astype(jnp.bfloat16)       # (K, E, C): wk[k,e,c] = w[c,e,k]
    cb = conv_b.reshape(1, C).astype(jnp.float32)
    # torch flattens (B, C, L_pool) row-major -> lin_w[0, c*L_POOL + l]; the kernel wants
    # (l, c) plus zero rows for the masked tail positions l >= L_POOL.
    lw = lin_w.reshape(C, L_POOL).T.astype(jnp.float32)              # (L_POOL, C)
    lw_pad = jnp.zeros((S, C), jnp.float32).at[:L_POOL, :].set(lw)   # (S, C)
    lb = lin_b.reshape(1).astype(jnp.float32)
    return emb_t, wk, cb, lw_pad, lb


# ------------------------------ forward wrapper --------------------------------
@jax.jit
def cnn_text_classifier(token_ids, emb_t, wk, cb, lw_pad, lb):
    # K+1 shifted token-id columns (tiny int32 glue; replaces v2's bf16 activation slab
    # and its HBM round trip).  Shifted tails are padded with token 0; those positions
    # only ever feed outputs that are masked by the zero-padded linear-weight rows.
    cols = [token_ids]
    for j in range(1, K + 1):
        pad = jnp.zeros((B, j), dtype=token_ids.dtype)
        cols.append(jnp.concatenate([token_ids[:, j:], pad], axis=1))
    idw = jnp.stack(cols, axis=0).reshape(K + 1, B * S, 1)   # idw[j, b*S + l, 0] = ids[b, l + j]

    grid_spec = pltpu.PrefetchScalarGridSpec(
        num_scalar_prefetch=0,
        grid=(GRID_STEPS,),                     # 1 step (v5e/v6e) or 2 parallel steps (v7x)
        in_specs=[
            pl.BlockSpec((K + 1, TB * S, 1), lambda i: (0, i, 0)),   # token-id columns (tiled)
            pl.BlockSpec((VOCAB + 1, E), lambda i: (0, 0)),          # embedding table (resident)
            pl.BlockSpec((K, E, C), lambda i: (0, 0, 0)),            # conv weight (resident)
            pl.BlockSpec((1, C), lambda i: (0, 0)),                  # conv bias (resident)
            pl.BlockSpec((S, C), lambda i: (0, 0)),                  # padded linear weight (resident)
            pl.BlockSpec(memory_space=pltpu.MemorySpace.SMEM),       # linear bias scalar
        ],
        out_specs=pl.BlockSpec((TB, 1), lambda i: (i, 0)),
    )
    out = pl.pallas_call(
        cnn_kernel,
        out_shape=jax.ShapeDtypeStruct((B, 1), jnp.float32),
        grid_spec=grid_spec,
        compiler_params=pltpu.CompilerParams(
            # Batch axis is fully independent -> megacore-shardable on v7x.
            dimension_semantics=("parallel",),
            # Explicit scoped-VMEM budget (review): per-step double-buffered blocks are
            # only ~20 KB here; when TB / real shapes scale, budget against v7x's
            # 64 MiB physical VMEM (not v5e/v6e's 128 MiB).
            vmem_limit_bytes=32 * 1024 * 1024,
        ),
    )(idw, emb_t, wk, cb, lw_pad, lb)
    # torch .squeeze(): (B, 1) -> (B,).  Free reshape; no broadcast slab / column gather.
    return out[:, 0]


# --------------------------- pure-JAX reference --------------------------------
def reference_forward(token_ids, emb_table, conv_w, conv_b, lin_w, lin_b):
    x = emb_table[token_ids].astype(jnp.float32)          # (B, S, E)
    x = jnp.transpose(x, (0, 2, 1))                       # (B, E, S) = torch NCL
    z = lax.conv_general_dilated(
        x, conv_w, window_strides=(STRIDE,), padding='VALID',
        dimension_numbers=('NCH', 'OIH', 'NCH'))
    z = z + conv_b[None, :, None]
    z = jnp.maximum(z, 0.0)
    p = jnp.maximum(z[:, :, :L_POOL], z[:, :, 1:1 + L_POOL])  # MaxPool1d(2, 1)
    enc = p.reshape(B, -1)                                    # torch flatten order
    out = jax.nn.sigmoid(enc @ lin_w.T + lin_b)               # (B, 1)
    return out[:, 0]


if __name__ == "__main__":
    key = jax.random.PRNGKey(0)
    k_tok, k_emb, k_cw, k_cb, k_lw, k_lb = jax.random.split(key, 6)

    # Deterministic synthetic parameters (shapes from the module's __init__).
    token_ids = jax.random.randint(k_tok, (B, S), 0, VOCAB + 1, dtype=jnp.int32)
    emb_table = 0.1 * jax.random.normal(k_emb, (VOCAB + 1, E), jnp.float32)
    emb_table = emb_table.at[0].set(0.0)                    # padding_idx = 0
    conv_w = 0.1 * jax.random.normal(k_cw, (C, E, K), jnp.float32)
    conv_b = 0.1 * jax.random.normal(k_cb, (C,), jnp.float32)
    lin_w = 0.1 * jax.random.normal(k_lw, (1, C * L_POOL), jnp.float32)
    lin_b = 0.1 * jax.random.normal(k_lb, (1,), jnp.float32)

    params = prepare_params(emb_table, conv_w, conv_b, lin_w, lin_b)

    out = jax.block_until_ready(cnn_text_classifier(token_ids, *params))
    ref = jax.block_until_ready(
        reference_forward(token_ids, emb_table, conv_w, conv_b, lin_w, lin_b))

    assert out.shape == (B,), out.shape
    # bf16 table / conv weights on the MXU -> relaxed tolerance vs. the all-f32 reference.
    assert jnp.allclose(out, ref, rtol=2e-2, atol=2e-2), (out, ref)
    print("KERNEL_OK")
</pallas_src>

<mosaic_0001>
module attributes {stable_mosaic.version = 11 : i64} {
  func.func @cnn_kernel(%arg0: i32, %arg1: memref<3x512x1xi32, #tpu.memory_space<vmem>>, %arg2: memref<65x32xbf16, #tpu.memory_space<vmem>>, %arg3: memref<2x32x32xbf16, #tpu.memory_space<vmem>>, %arg4: memref<1x32xf32, #tpu.memory_space<vmem>>, %arg5: memref<8x32xf32, #tpu.memory_space<vmem>>, %arg6: memref<1xf32, #tpu.memory_space<smem>>, %arg7: memref<64x1xf32, #tpu.memory_space<vmem>>) attributes {dimension_semantics = [#tpu.dimension_semantics<parallel>], iteration_bounds = array<i64: 1>, scalar_prefetch = 0 : i64, scratch_operands = 0 : i64, tpu.core_type = #tpu.core_type<tc>, window_params = [{transform_indices = @transform_0, window_bounds = array<i64: 3, 512, 1>}, {pipeline_mode = #tpu.pipeline_mode<synchronous>, transform_indices = @transform_1, window_bounds = array<i64: 65, 32>}, {pipeline_mode = #tpu.pipeline_mode<synchronous>, transform_indices = @transform_2, window_bounds = array<i64: 2, 32, 32>}, {pipeline_mode = #tpu.pipeline_mode<synchronous>, transform_indices = @transform_3, window_bounds = array<i64: 1, 32>}, {pipeline_mode = #tpu.pipeline_mode<synchronous>, transform_indices = @transform_4, window_bounds = array<i64: 8, 32>}, {transform_indices = @transform_5, window_bounds = array<i64: 1>}, {transform_indices = @transform_6, window_bounds = array<i64: 64, 1>}]} {
    %0 = tpu.iota {dimensions = array<i32: 1>} : vector<512x65xi32>
    %c0 = arith.constant 0 : index
    %c0_0 = arith.constant 0 : index
    %1 = vector.load %arg2[%c0, %c0_0] : memref<65x32xbf16, #tpu.memory_space<vmem>>, vector<65x32xbf16>
    %c0_1 = arith.constant 0 : index
    %c0_2 = arith.constant 0 : index
    %c0_3 = arith.constant 0 : index
    %2 = vector.load %arg1[%c0_1, %c0_2, %c0_3] : memref<3x512x1xi32, #tpu.memory_space<vmem>>, vector<1x512x1xi32>
    %3 = vector.shape_cast %2 : vector<1x512x1xi32> to vector<512x1xi32>
    %4 = vector.broadcast %3 : vector<512x1xi32> to vector<512x65xi32>
    %5 = arith.cmpi eq, %4, %0 : vector<512x65xi32>
    %cst = arith.constant 1.000000e+00 : f32
    %cst_4 = arith.constant 0.000000e+00 : f32
    %6 = vector.broadcast %cst : f32 to vector<512x65xf32>
    %7 = vector.broadcast %cst_4 : f32 to vector<512x65xf32>
    %8 = arith.select %5, %6, %7 : vector<512x65xi1>, vector<512x65xf32>
    %9 = arith.truncf %8 : vector<512x65xf32> to vector<512x65xbf16>
    %cst_5 = arith.constant dense<0.000000e+00> : vector<512x32xf32>
    %10 = tpu.matmul %9, %1, %cst_5 {dimension_numbers = #tpu.dot_dimension_numbers<[1], [0], [0], [1], [0, 0, 1, 1], [], []>} : vector<512x65xbf16>, vector<65x32xbf16>, vector<512x32xf32> -> vector<512x32xf32>
    %11 = arith.truncf %10 : vector<512x32xf32> to vector<512x32xbf16>
    %c1 = arith.constant 1 : index
    %c0_6 = arith.constant 0 : index
    %c0_7 = arith.constant 0 : index
    %12 = vector.load %arg1[%c1, %c0_6, %c0_7] : memref<3x512x1xi32, #tpu.memory_space<vmem>>, vector<1x512x1xi32>
    %13 = vector.shape_cast %12 : vector<1x512x1xi32> to vector<512x1xi32>
    %14 = vector.broadcast %13 : vector<512x1xi32> to vector<512x65xi32>
    %15 = arith.cmpi eq, %14, %0 : vector<512x65xi32>
    %cst_8 = arith.constant 1.000000e+00 : f32
    %cst_9 = arith.constant 0.000000e+00 : f32
    %16 = vector.broadcast %cst_8 : f32 to vector<512x65xf32>
    %17 = vector.broadcast %cst_9 : f32 to vector<512x65xf32>
    %18 = arith.select %15, %16, %17 : vector<512x65xi1>, vector<512x65xf32>
    %19 = arith.truncf %18 : vector<512x65xf32> to vector<512x65xbf16>
    %cst_10 = arith.constant dense<0.000000e+00> : vector<512x32xf32>
    %20 = tpu.matmul %19, %1, %cst_10 {dimension_numbers = #tpu.dot_dimension_numbers<[1], [0], [0], [1], [0, 0, 1, 1], [], []>} : vector<512x65xbf16>, vector<65x32xbf16>, vector<512x32xf32> -> vector<512x32xf32>
    %21 = arith.truncf %20 : vector<512x32xf32> to vector<512x32xbf16>
    %c2 = arith.constant 2 : index
    %c0_11 = arith.constant 0 : index
    %c0_12 = arith.constant 0 : index
    %22 = vector.load %arg1[%c2, %c0_11, %c0_12] : memref<3x512x1xi32, #tpu.memory_space<vmem>>, vector<1x512x1xi32>
    %23 = vector.shape_cast %22 : vector<1x512x1xi32> to vector<512x1xi32>
    %24 = vector.broadcast %23 : vector<512x1xi32> to vector<512x65xi32>
    %25 = arith.cmpi eq, %24, %0 : vector<512x65xi32>
    %cst_13 = arith.constant 1.000000e+00 : f32
    %cst_14 = arith.constant 0.000000e+00 : f32
    %26 = vector.broadcast %cst_13 : f32 to vector<512x65xf32>
    %27 = vector.broadcast %cst_14 : f32 to vector<512x65xf32>
    %28 = arith.select %25, %26, %27 : vector<512x65xi1>, vector<512x65xf32>
    %29 = arith.truncf %28 : vector<512x65xf32> to vector<512x65xbf16>
    %cst_15 = arith.constant dense<0.000000e+00> : vector<512x32xf32>
    %30 = tpu.matmul %29, %1, %cst_15 {dimension_numbers = #tpu.dot_dimension_numbers<[1], [0], [0], [1], [0, 0, 1, 1], [], []>} : vector<512x65xbf16>, vector<65x32xbf16>, vector<512x32xf32> -> vector<512x32xf32>
    %31 = arith.truncf %30 : vector<512x32xf32> to vector<512x32xbf16>
    %c0_16 = arith.constant 0 : index
    %c0_17 = arith.constant 0 : index
    %c0_18 = arith.constant 0 : index
    %32 = vector.load %arg3[%c0_16, %c0_17, %c0_18] : memref<2x32x32xbf16, #tpu.memory_space<vmem>>, vector<1x32x32xbf16>
    %33 = vector.shape_cast %32 : vector<1x32x32xbf16> to vector<32x32xbf16>
    %c1_19 = arith.constant 1 : index
    %c0_20 = arith.constant 0 : index
    %c0_21 = arith.constant 0 : index
    %34 = vector.load %arg3[%c1_19, %c0_20, %c0_21] : memref<2x32x32xbf16, #tpu.memory_space<vmem>>, vector<1x32x32xbf16>
    %35 = vector.shape_cast %34 : vector<1x32x32xbf16> to vector<32x32xbf16>
    %c0_22 = arith.constant 0 : index
    %c0_23 = arith.constant 0 : index
    %36 = vector.load %arg4[%c0_22, %c0_23] : memref<1x32xf32, #tpu.memory_space<vmem>>, vector<1x32xf32>
    %cst_24 = arith.constant dense<0.000000e+00> : vector<512x32xf32>
    %37 = tpu.matmul %11, %33, %cst_24 {dimension_numbers = #tpu.dot_dimension_numbers<[1], [0], [0], [1], [0, 0, 1, 1], [], []>} : vector<512x32xbf16>, vector<32x32xbf16>, vector<512x32xf32> -> vector<512x32xf32>
    %cst_25 = arith.constant dense<0.000000e+00> : vector<512x32xf32>
    %38 = tpu.matmul %21, %35, %cst_25 {dimension_numbers = #tpu.dot_dimension_numbers<[1], [0], [0], [1], [0, 0, 1, 1], [], []>} : vector<512x32xbf16>, vector<32x32xbf16>, vector<512x32xf32> -> vector<512x32xf32>
    %39 = arith.addf %37, %38 : vector<512x32xf32>
    %40 = vector.broadcast %36 : vector<1x32xf32> to vector<512x32xf32>
    %41 = arith.addf %39, %40 : vector<512x32xf32>
    %cst_26 = arith.constant 0.000000e+00 : f32
    %42 = vector.broadcast %cst_26 : f32 to vector<512x32xf32>
    %43 = arith.maximumf %41, %42 : vector<512x32xf32>
    %cst_27 = arith.constant dense<0.000000e+00> : vector<512x32xf32>
    %44 = tpu.matmul %21, %33, %cst_27 {dimension_numbers = #tpu.dot_dimension_numbers<[1], [0], [0], [1], [0, 0, 1, 1], [], []>} : vector<512x32xbf16>, vector<32x32xbf16>, vector<512x32xf32> -> vector<512x32xf32>
    %cst_28 = arith.constant dense<0.000000e+00> : vector<512x32xf32>
    %45 = tpu.matmul %31, %35, %cst_28 {dimension_numbers = #tpu.dot_dimension_numbers<[1], [0], [0], [1], [0, 0, 1, 1], [], []>} : vector<512x32xbf16>, vector<32x32xbf16>, vector<512x32xf32> -> vector<512x32xf32>
    %46 = arith.addf %44, %45 : vector<512x32xf32>
    %47 = vector.broadcast %36 : vector<1x32xf32> to vector<512x32xf32>
    %48 = arith.addf %46, %47 : vector<512x32xf32>
    %cst_29 = arith.constant 0.000000e+00 : f32
    %49 = vector.broadcast %cst_29 : f32 to vector<512x32xf32>
    %50 = arith.maximumf %48, %49 : vector<512x32xf32>
    %51 = arith.maximumf %43, %50 : vector<512x32xf32>
    %52 = vector.shape_cast %51 : vector<512x32xf32> to vector<64x8x32xf32>
    %c0_30 = arith.constant 0 : index
    %c0_31 = arith.constant 0 : index
    %53 = vector.load %arg5[%c0_30, %c0_31] : memref<8x32xf32, #tpu.memory_space<vmem>>, vector<8x32xf32>
    %54 = vector.shape_cast %53 : vector<8x32xf32> to vector<1x8x32xf32>
    %55 = vector.broadcast %54 : vector<1x8x32xf32> to vector<64x8x32xf32>
    %56 = arith.mulf %52, %55 : vector<64x8x32xf32>
    %cst_32 = arith.constant dense<0.000000e+00> : vector<64x8xf32>
    %57 = vector.multi_reduction <add>, %56, %cst_32 [2] : vector<64x8x32xf32> to vector<64x8xf32>
    %cst_33 = arith.constant dense<0.000000e+00> : vector<64xf32>
    %58 = vector.multi_reduction <add>, %57, %cst_33 [1] : vector<64x8xf32> to vector<64xf32>
    %59 = vector.shape_cast %58 : vector<64xf32> to vector<64x1xf32>
    %c0_34 = arith.constant 0 : index
    %60 = memref.load %arg6[%c0_34] : memref<1xf32, #tpu.memory_space<smem>>
    %61 = vector.broadcast %60 : f32 to vector<64x1xf32>
    %62 = arith.addf %59, %61 : vector<64x1xf32>
    %63 = arith.negf %62 : vector<64x1xf32>
    %64 = math.exp %63 : vector<64x1xf32>
    %cst_35 = arith.constant 1.000000e+00 : f32
    %65 = vector.broadcast %cst_35 : f32 to vector<64x1xf32>
    %66 = arith.addf %65, %64 : vector<64x1xf32>
    %67 = arith.divf %65, %66 : vector<64x1xf32>
    %c0_36 = arith.constant 0 : index
    %c0_37 = arith.constant 0 : index
    %68 = vector.load %arg7[%c0_36, %c0_37] : memref<64x1xf32, #tpu.memory_space<vmem>>, vector<64x1xf32>
    tpu.vector_store %arg7[%c0_36, %c0_37], %67 {strides = array<i32>} : memref<64x1xf32, #tpu.memory_space<vmem>>, vector<64x1xf32>,
    return
  }
  func.func @transform_0(%arg0: i32) -> (i32, i32, i32) {
    %c0_i32 = arith.constant 0 : i32
    %c0_i32_0 = arith.constant 0 : i32
    %c0_i32_1 = arith.constant 0 : i32
    return %c0_i32, %arg0, %c0_i32_0 : i32, i32, i32
  }
  func.func @transform_1(%arg0: i32) -> (i32, i32) {
    %c0_i32 = arith.constant 0 : i32
    %c0_i32_0 = arith.constant 0 : i32
    %c0_i32_1 = arith.constant 0 : i32
    return %c0_i32, %c0_i32_0 : i32, i32
  }
  func.func @transform_2(%arg0: i32) -> (i32, i32, i32) {
    %c0_i32 = arith.constant 0 : i32
    %c0_i32_0 = arith.constant 0 : i32
    %c0_i32_1 = arith.constant 0 : i32
    %c0_i32_2 = arith.constant 0 : i32
    return %c0_i32, %c0_i32_0, %c0_i32_1 : i32, i32, i32
  }
  func.func @transform_3(%arg0: i32) -> (i32, i32) {
    %c0_i32 = arith.constant 0 : i32
    %c0_i32_0 = arith.constant 0 : i32
    %c0_i32_1 = arith.constant 0 : i32
    return %c0_i32, %c0_i32_0 : i32, i32
  }
  func.func @transform_4(%arg0: i32) -> (i32, i32) {
    %c0_i32 = arith.constant 0 : i32
    %c0_i32_0 = arith.constant 0 : i32
    %c0_i32_1 = arith.constant 0 : i32
    return %c0_i32, %c0_i32_0 : i32, i32
  }
  func.func @transform_5(%arg0: i32) -> i32 {
    %c0_i32 = arith.constant 0 : i32
    %c0_i32_0 = arith.constant 0 : i32
    return %c0_i32 : i32
  }
  func.func @transform_6(%arg0: i32) -> (i32, i32) {
    %c0_i32 = arith.constant 0 : i32
    %c0_i32_0 = arith.constant 0 : i32
    return %arg0, %c0_i32 : i32, i32
  }
}

</mosaic_0001>

<bundles_post_ra>
// kernel: cnn_text_classifier.1
= control target key start
LH: loop header
LB: loop body
LE: loop exit
PB: predicated region body
PF: predicated region fallthrough
CT: control target
= control target key end

     0   :  { %v6420_v0 = vmov 0   ;;  %vm576_vm0 = vcmask 1040384   ;;  %vm479_vm5 = vcmask 531456   ;;  %s8622_s1 = inlined_call_operand.vmem [shape: bf16[65,32], index: 1, kind: input, shape index: {}]   ;;  %s8623_s0 = inlined_call_operand.vmem [shape: s32[3,512,1], index: 0, kind: input, shape index: {}]   ;;  %s8624_s2 = inlined_call_operand.vmem [shape: bf16[2,32,32], index: 2, kind: input, shape index: {}]   ;;  %s8625_s3 = inlined_call_operand.vmem [shape: f32[1,32], index: 3, kind: input, shape index: {}]   ;;  %s8626_s4 = inlined_call_operand.vmem [shape: f32[8,32], index: 4, kind: input, shape index: {}]   ;;  %s8627_s5 = inlined_call_operand.<no memory space> [shape: f32[1], index: 5, kind: input, shape index: {}]   ;;  %s8628_s6 = inlined_call_operand.vmem [shape: f32[64,1], index: 6, kind: output, shape index: {}]  }
   0x1   :  { %6376 = vset.pattern.permute.xlu1 %v6420_v0  ;;  %6375 = vset.pattern.permute.xlu0 %v6420_v0  ;;  %v68_v1 = vld [vmem:[%s8623_s0 + $0x100] sm:$0xff]  ;;  %v69_v3 = vld [vmem:[%s8623_s0 + $0x108] sm:$0xff]  ;;  %v39_v5 = vld [vmem:[%s8623_s0 + $0x18] sm:$0xff]  ;;  %v578_v22 = vsel %vm576_vm0, 65535, %v6420_v0 }
   0x2   :  { %v36_v2 = vld [vmem:[%s8623_s0] sm:$0xff]  ;;  %197 = vperm.xlu1 %6376, %v68_v1   ;;  %v37_v4 = vld [vmem:[%s8623_s0 + $0x8] sm:$0xff]  ;;  %v38_v6 = vld [vmem:[%s8623_s0 + $0x10] sm:$0xff] }
   0x3   :  { %101 = vperm.xlu0 %6375, %v36_v2   ;;  %v71_v7 = vld [vmem:[%s8623_s0 + $0x118] sm:$0xff]  ;;  %v70_v8 = vld [vmem:[%s8623_s0 + $0x110] sm:$0xff]  ;;  %v41_v9 = vld [vmem:[%s8623_s0 + $0x28] sm:$0xff] }
   0x4   :  { %v40_v10 = vld [vmem:[%s8623_s0 + $0x20] sm:$0xff]  ;;  %v73_v11 = vld [vmem:[%s8623_s0 + $0x128] sm:$0xff]  ;;  %v43_v14 = vld [vmem:[%s8623_s0 + $0x38] sm:$0xff] }
   0x5   :  { %v72_v12 = vld [vmem:[%s8623_s0 + $0x120] sm:$0xff]  ;;  %v42_v15 = vld [vmem:[%s8623_s0 + $0x30] sm:$0xff]  ;;  %v6509_v16 = vld [vmem:[%s8622_s1 + $0x8] sm:$0xff]  }
   0x6   :  { %200 = vperm.xlu1 %6376, %v69_v3   ;;  %v6496_v13 = vld [vmem:[%s8622_s1] sm:$0xff]   ;;  %v6518_v17 = vld [vmem:[%s8622_s1 + $0x10] sm:$0xff]   ;;  %v75_v18 = vld [vmem:[%s8623_s0 + $0x138] sm:$0xff] }
   0x7   :  { %104 = vperm.xlu0 %6375, %v37_v4   ;;  %5741 = vmatprep.subr.bf16.mxu0 %v6496_v13  ;;  %v74_v19 = vld [vmem:[%s8623_s0 + $0x130] sm:$0xff]  ;;  %v6377_v20 = vld [vmem:[%s8622_s1 + $0x20] ss:$0 sps:$4 sm:$0x11]   ;;  %v6536_v21 = vld [vmem:[%s8622_s1 + $0x18] sm:$0xff]  }
   0x8   :  { %6235 = vmatprep.subr.bf16.mxu1 %v6496_v13  ;;  %5742 = vmatpush3.bf16.msra.mxu0 %v6496_v13  ;;  %v45_v23 = vld [vmem:[%s8623_s0 + $0x48] sm:$0xff]  ;;  %v44_v24 = vld [vmem:[%s8623_s0 + $0x40] sm:$0xff]  ;;  %v6546_v25 = vand.u32 %v6377_v20, %v578_v22  ;;  %v47_v28 = vld [vmem:[%s8623_s0 + $0x58] sm:$0xff]  ;;  %v6421_v22 = vmov 0.0  }
   0x9   :  { %6240 = vmatpush3.bf16.msra.mxu1 %v6496_v13  ;;  %5743 = vmatprep.subr.bf16.mxu0 %v6509_v16  ;;  %v77_v26 = vld [vmem:[%s8623_s0 + $0x148] sm:$0xff]  ;;  %v76_v27 = vld [vmem:[%s8623_s0 + $0x140] sm:$0xff]  ;;  %v46_v29 = vld [vmem:[%s8623_s0 + $0x50] sm:$0xff] }
   0xa   :  { %110 = vperm.xlu1 %6376, %v39_v5   ;;  %6236 = vmatprep.subr.bf16.mxu1 %v6509_v16  ;;  %v79_v30 = vld [vmem:[%s8623_s0 + $0x158] sm:$0xff]  ;;  %v78_v31 = vld [vmem:[%s8623_s0 + $0x150] sm:$0xff]  ;;  %v49_v32 = vld [vmem:[%s8623_s0 + $0x68] sm:$0xff] }
   0xb   :  { %107 = vperm.xlu0 %6375, %v38_v6   ;;  %v48_v33 = vld [vmem:[%s8623_s0 + $0x60] sm:$0xff]  ;;  %v81_v34 = vld [vmem:[%s8623_s0 + $0x168] sm:$0xff]  ;;  %v51_v36 = vld [vmem:[%s8623_s0 + $0x78] sm:$0xff] }
   0xc   :  { %5744 = vmatpush3.bf16.msra.mxu0 %v6509_v16  ;;  %v80_v35 = vld [vmem:[%s8623_s0 + $0x160] sm:$0xff]  ;;  %v50_v37 = vld [vmem:[%s8623_s0 + $0x70] sm:$0xff]  ;;  %v83_v38 = vld [vmem:[%s8623_s0 + $0x178] sm:$0xff] }
   0xd   :  { %6241 = vmatpush3.bf16.msra.mxu1 %v6509_v16  ;;  %5745 = vmatprep.subr.bf16.mxu0 %v6518_v17  ;;  %v82_v39 = vld [vmem:[%s8623_s0 + $0x170] sm:$0xff]  ;;  %v53_v40 = vld [vmem:[%s8623_s0 + $0x88] sm:$0xff]  ;;  %v52_v41 = vld [vmem:[%s8623_s0 + $0x80] sm:$0xff] }
   0xe   :  { %206 = vperm.xlu1 %6376, %v71_v7   ;;  %6237 = vmatprep.subr.bf16.mxu1 %v6518_v17  ;;  %v85_v42 = vld [vmem:[%s8623_s0 + $0x188] sm:$0xff]  ;;  %v84_v43 = vld [vmem:[%s8623_s0 + $0x180] sm:$0xff]  ;;  %v55_v44 = vld [vmem:[%s8623_s0 + $0x98] sm:$0xff] }
   0xf   :  { %203 = vperm.xlu0 %6375, %v70_v8   ;;  %v54_v45 = vld [vmem:[%s8623_s0 + $0x90] sm:$0xff]  ;;  %v87_v46 = vld [vmem:[%s8623_s0 + $0x198] sm:$0xff]  ;;  %v57_v48 = vld [vmem:[%s8623_s0 + $0xa8] sm:$0xff]  ;;  %v8629_v8 = vlaneseq }
  0x10   :  { %5746 = vmatpush3.bf16.msra.mxu0 %v6518_v17  ;;  %v86_v47 = vld [vmem:[%s8623_s0 + $0x190] sm:$0xff]  ;;  %v56_v49 = vld [vmem:[%s8623_s0 + $0xa0] sm:$0xff]  ;;  %v89_v50 = vld [vmem:[%s8623_s0 + $0x1a8] sm:$0xff] }
  0x11   :  { %6242 = vmatpush3.bf16.msra.mxu1 %v6518_v17  ;;  %5747 = vmatprep.subr.bf16.mxu0 %v6536_v21  ;;  %v88_v51 = vld [vmem:[%s8623_s0 + $0x1a0] sm:$0xff]  ;;  %v59_v52 = vld [vmem:[%s8623_s0 + $0xb8] sm:$0xff]  ;;  %v58_v53 = vld [vmem:[%s8623_s0 + $0xb0] sm:$0xff] }
  0x12   :  { %116 = vperm.xlu1 %6376, %v41_v9   ;;  %6238 = vmatprep.subr.bf16.mxu1 %v6536_v21  ;;  %v91_v54 = vld [vmem:[%s8623_s0 + $0x1b8] sm:$0xff]  ;;  %v90_v55 = vld [vmem:[%s8623_s0 + $0x1b0] sm:$0xff]  ;;  %v61_v56 = vld [vmem:[%s8623_s0 + $0xc8] sm:$0xff] }
  0x13   :  { %113 = vperm.xlu0 %6375, %v40_v10   ;;  %v60_v57 = vld [vmem:[%s8623_s0 + $0xc0] sm:$0xff]  ;;  %v93_v58 = vld [vmem:[%s8623_s0 + $0x1c8] sm:$0xff]  ;;  %v63_v60 = vld [vmem:[%s8623_s0 + $0xd8] sm:$0xff] }
  0x14   :  { %5748 = vmatpush3.bf16.msra.mxu0 %v6536_v21  ;;  %v92_v59 = vld [vmem:[%s8623_s0 + $0x1c0] sm:$0xff]  ;;  %v62_v61 = vld [vmem:[%s8623_s0 + $0xd0] sm:$0xff]  ;;  %v95_v62 = vld [vmem:[%s8623_s0 + $0x1d8] sm:$0xff] }
  0x15   :  { %6243 = vmatpush3.bf16.msra.mxu1 %v6536_v21  ;;  %5749 = vmatprep.subr.bf16.mxu0 %v6546_v25  ;;  %v94_v63 = vld [vmem:[%s8623_s0 + $0x1d0] sm:$0xff]  ;;  %v65_v0 = vld [vmem:[%s8623_s0 + $0xe8] sm:$0xff]  ;;  %v64_v1 = vld [vmem:[%s8623_s0 + $0xe0] sm:$0xff] }
  0x16   :  { %212 = vperm.xlu1 %6376, %v73_v11   ;;  %6239 = vmatprep.subr.bf16.mxu1 %v6546_v25  ;;  %v97_v2 = vld [vmem:[%s8623_s0 + $0x1e8] sm:$0xff]  ;;  %v96_v3 = vld [vmem:[%s8623_s0 + $0x1e0] sm:$0xff]  ;;  %v67_v4 = vld [vmem:[%s8623_s0 + $0xf8] sm:$0xff]  ;;  %v6703_v11 = vand.u32 127, %v8629_v8 }
  0x17   :  { %209 = vperm.xlu0 %6375, %v72_v12   ;;  %v66_v5 = vld [vmem:[%s8623_s0 + $0xf0] sm:$0xff]  ;;  %v99_v6 = vld [vmem:[%s8623_s0 + $0x1f8] sm:$0xff]  ;;  %v5158_v9 = vld [vmem:[%s8623_s0 + $0x208] sm:$0xff] }
  0x18   :  { %5750 = vmatpush3.bf16.msra.mxu0 %v6546_v25  ;;  %v98_v7 = vld [vmem:[%s8623_s0 + $0x1f0] sm:$0xff]  ;;  %v5157_v10 = vld [vmem:[%s8623_s0 + $0x200] sm:$0xff]  ;;  %8675 = vst [vmem:[#allocation3_spill] sm:$0xff] %v6703_v11 }
  0x19   :  { %6244 = vmatpush3.bf16.msra.mxu1 %v6546_v25  ;;  %5889 = vmatprep.subr.bf16.mxu0 %v6496_v13 }
  0x1a   :  { %122 = vperm.xlu1 %6376, %v43_v14   ;;  %5815 = vmatprep.subr.bf16.mxu1 %v6496_v13 }
  0x1b   :  { %119 = vperm.xlu0 %6375, %v42_v15   ;;  %v5254_v15 = vld [vmem:[%s8623_s0 + $0x408] sm:$0xff] }
  0x1e   :  { %218 = vperm.xlu1 %6376, %v75_v18   ;;  %v5253_v18 = vld [vmem:[%s8623_s0 + $0x400] sm:$0xff] }
  0x1f   :  { %215 = vperm.xlu0 %6375, %v74_v19  }
  0x22   :  { %128 = vperm.xlu1 %6376, %v45_v23  }
  0x23   :  { %125 = vperm.xlu0 %6375, %v44_v24  }
  0x26   :  { %224 = vperm.xlu1 %6376, %v77_v26   ;;  %v5160_v26 = vld [vmem:[%s8623_s0 + $0x218] sm:$0xff] }
  0x27   :  { %221 = vperm.xlu0 %6375, %v76_v27  }
  0x2a   :  { %134 = vperm.xlu1 %6376, %v47_v28  }
  0x2b   :  { %131 = vperm.xlu0 %6375, %v46_v29  }
  0x2e   :  { %230 = vperm.xlu1 %6376, %v79_v30   ;;  %v5159_v30 = vld [vmem:[%s8623_s0 + $0x210] sm:$0xff] }
  0x2f   :  { %227 = vperm.xlu0 %6375, %v78_v31  }
  0x32   :  { %140 = vperm.xlu1 %6376, %v49_v32  }
  0x33   :  { %137 = vperm.xlu0 %6375, %v48_v33  }
  0x36   :  { %236 = vperm.xlu1 %6376, %v81_v34  }
  0x37   :  { %233 = vperm.xlu0 %6375, %v80_v35  }
  0x3a   :  { %146 = vperm.xlu1 %6376, %v51_v36   ;;  %v5256_v36 = vld [vmem:[%s8623_s0 + $0x418] sm:$0xff] }
  0x3b   :  { %143 = vperm.xlu0 %6375, %v50_v37  }
  0x3e   :  { %242 = vperm.xlu1 %6376, %v83_v38   ;;  %v5255_v38 = vld [vmem:[%s8623_s0 + $0x410] sm:$0xff] }
  0x3f   :  { %239 = vperm.xlu0 %6375, %v82_v39  }
  0x42   :  { %152 = vperm.xlu1 %6376, %v53_v40  }
  0x43   :  { %149 = vperm.xlu0 %6375, %v52_v41  }
  0x46   :  { %248 = vperm.xlu1 %6376, %v85_v42  }
  0x47   :  { %245 = vperm.xlu0 %6375, %v84_v43   ;;  %v5162_v43 = vld [vmem:[%s8623_s0 + $0x228] sm:$0xff] }
  0x4a   :  { %158 = vperm.xlu1 %6376, %v55_v44  }
  0x4b   :  { %155 = vperm.xlu0 %6375, %v54_v45   ;;  %v5161_v45 = vld [vmem:[%s8623_s0 + $0x220] sm:$0xff] }
  0x4e   :  { %254 = vperm.xlu1 %6376, %v87_v46  }
  0x4f   :  { %251 = vperm.xlu0 %6375, %v86_v47  }
  0x52   :  { %164 = vperm.xlu1 %6376, %v57_v48  }
  0x53   :  { %161 = vperm.xlu0 %6375, %v56_v49  }
  0x56   :  { %260 = vperm.xlu1 %6376, %v89_v50   ;;  %v5258_v50 = vld [vmem:[%s8623_s0 + $0x428] sm:$0xff] }
  0x57   :  { %257 = vperm.xlu0 %6375, %v88_v51  }
  0x5a   :  { %170 = vperm.xlu1 %6376, %v59_v52   ;;  %v5257_v52 = vld [vmem:[%s8623_s0 + $0x420] sm:$0xff] }
  0x5b   :  { %167 = vperm.xlu0 %6375, %v58_v53  }
  0x5e   :  { %266 = vperm.xlu1 %6376, %v91_v54  }
  0x5f   :  { %263 = vperm.xlu0 %6375, %v90_v55  }
  0x62   :  { %176 = vperm.xlu1 %6376, %v61_v56   ;;  %v5164_v56 = vld [vmem:[%s8623_s0 + $0x238] sm:$0xff] }
  0x63   :  { %173 = vperm.xlu0 %6375, %v60_v57  }
  0x66   :  { %272 = vperm.xlu1 %6376, %v93_v58   ;;  %v5163_v58 = vld [vmem:[%s8623_s0 + $0x230] sm:$0xff] }
  0x67   :  { %269 = vperm.xlu0 %6375, %v92_v59  }
  0x6a   :  { %182 = vperm.xlu1 %6376, %v63_v60  }
  0x6b   :  { %179 = vperm.xlu0 %6375, %v62_v61  }
  0x6e   :  { %278 = vperm.xlu1 %6376, %v95_v62   ;;  %v5260_v62 = vld [vmem:[%s8623_s0 + $0x438] sm:$0xff] }
  0x6f   :  { %275 = vperm.xlu0 %6375, %v94_v63  }
  0x72   :  { %188 = vperm.xlu1 %6376, %v65_v0   ;;  %v5259_v0 = vld [vmem:[%s8623_s0 + $0x430] sm:$0xff] }
  0x73   :  { %185 = vperm.xlu0 %6375, %v64_v1  }
  0x76   :  { %284 = vperm.xlu1 %6376, %v97_v2  }
  0x77   :  { %281 = vperm.xlu0 %6375, %v96_v3  }
  0x7a   :  { %194 = vperm.xlu1 %6376, %v67_v4   ;;  %v5166_v4 = vld [vmem:[%s8623_s0 + $0x248] sm:$0xff] }
  0x7b   :  { %191 = vperm.xlu0 %6375, %v66_v5  }
  0x7e   :  { %290 = vperm.xlu1 %6376, %v99_v6   ;;  %v5165_v6 = vld [vmem:[%s8623_s0 + $0x240] sm:$0xff] }
  0x7f   :  { %287 = vperm.xlu0 %6375, %v98_v7  }
  0x81   :  { %v198_v12 = vpop.permute.xlu1 %197 }
  0x82   :  { %v102_v14 = vpop.permute.xlu0 %101  ;;  %972 = vperm.xlu1 %6376, %v5158_v9   ;;  %vm324_vm1 = vcmp.eq.s32.totalorder %v198_v12, %v6703_v11  ;;  %v5262_v12 = vld [vmem:[%s8623_s0 + $0x448] sm:$0xff] }
  0x83   :  { %969 = vperm.xlu0 %6375, %v5157_v10   ;;  %vm292_vm2 = vcmp.eq.s32.totalorder %v102_v14, %v6703_v11  ;;  %v388_v23 = vsel %vm324_vm1, 1.0, %v6421_v22 }
  0x84   :  { %v356_v27 = vsel %vm292_vm2, 1.0, %v6421_v22 }
  0x85   :  { %v201_v19 = vpop.permute.xlu1 %200 }
  0x86   :  { %v105_v20 = vpop.permute.xlu0 %104  ;;  %vm325_vm3 = vcmp.eq.s32.totalorder %v201_v19, %v6703_v11  ;;  %1806 = vperm.xlu1 %6376, %v5254_v15   ;;  %v5261_v15 = vld [vmem:[%s8623_s0 + $0x440] sm:$0xff] }
  0x87   :  { %vm293_vm4 = vcmp.eq.s32.totalorder %v105_v20, %v6703_v11  ;;  %1803 = vperm.xlu0 %6375, %v5253_v18   ;;  %v389_v24 = vsel %vm325_vm3, 1.0, %v6421_v22 }
  0x88   :  { %v357_v28 = vsel %vm293_vm4, 1.0, %v6421_v22  ;;  %v436_v29 = vpack.c.bf16 %v389_v24, %v388_v23 }
  0x89   :  { %v420_v31 = vpack.c.bf16 %v357_v28, %v356_v27  ;;  %v111_v32 = vpop.permute.xlu1 %110 }
  0x8a   :  { %v108_v33 = vpop.permute.xlu0 %107  ;;  %vm295_vm6 = vcmp.eq.s32.totalorder %v111_v32, %v6703_v11  ;;  %5783 = vmatprep.mubr.msk.bf16.mxu1 %vm479_vm5, %v436_v29  ;;  %978 = vperm.xlu1 %6376, %v5160_v26   ;;  %v5167_v26 = vld [vmem:[%s8623_s0 + $0x250] sm:$0xff] }
  0x8b   :  { %vm294_vm7 = vcmp.eq.s32.totalorder %v108_v33, %v6703_v11  ;;  %v359_v34 = vsel %vm295_vm6, 1.0, %v6421_v22  ;;  %975 = vperm.xlu0 %6375, %v5159_v30   ;;  %5751 = vmatprep.mubr.msk.bf16.mxu0 %vm479_vm5, %v420_v31  ;;  %v5264_v31 = vld [vmem:[%s8623_s0 + $0x458] sm:$0xff]  ;;  %v5263_v33 = vld [vmem:[%s8623_s0 + $0x450] sm:$0xff] }
  0x8c   :  { %v358_v35 = vsel %vm294_vm7, 1.0, %v6421_v22 }
  0x8d   :  { %v421_v37 = vpack.c.bf16 %v359_v34, %v358_v35  ;;  %v207_v39 = vpop.permute.xlu1 %206 }
  0x8e   :  { %v204_v40 = vpop.permute.xlu0 %203  ;;  %vm327_vm8 = vcmp.eq.s32.totalorder %v207_v39, %v6703_v11  ;;  %1812 = vperm.xlu1 %6376, %v5256_v36  }
  0x8f   :  { %vm326_vm9 = vcmp.eq.s32.totalorder %v204_v40, %v6703_v11  ;;  %5752 = vmatmul.mubr.msk.bf16.vlgmr.msra.gmra.mrb[0].mxu0 %vm479_vm5, %v421_v37  ;;  %v391_v41 = vsel %vm327_vm8, 1.0, %v6421_v22  ;;  %1809 = vperm.xlu0 %6375, %v5255_v38   ;;  %v5170_v38 = vld [vmem:[%s8623_s0 + $0x268] sm:$0xff]  ;;  %v5169_v40 = vld [vmem:[%s8623_s0 + $0x260] sm:$0xff] }
  0x90   :  { %v390_v42 = vsel %vm326_vm9, 1.0, %v6421_v22  ;;  %5890 = vmatpush3.bf16.msra.mxu0 %v6496_v13 }
  0x91   :  { %v437_v44 = vpack.c.bf16 %v391_v41, %v390_v42  ;;  %5891 = vmatprep.subr.bf16.mxu0 %v6509_v16  ;;  %v117_v46 = vpop.permute.xlu1 %116 }
  0x92   :  { %v114_v47 = vpop.permute.xlu0 %113  ;;  %vm297_vm10 = vcmp.eq.s32.totalorder %v117_v46, %v6703_v11  ;;  %984 = vperm.xlu1 %6376, %v5162_v43  }
  0x93   :  { %vm296_vm11 = vcmp.eq.s32.totalorder %v114_v47, %v6703_v11  ;;  %5784 = vmatmul.mubr.msk.bf16.vlgmr.msra.gmra.mrb[0].mxu1 %vm479_vm5, %v437_v44  ;;  %v361_v48 = vsel %vm297_vm10, 1.0, %v6421_v22  ;;  %981 = vperm.xlu0 %6375, %v5161_v45   ;;  %v5266_v45 = vld [vmem:[%s8623_s0 + $0x468] sm:$0xff]  ;;  %v5265_v47 = vld [vmem:[%s8623_s0 + $0x460] sm:$0xff] }
  0x94   :  { %v360_v49 = vsel %vm296_vm11, 1.0, %v6421_v22  ;;  %5816 = vmatpush3.bf16.msra.mxu1 %v6496_v13  ;;  %5892 = vmatpush3.bf16.msra.mxu0 %v6509_v16 }
  0x95   :  { %v422_v51 = vpack.c.bf16 %v361_v48, %v360_v49  ;;  %5817 = vmatprep.subr.bf16.mxu1 %v6509_v16  ;;  %v213_v53 = vpop.permute.xlu1 %212  ;;  %5893 = vmatprep.subr.bf16.mxu0 %v6518_v17 }
  0x96   :  { %v210_v54 = vpop.permute.xlu0 %209  ;;  %vm329_vm12 = vcmp.eq.s32.totalorder %v213_v53, %v6703_v11  ;;  %1818 = vperm.xlu1 %6376, %v5258_v50  }
  0x97   :  { %vm328_vm13 = vcmp.eq.s32.totalorder %v210_v54, %v6703_v11  ;;  %5755 = vmatprep.mubr.msk.bf16.mxu0 %vm479_vm5, %v422_v51  ;;  %v393_v13 = vsel %vm329_vm12, 1.0, %v6421_v22  ;;  %1815 = vperm.xlu0 %6375, %v5257_v52   ;;  %v5172_v52 = vld [vmem:[%s8623_s0 + $0x278] sm:$0xff]  ;;  %v5171_v54 = vld [vmem:[%s8623_s0 + $0x270] sm:$0xff] }
  0x98   :  { %v392_v55 = vsel %vm328_vm13, 1.0, %v6421_v22  ;;  %5818 = vmatpush3.bf16.msra.mxu1 %v6509_v16  ;;  %5894 = vmatpush3.bf16.msra.mxu0 %v6518_v17 }
  0x99   :  { %v438_v57 = vpack.c.bf16 %v393_v13, %v392_v55  ;;  %5819 = vmatprep.subr.bf16.mxu1 %v6518_v17  ;;  %v123_v59 = vpop.permute.xlu1 %122  ;;  %5895 = vmatprep.subr.bf16.mxu0 %v6536_v21 }
  0x9a   :  { %v120_v60 = vpop.permute.xlu0 %119  ;;  %vm299_vm14 = vcmp.eq.s32.totalorder %v123_v59, %v6703_v11  ;;  %990 = vperm.xlu1 %6376, %v5164_v56  }
  0x9b   :  { %vm298_vm15 = vcmp.eq.s32.totalorder %v120_v60, %v6703_v11  ;;  %5787 = vmatprep.mubr.msk.bf16.mxu1 %vm479_vm5, %v438_v57  ;;  %v363_v16 = vsel %vm299_vm14, 1.0, %v6421_v22  ;;  %987 = vperm.xlu0 %6375, %v5163_v58   ;;  %v5268_v58 = vld [vmem:[%s8623_s0 + $0x478] sm:$0xff]  ;;  %v5267_v60 = vld [vmem:[%s8623_s0 + $0x470] sm:$0xff] }
  0x9c   :  { %v362_v61 = vsel %vm298_vm15, 1.0, %v6421_v22  ;;  %5820 = vmatpush3.bf16.msra.mxu1 %v6518_v17  ;;  %5896 = vmatpush3.bf16.msra.mxu0 %v6536_v21 }
  0x9d   :  { %v423_v63 = vpack.c.bf16 %v363_v16, %v362_v61  ;;  %5821 = vmatprep.subr.bf16.mxu1 %v6536_v21  ;;  %v219_v1 = vpop.permute.xlu1 %218  ;;  %5897 = vmatprep.subr.bf16.mxu0 %v6546_v25 }
  0x9e   :  { %v216_v2 = vpop.permute.xlu0 %215  ;;  %vm331_vm0 = vcmp.eq.s32.totalorder %v219_v1, %v6703_v11  ;;  %1824 = vperm.xlu1 %6376, %v5260_v62  }
  0x9f   :  { %vm330_vm1 = vcmp.eq.s32.totalorder %v216_v2, %v6703_v11  ;;  %5756 = vmatmul.mubr.msk.bf16.gmra.mrb[4].mxu0 %vm479_vm5, %v423_v63  ;;  %v395_v17 = vsel %vm331_vm0, 1.0, %v6421_v22  ;;  %1821 = vperm.xlu0 %6375, %v5259_v0   ;;  %v5174_v0 = vld [vmem:[%s8623_s0 + $0x288] sm:$0xff]  ;;  %v5173_v2 = vld [vmem:[%s8623_s0 + $0x280] sm:$0xff] }
  0xa0   :  { %v394_v3 = vsel %vm330_vm1, 1.0, %v6421_v22  ;;  %5822 = vmatpush3.bf16.msra.mxu1 %v6536_v21  ;;  %5898 = vmatpush3.bf16.msra.mxu0 %v6546_v25 }
  0xa1   :  { %v439_v5 = vpack.c.bf16 %v395_v17, %v394_v3  ;;  %5823 = vmatprep.subr.bf16.mxu1 %v6546_v25  ;;  %v129_v7 = vpop.permute.xlu1 %128 }
  0xa2   :  { %v126_v9 = vpop.permute.xlu0 %125  ;;  %vm301_vm2 = vcmp.eq.s32.totalorder %v129_v7, %v6703_v11  ;;  %996 = vperm.xlu1 %6376, %v5166_v4  }
  0xa3   :  { %vm300_vm3 = vcmp.eq.s32.totalorder %v126_v9, %v6703_v11  ;;  %5788 = vmatmul.mubr.msk.bf16.gmra.mrb[4].mxu1 %vm479_vm5, %v439_v5  ;;  %v365_v21 = vsel %vm301_vm2, 1.0, %v6421_v22  ;;  %993 = vperm.xlu0 %6375, %v5165_v6   ;;  %v5270_v6 = vld [vmem:[%s8623_s0 + $0x488] sm:$0xff]  ;;  %v5269_v9 = vld [vmem:[%s8623_s0 + $0x480] sm:$0xff] }
  0xa4   :  { %v364_v10 = vsel %vm300_vm3, 1.0, %v6421_v22  ;;  %5824 = vmatpush3.bf16.msra.mxu1 %v6546_v25  ;;  %v5168_v25 = vld [vmem:[%s8623_s0 + $0x258] sm:$0xff] }
  0xa5   :  { %v424_v14 = vpack.c.bf16 %v365_v21, %v364_v10  ;;  %v225_v18 = vpop.permute.xlu1 %224 }
  0xa6   :  { %v222_v19 = vpop.permute.xlu0 %221  ;;  %vm333_vm4 = vcmp.eq.s32.totalorder %v225_v18, %v6703_v11  ;;  %1830 = vperm.xlu1 %6376, %v5262_v12  }
  0xa7   :  { %vm332_vm6 = vcmp.eq.s32.totalorder %v222_v19, %v6703_v11  ;;  %5759 = vmatprep.mubr.msk.bf16.mxu0 %vm479_vm5, %v424_v14  ;;  %v397_v20 = vsel %vm333_vm4, 1.0, %v6421_v22  ;;  %1827 = vperm.xlu0 %6375, %v5261_v15   ;;  %v5176_v15 = vld [vmem:[%s8623_s0 + $0x298] sm:$0xff]  ;;  %v5175_v19 = vld [vmem:[%s8623_s0 + $0x290] sm:$0xff] }
  0xa8   :  { %v396_v23 = vsel %vm332_vm6, 1.0, %v6421_v22 }
  0xa9   :  { %v440_v24 = vpack.c.bf16 %v397_v20, %v396_v23  ;;  %v135_v27 = vpop.permute.xlu1 %134 }
  0xaa   :  { %v132_v28 = vpop.permute.xlu0 %131  ;;  %vm303_vm7 = vcmp.eq.s32.totalorder %v135_v27, %v6703_v11  ;;  %1002 = vperm.xlu1 %6376, %v5168_v25  }
  0xab   :  { %vm302_vm8 = vcmp.eq.s32.totalorder %v132_v28, %v6703_v11  ;;  %5791 = vmatprep.mubr.msk.bf16.mxu1 %vm479_vm5, %v440_v24  ;;  %v367_v29 = vsel %vm303_vm7, 1.0, %v6421_v22  ;;  %999 = vperm.xlu0 %6375, %v5167_v26   ;;  %v5272_v26 = vld [vmem:[%s8623_s0 + $0x498] sm:$0xff]  ;;  %v5271_v28 = vld [vmem:[%s8623_s0 + $0x490] sm:$0xff] }
  0xac   :  { %v366_v30 = vsel %vm302_vm8, 1.0, %v6421_v22 }
  0xad   :  { %v425_v32 = vpack.c.bf16 %v367_v29, %v366_v30  ;;  %v231_v34 = vpop.permute.xlu1 %230 }
  0xae   :  { %v228_v35 = vpop.permute.xlu0 %227  ;;  %vm335_vm9 = vcmp.eq.s32.totalorder %v231_v34, %v6703_v11  ;;  %1836 = vperm.xlu1 %6376, %v5264_v31  }
  0xaf   :  { %vm334_vm10 = vcmp.eq.s32.totalorder %v228_v35, %v6703_v11  ;;  %5760 = vmatmul.mubr.msk.bf16.gmra.mrb[8].mxu0 %vm479_vm5, %v425_v32  ;;  %v399_v36 = vsel %vm335_vm9, 1.0, %v6421_v22  ;;  %1833 = vperm.xlu0 %6375, %v5263_v33   ;;  %v5178_v33 = vld [vmem:[%s8623_s0 + $0x2a8] sm:$0xff]  ;;  %v5177_v35 = vld [vmem:[%s8623_s0 + $0x2a0] sm:$0xff] }
  0xb0   :  { %v398_v37 = vsel %vm334_vm10, 1.0, %v6421_v22 }
  0xb1   :  { %v441_v39 = vpack.c.bf16 %v399_v36, %v398_v37  ;;  %v141_v41 = vpop.permute.xlu1 %140 }
  0xb2   :  { %v138_v42 = vpop.permute.xlu0 %137  ;;  %vm305_vm11 = vcmp.eq.s32.totalorder %v141_v41, %v6703_v11  ;;  %1008 = vperm.xlu1 %6376, %v5170_v38  }
  0xb3   :  { %vm304_vm12 = vcmp.eq.s32.totalorder %v138_v42, %v6703_v11  ;;  %5792 = vmatmul.mubr.msk.bf16.gmra.mrb[8].mxu1 %vm479_vm5, %v441_v39  ;;  %v369_v43 = vsel %vm305_vm11, 1.0, %v6421_v22  ;;  %1005 = vperm.xlu0 %6375, %v5169_v40   ;;  %v5274_v40 = vld [vmem:[%s8623_s0 + $0x4a8] sm:$0xff]  ;;  %v5273_v42 = vld [vmem:[%s8623_s0 + $0x4a0] sm:$0xff] }
  0xb4   :  { %v368_v44 = vsel %vm304_vm12, 1.0, %v6421_v22 }
  0xb5   :  { %v426_v46 = vpack.c.bf16 %v369_v43, %v368_v44  ;;  %v237_v48 = vpop.permute.xlu1 %236 }
  0xb6   :  { %v234_v49 = vpop.permute.xlu0 %233  ;;  %vm337_vm13 = vcmp.eq.s32.totalorder %v237_v48, %v6703_v11  ;;  %1842 = vperm.xlu1 %6376, %v5266_v45  }
  0xb7   :  { %vm336_vm14 = vcmp.eq.s32.totalorder %v234_v49, %v6703_v11  ;;  %5763 = vmatprep.mubr.msk.bf16.mxu0 %vm479_vm5, %v426_v46  ;;  %v401_v50 = vsel %vm337_vm13, 1.0, %v6421_v22  ;;  %1839 = vperm.xlu0 %6375, %v5265_v47   ;;  %v5180_v47 = vld [vmem:[%s8623_s0 + $0x2b8] sm:$0xff]  ;;  %v5179_v49 = vld [vmem:[%s8623_s0 + $0x2b0] sm:$0xff] }
  0xb8   :  { %v400_v51 = vsel %vm336_vm14, 1.0, %v6421_v22 }
  0xb9   :  { %v442_v53 = vpack.c.bf16 %v401_v50, %v400_v51  ;;  %v147_v13 = vpop.permute.xlu1 %146 }
  0xba   :  { %v144_v55 = vpop.permute.xlu0 %143  ;;  %vm307_vm15 = vcmp.eq.s32.totalorder %v147_v13, %v6703_v11  ;;  %1014 = vperm.xlu1 %6376, %v5172_v52  }
  0xbb   :  { %vm306_vm0 = vcmp.eq.s32.totalorder %v144_v55, %v6703_v11  ;;  %5795 = vmatprep.mubr.msk.bf16.mxu1 %vm479_vm5, %v442_v53  ;;  %v371_v56 = vsel %vm307_vm15, 1.0, %v6421_v22  ;;  %1011 = vperm.xlu0 %6375, %v5171_v54   ;;  %v5276_v54 = vld [vmem:[%s8623_s0 + $0x4b8] sm:$0xff]  ;;  %v5275_v55 = vld [vmem:[%s8623_s0 + $0x4b0] sm:$0xff] }
  0xbc   :  { %v370_v57 = vsel %vm306_vm0, 1.0, %v6421_v22 }
  0xbd   :  { %v427_v59 = vpack.c.bf16 %v371_v56, %v370_v57  ;;  %v243_v16 = vpop.permute.xlu1 %242 }
  0xbe   :  { %v240_v61 = vpop.permute.xlu0 %239  ;;  %vm339_vm1 = vcmp.eq.s32.totalorder %v243_v16, %v6703_v11  ;;  %1848 = vperm.xlu1 %6376, %v5268_v58  }
  0xbf   :  { %vm338_vm2 = vcmp.eq.s32.totalorder %v240_v61, %v6703_v11  ;;  %5764 = vmatmul.mubr.msk.bf16.gmra.mrb[12].mxu0 %vm479_vm5, %v427_v59  ;;  %v403_v62 = vsel %vm339_vm1, 1.0, %v6421_v22  ;;  %1845 = vperm.xlu0 %6375, %v5267_v60   ;;  %v5182_v60 = vld [vmem:[%s8623_s0 + $0x2c8] sm:$0xff]  ;;  %v5181_v61 = vld [vmem:[%s8623_s0 + $0x2c0] sm:$0xff] }
  0xc0   :  { %v402_v63 = vsel %vm338_vm2, 1.0, %v6421_v22 }
  0xc1   :  { %v443_v1 = vpack.c.bf16 %v403_v62, %v402_v63  ;;  %v153_v17 = vpop.permute.xlu1 %152 }
  0xc2   :  { %v150_v3 = vpop.permute.xlu0 %149  ;;  %vm309_vm3 = vcmp.eq.s32.totalorder %v153_v17, %v6703_v11  ;;  %1020 = vperm.xlu1 %6376, %v5174_v0  }
  0xc3   :  { %vm308_vm4 = vcmp.eq.s32.totalorder %v150_v3, %v6703_v11  ;;  %5796 = vmatmul.mubr.msk.bf16.gmra.mrb[12].mxu1 %vm479_vm5, %v443_v1  ;;  %v373_v4 = vsel %vm309_vm3, 1.0, %v6421_v22  ;;  %1017 = vperm.xlu0 %6375, %v5173_v2   ;;  %v5278_v2 = vld [vmem:[%s8623_s0 + $0x4c8] sm:$0xff]  ;;  %v5277_v3 = vld [vmem:[%s8623_s0 + $0x4c0] sm:$0xff] }
  0xc4   :  { %v372_v5 = vsel %vm308_vm4, 1.0, %v6421_v22 }
  0xc5   :  { %v428_v7 = vpack.c.bf16 %v373_v4, %v372_v5  ;;  %v249_v21 = vpop.permute.xlu1 %248 }
  0xc6   :  { %v246_v10 = vpop.permute.xlu0 %245  ;;  %vm341_vm6 = vcmp.eq.s32.totalorder %v249_v21, %v6703_v11  ;;  %1854 = vperm.xlu1 %6376, %v5270_v6  }
  0xc7   :  { %vm340_vm7 = vcmp.eq.s32.totalorder %v246_v10, %v6703_v11  ;;  %5767 = vmatprep.mubr.msk.bf16.mxu0 %vm479_vm5, %v428_v7  ;;  %v405_v12 = vsel %vm341_vm6, 1.0, %v6421_v22  ;;  %1851 = vperm.xlu0 %6375, %v5269_v9   ;;  %v5184_v9 = vld [vmem:[%s8623_s0 + $0x2d8] sm:$0xff]  ;;  %v5183_v10 = vld [vmem:[%s8623_s0 + $0x2d0] sm:$0xff] }
  0xc8   :  { %v404_v14 = vsel %vm340_vm7, 1.0, %v6421_v22 }
  0xc9   :  { %v444_v18 = vpack.c.bf16 %v405_v12, %v404_v14  ;;  %v159_v20 = vpop.permute.xlu1 %158 }
  0xca   :  { %v156_v23 = vpop.permute.xlu0 %155  ;;  %vm311_vm8 = vcmp.eq.s32.totalorder %v159_v20, %v6703_v11  ;;  %1026 = vperm.xlu1 %6376, %v5176_v15  }
  0xcb   :  { %vm310_vm9 = vcmp.eq.s32.totalorder %v156_v23, %v6703_v11  ;;  %5799 = vmatprep.mubr.msk.bf16.mxu1 %vm479_vm5, %v444_v18  ;;  %v375_v25 = vsel %vm311_vm8, 1.0, %v6421_v22  ;;  %1023 = vperm.xlu0 %6375, %v5175_v19   ;;  %v5280_v19 = vld [vmem:[%s8623_s0 + $0x4d8] sm:$0xff]  ;;  %v5279_v23 = vld [vmem:[%s8623_s0 + $0x4d0] sm:$0xff] }
  0xcc   :  { %v374_v24 = vsel %vm310_vm9, 1.0, %v6421_v22 }
  0xcd   :  { %v429_v27 = vpack.c.bf16 %v375_v25, %v374_v24  ;;  %v255_v29 = vpop.permute.xlu1 %254 }
  0xce   :  { %v252_v30 = vpop.permute.xlu0 %251  ;;  %vm343_vm10 = vcmp.eq.s32.totalorder %v255_v29, %v6703_v11  ;;  %1860 = vperm.xlu1 %6376, %v5272_v26  }
  0xcf   :  { %vm342_vm11 = vcmp.eq.s32.totalorder %v252_v30, %v6703_v11  ;;  %5768 = vmatmul.mubr.msk.bf16.gmra.mrb[16].mxu0 %vm479_vm5, %v429_v27  ;;  %v407_v31 = vsel %vm343_vm10, 1.0, %v6421_v22  ;;  %1857 = vperm.xlu0 %6375, %v5271_v28   ;;  %v5186_v28 = vld [vmem:[%s8623_s0 + $0x2e8] sm:$0xff]  ;;  %v5185_v30 = vld [vmem:[%s8623_s0 + $0x2e0] sm:$0xff] }
  0xd0   :  { %v406_v32 = vsel %vm342_vm11, 1.0, %v6421_v22 }
  0xd1   :  { %v445_v34 = vpack.c.bf16 %v407_v31, %v406_v32  ;;  %v165_v36 = vpop.permute.xlu1 %164 }
  0xd2   :  { %v162_v37 = vpop.permute.xlu0 %161  ;;  %vm313_vm12 = vcmp.eq.s32.totalorder %v165_v36, %v6703_v11  ;;  %1032 = vperm.xlu1 %6376, %v5178_v33  }
  0xd3   :  { %vm312_vm13 = vcmp.eq.s32.totalorder %v162_v37, %v6703_v11  ;;  %5800 = vmatmul.mubr.msk.bf16.gmra.mrb[16].mxu1 %vm479_vm5, %v445_v34  ;;  %v377_v38 = vsel %vm313_vm12, 1.0, %v6421_v22  ;;  %1029 = vperm.xlu0 %6375, %v5177_v35   ;;  %v5282_v35 = vld [vmem:[%s8623_s0 + $0x4e8] sm:$0xff]  ;;  %v5281_v37 = vld [vmem:[%s8623_s0 + $0x4e0] sm:$0xff] }
  0xd4   :  { %v376_v39 = vsel %vm312_vm13, 1.0, %v6421_v22 }
  0xd5   :  { %v430_v41 = vpack.c.bf16 %v377_v38, %v376_v39  ;;  %v261_v43 = vpop.permute.xlu1 %260 }
  0xd6   :  { %v258_v44 = vpop.permute.xlu0 %257  ;;  %vm345_vm14 = vcmp.eq.s32.totalorder %v261_v43, %v6703_v11  ;;  %1866 = vperm.xlu1 %6376, %v5274_v40  }
  0xd7   :  { %vm344_vm15 = vcmp.eq.s32.totalorder %v258_v44, %v6703_v11  ;;  %5771 = vmatprep.mubr.msk.bf16.mxu0 %vm479_vm5, %v430_v41  ;;  %v409_v45 = vsel %vm345_vm14, 1.0, %v6421_v22  ;;  %1863 = vperm.xlu0 %6375, %v5273_v42   ;;  %v5188_v42 = vld [vmem:[%s8623_s0 + $0x2f8] sm:$0xff]  ;;  %v5187_v44 = vld [vmem:[%s8623_s0 + $0x2f0] sm:$0xff] }
  0xd8   :  { %v408_v46 = vsel %vm344_vm15, 1.0, %v6421_v22 }
  0xd9   :  { %v446_v48 = vpack.c.bf16 %v409_v45, %v408_v46  ;;  %v171_v50 = vpop.permute.xlu1 %170 }
  0xda   :  { %v168_v51 = vpop.permute.xlu0 %167  ;;  %vm315_vm0 = vcmp.eq.s32.totalorder %v171_v50, %v6703_v11  ;;  %1038 = vperm.xlu1 %6376, %v5180_v47  }
  0xdb   :  { %vm314_vm1 = vcmp.eq.s32.totalorder %v168_v51, %v6703_v11  ;;  %5803 = vmatprep.mubr.msk.bf16.mxu1 %vm479_vm5, %v446_v48  ;;  %v379_v52 = vsel %vm315_vm0, 1.0, %v6421_v22  ;;  %1035 = vperm.xlu0 %6375, %v5179_v49   ;;  %v5284_v49 = vld [vmem:[%s8623_s0 + $0x4f8] sm:$0xff]  ;;  %v5283_v51 = vld [vmem:[%s8623_s0 + $0x4f0] sm:$0xff] }
  0xdc   :  { %v378_v53 = vsel %vm314_vm1, 1.0, %v6421_v22 }
  0xdd   :  { %v431_v13 = vpack.c.bf16 %v379_v52, %v378_v53  ;;  %v267_v56 = vpop.permute.xlu1 %266 }
  0xde   :  { %v264_v57 = vpop.permute.xlu0 %263  ;;  %vm347_vm2 = vcmp.eq.s32.totalorder %v267_v56, %v6703_v11  ;;  %1872 = vperm.xlu1 %6376, %v5276_v54  }
  0xdf   :  { %vm346_vm3 = vcmp.eq.s32.totalorder %v264_v57, %v6703_v11  ;;  %5772 = vmatmul.mubr.msk.bf16.gmra.mrb[20].mxu0 %vm479_vm5, %v431_v13  ;;  %v411_v58 = vsel %vm347_vm2, 1.0, %v6421_v22  ;;  %1869 = vperm.xlu0 %6375, %v5275_v55   ;;  %v5190_v55 = vld [vmem:[%s8623_s0 + $0x308] sm:$0xff]  ;;  %v5189_v57 = vld [vmem:[%s8623_s0 + $0x300] sm:$0xff] }
  0xe0   :  { %v410_v59 = vsel %vm346_vm3, 1.0, %v6421_v22 }
  0xe1   :  { %v447_v16 = vpack.c.bf16 %v411_v58, %v410_v59  ;;  %v177_v62 = vpop.permute.xlu1 %176 }
  0xe2   :  { %v174_v63 = vpop.permute.xlu0 %173  ;;  %vm317_vm4 = vcmp.eq.s32.totalorder %v177_v62, %v6703_v11  ;;  %1044 = vperm.xlu1 %6376, %v5182_v60  }
  0xe3   :  { %vm316_vm6 = vcmp.eq.s32.totalorder %v174_v63, %v6703_v11  ;;  %5804 = vmatmul.mubr.msk.bf16.gmra.mrb[20].mxu1 %vm479_vm5, %v447_v16  ;;  %v381_v0 = vsel %vm317_vm4, 1.0, %v6421_v22  ;;  %1041 = vperm.xlu0 %6375, %v5181_v61   ;;  %v5286_v61 = vld [vmem:[%s8623_s0 + $0x508] sm:$0xff]  ;;  %v5285_v63 = vld [vmem:[%s8623_s0 + $0x500] sm:$0xff] }
  0xe4   :  { %v380_v1 = vsel %vm316_vm6, 1.0, %v6421_v22 }
  0xe5   :  { %v432_v17 = vpack.c.bf16 %v381_v0, %v380_v1  ;;  %v273_v4 = vpop.permute.xlu1 %272 }
  0xe6   :  { %v270_v5 = vpop.permute.xlu0 %269  ;;  %vm349_vm7 = vcmp.eq.s32.totalorder %v273_v4, %v6703_v11  ;;  %1878 = vperm.xlu1 %6376, %v5278_v2  }
  0xe7   :  { %vm348_vm8 = vcmp.eq.s32.totalorder %v270_v5, %v6703_v11  ;;  %5775 = vmatprep.mubr.msk.bf16.mxu0 %vm479_vm5, %v432_v17  ;;  %v413_v6 = vsel %vm349_vm7, 1.0, %v6421_v22  ;;  %1875 = vperm.xlu0 %6375, %v5277_v3   ;;  %v5192_v3 = vld [vmem:[%s8623_s0 + $0x318] sm:$0xff]  ;;  %v5191_v5 = vld [vmem:[%s8623_s0 + $0x310] sm:$0xff] }
  0xe8   :  { %v412_v7 = vsel %vm348_vm8, 1.0, %v6421_v22 }
  0xe9   :  { %v448_v21 = vpack.c.bf16 %v413_v6, %v412_v7  ;;  %v183_v12 = vpop.permute.xlu1 %182 }
  0xea   :  { %v180_v14 = vpop.permute.xlu0 %179  ;;  %vm319_vm9 = vcmp.eq.s32.totalorder %v183_v12, %v6703_v11  ;;  %1050 = vperm.xlu1 %6376, %v5184_v9   ;;  %v5287_v12 = vld [vmem:[%s8623_s0 + $0x510] sm:$0xff] }
  0xeb   :  { %vm318_vm10 = vcmp.eq.s32.totalorder %v180_v14, %v6703_v11  ;;  %5807 = vmatprep.mubr.msk.bf16.mxu1 %vm479_vm5, %v448_v21  ;;  %v383_v15 = vsel %vm319_vm9, 1.0, %v6421_v22  ;;  %1047 = vperm.xlu0 %6375, %v5183_v10   ;;  %v5288_v21 = vld [vmem:[%s8623_s0 + $0x518] sm:$0xff] }
  0xec   :  { %v382_v18 = vsel %vm318_vm10, 1.0, %v6421_v22 }
  0xed   :  { %v433_v20 = vpack.c.bf16 %v383_v15, %v382_v18  ;;  %v279_v25 = vpop.permute.xlu1 %278 }
  0xee   :  { %v276_v24 = vpop.permute.xlu0 %275  ;;  %vm351_vm11 = vcmp.eq.s32.totalorder %v279_v25, %v6703_v11  ;;  %1884 = vperm.xlu1 %6376, %v5280_v19   ;;  %v5193_v25 = vld [vmem:[%s8623_s0 + $0x320] sm:$0xff] }
  0xef   :  { %vm350_vm12 = vcmp.eq.s32.totalorder %v276_v24, %v6703_v11  ;;  %5776 = vmatmul.mubr.msk.bf16.gmra.mrb[24].mxu0 %vm479_vm5, %v433_v20  ;;  %v415_v26 = vsel %vm351_vm11, 1.0, %v6421_v22  ;;  %1881 = vperm.xlu0 %6375, %v5279_v23   ;;  %v5194_v20 = vld [vmem:[%s8623_s0 + $0x328] sm:$0xff] }
  0xf0   :  { %v414_v27 = vsel %vm350_vm12, 1.0, %v6421_v22 }
  0xf1   :  { %v449_v29 = vpack.c.bf16 %v415_v26, %v414_v27  ;;  %v189_v31 = vpop.permute.xlu1 %188 }
  0xf2   :  { %v186_v32 = vpop.permute.xlu0 %185  ;;  %vm321_vm13 = vcmp.eq.s32.totalorder %v189_v31, %v6703_v11  ;;  %1056 = vperm.xlu1 %6376, %v5186_v28   ;;  %v5289_v31 = vld [vmem:[%s8623_s0 + $0x520] sm:$0xff] }
  0xf3   :  { %vm320_vm14 = vcmp.eq.s32.totalorder %v186_v32, %v6703_v11  ;;  %5808 = vmatmul.mubr.msk.bf16.gmra.mrb[24].mxu1 %vm479_vm5, %v449_v29  ;;  %v385_v33 = vsel %vm321_vm13, 1.0, %v6421_v22  ;;  %1053 = vperm.xlu0 %6375, %v5185_v30   ;;  %v5290_v29 = vld [vmem:[%s8623_s0 + $0x528] sm:$0xff] }
  0xf4   :  { %v384_v34 = vsel %vm320_vm14, 1.0, %v6421_v22 }
  0xf5   :  { %v434_v36 = vpack.c.bf16 %v385_v33, %v384_v34  ;;  %v285_v38 = vpop.permute.xlu1 %284 }
  0xf6   :  { %v282_v39 = vpop.permute.xlu0 %281  ;;  %vm353_vm15 = vcmp.eq.s32.totalorder %v285_v38, %v6703_v11  ;;  %1890 = vperm.xlu1 %6376, %v5282_v35   ;;  %v5195_v38 = vld [vmem:[%s8623_s0 + $0x330] sm:$0xff] }
  0xf7   :  { %vm352_vm0 = vcmp.eq.s32.totalorder %v282_v39, %v6703_v11  ;;  %5779 = vmatprep.mubr.msk.bf16.mxu0 %vm479_vm5, %v434_v36  ;;  %v417_v40 = vsel %vm353_vm15, 1.0, %v6421_v22  ;;  %1887 = vperm.xlu0 %6375, %v5281_v37   ;;  %v5196_v36 = vld [vmem:[%s8623_s0 + $0x338] sm:$0xff] }
  0xf8   :  { %v416_v41 = vsel %vm352_vm0, 1.0, %v6421_v22 }
  0xf9   :  { %v450_v43 = vpack.c.bf16 %v417_v40, %v416_v41  ;;  %v195_v45 = vpop.permute.xlu1 %194 }
  0xfa   :  { %v192_v46 = vpop.permute.xlu0 %191  ;;  %vm323_vm1 = vcmp.eq.s32.totalorder %v195_v45, %v6703_v11  ;;  %1062 = vperm.xlu1 %6376, %v5188_v42   ;;  %v5291_v45 = vld [vmem:[%s8623_s0 + $0x530] sm:$0xff] }
  0xfb   :  { %vm322_vm2 = vcmp.eq.s32.totalorder %v192_v46, %v6703_v11  ;;  %5811 = vmatprep.mubr.msk.bf16.mxu1 %vm479_vm5, %v450_v43  ;;  %v387_v47 = vsel %vm323_vm1, 1.0, %v6421_v22  ;;  %1059 = vperm.xlu0 %6375, %v5187_v44   ;;  %v5292_v43 = vld [vmem:[%s8623_s0 + $0x538] sm:$0xff] }
  0xfc   :  { %v386_v48 = vsel %vm322_vm2, 1.0, %v6421_v22 }
  0xfd   :  { %v435_v50 = vpack.c.bf16 %v387_v47, %v386_v48  ;;  %v291_v52 = vpop.permute.xlu1 %290 }
  0xfe   :  { %v288_v53 = vpop.permute.xlu0 %287  ;;  %vm355_vm3 = vcmp.eq.s32.totalorder %v291_v52, %v6703_v11  ;;  %1896 = vperm.xlu1 %6376, %v5284_v49   ;;  %v5197_v52 = vld [vmem:[%s8623_s0 + $0x340] sm:$0xff] }
  0xff   :  { %vm354_vm4 = vcmp.eq.s32.totalorder %v288_v53, %v6703_v11  ;;  %5780 = vmatmul.mubr.msk.bf16.gmra.mrb[28].mxu0 %vm479_vm5, %v435_v50  ;;  %v419_v54 = vsel %vm355_vm3, 1.0, %v6421_v22  ;;  %1893 = vperm.xlu0 %6375, %v5283_v51   ;;  %v5198_v50 = vld [vmem:[%s8623_s0 + $0x348] sm:$0xff] }
 0x100   :  { %v418_v13 = vsel %vm354_vm4, 1.0, %v6421_v22 }
 0x101   :  { %v451_v56 = vpack.c.bf16 %v419_v54, %v418_v13  ;;  %v973_v58 = vpop.permute.xlu1 %972 }
 0x102   :  { %v970_v59 = vpop.permute.xlu0 %969  ;;  %vm1161_vm6 = vcmp.eq.s32.totalorder %v973_v58, %v6703_v11  ;;  %1068 = vperm.xlu1 %6376, %v5190_v55   ;;  %v5293_v58 = vld [vmem:[%s8623_s0 + $0x540] sm:$0xff] }
 0x103   :  { %vm1160_vm7 = vcmp.eq.s32.totalorder %v970_v59, %v6703_v11  ;;  %5812 = vmatmul.mubr.msk.bf16.gmra.mrb[28].mxu1 %vm479_vm5, %v451_v56  ;;  %v1225_v60 = vsel %vm1161_vm6, 1.0, %v6421_v22  ;;  %1065 = vperm.xlu0 %6375, %v5189_v57   ;;  %v5294_v56 = vld [vmem:[%s8623_s0 + $0x548] sm:$0xff] }
 0x104   :  { %v1224_v16 = vsel %vm1160_vm7, 1.0, %v6421_v22 }
 0x105   :  { %v1288_v62 = vpack.c.bf16 %v1225_v60, %v1224_v16  ;;  %v1807_v0 = vpop.permute.xlu1 %1806 }
 0x106   :  { %v1804_v1 = vpop.permute.xlu0 %1803  ;;  %vm1995_vm8 = vcmp.eq.s32.totalorder %v1807_v0, %v6703_v11  ;;  %1902 = vperm.xlu1 %6376, %v5286_v61   ;;  %v5199_v0 = vld [vmem:[%s8623_s0 + $0x350] sm:$0xff] }
 0x107   :  { %vm1994_vm9 = vcmp.eq.s32.totalorder %v1804_v1, %v6703_v11  ;;  %5825 = vmatprep.mubr.msk.bf16.mxu1 %vm479_vm5, %v1288_v62  ;;  %v2059_v2 = vsel %vm1995_vm8, 1.0, %v6421_v22  ;;  %1899 = vperm.xlu0 %6375, %v5285_v63   ;;  %v5200_v62 = vld [vmem:[%s8623_s0 + $0x358] sm:$0xff] }
 0x108   :  { %v2058_v17 = vsel %vm1994_vm9, 1.0, %v6421_v22 }
 0x109   :  { %v2122_v4 = vpack.c.bf16 %v2059_v2, %v2058_v17  ;;  %v979_v6 = vpop.permute.xlu1 %978 }
 0x10a   :  { %vm1163_vm10 = vcmp.eq.s32.totalorder %v979_v6, %v6703_v11  ;;  %v976_v7 = vpop.permute.xlu0 %975  ;;  %1074 = vperm.xlu1 %6376, %v5192_v3   ;;  %v5295_v6 = vld [vmem:[%s8623_s0 + $0x550] sm:$0xff] }
 0x10b   :  { %5899 = vmatprep.mubr.msk.bf16.mxu0 %vm479_vm5, %v2122_v4  ;;  %v1227_v9 = vsel %vm1163_vm10, 1.0, %v6421_v22  ;;  %vm1162_vm11 = vcmp.eq.s32.totalorder %v976_v7, %v6703_v11  ;;  %1071 = vperm.xlu0 %6375, %v5191_v5   ;;  %v5296_v4 = vld [vmem:[%s8623_s0 + $0x558] sm:$0xff] }
 0x10c   :  { %v1226_v10 = vsel %vm1162_vm11, 1.0, %v6421_v22 }
 0x10d   :  { %v1289_v14 = vpack.c.bf16 %v1227_v9, %v1226_v10  ;;  %v1813_v15 = vpop.permute.xlu1 %1812 }
 0x10e   :  { %vm1997_vm12 = vcmp.eq.s32.totalorder %v1813_v15, %v6703_v11  ;;  %v1810_v18 = vpop.permute.xlu0 %1809  ;;  %1908 = vperm.xlu1 %6376, %v5288_v21   ;;  %v5201_v15 = vld [vmem:[%s8623_s0 + $0x360] sm:$0xff] }
 0x10f   :  { %v2061_v19 = vsel %vm1997_vm12, 1.0, %v6421_v22  ;;  %vm1996_vm13 = vcmp.eq.s32.totalorder %v1810_v18, %v6703_v11  ;;  %1905 = vperm.xlu0 %6375, %v5287_v12   ;;  %5826 = vmatmul.mubr.msk.bf16.vlgmr.msra.gmra.mrb[32].mxu1 %vm479_vm5, %v1289_v14  ;;  %v5202_v12 = vld [vmem:[%s8623_s0 + $0x368] sm:$0xff] }
 0x110   :  { %v2060_v23 = vsel %vm1996_vm13, 1.0, %v6421_v22 }
 0x111   :  { %v2123_v24 = vpack.c.bf16 %v2061_v19, %v2060_v23  ;;  %v985_v26 = vpop.permute.xlu1 %984 }
 0x112   :  { %vm1165_vm14 = vcmp.eq.s32.totalorder %v985_v26, %v6703_v11  ;;  %v982_v27 = vpop.permute.xlu0 %981  ;;  %1080 = vperm.xlu1 %6376, %v5194_v20   ;;  %v5297_v26 = vld [vmem:[%s8623_s0 + $0x560] sm:$0xff] }
 0x113   :  { %v1229_v28 = vsel %vm1165_vm14, 1.0, %v6421_v22  ;;  %vm1164_vm15 = vcmp.eq.s32.totalorder %v982_v27, %v6703_v11  ;;  %1077 = vperm.xlu0 %6375, %v5193_v25   ;;  %5900 = vmatmul.mubr.msk.bf16.vlgmr.msra.gmra.mrb[32].mxu0 %vm479_vm5, %v2123_v24  ;;  %v5298_v25 = vld [vmem:[%s8623_s0 + $0x568] sm:$0xff] }
 0x114   :  { %v1228_v30 = vsel %vm1164_vm15, 1.0, %v6421_v22 }
 0x115   :  { %v1290_v32 = vpack.c.bf16 %v1229_v28, %v1228_v30  ;;  %v1819_v33 = vpop.permute.xlu1 %1818 }
 0x116   :  { %vm1999_vm0 = vcmp.eq.s32.totalorder %v1819_v33, %v6703_v11  ;;  %v1816_v34 = vpop.permute.xlu0 %1815  ;;  %1914 = vperm.xlu1 %6376, %v5290_v29   ;;  %v5203_v33 = vld [vmem:[%s8623_s0 + $0x370] sm:$0xff] }
 0x117   :  { %v2063_v35 = vsel %vm1999_vm0, 1.0, %v6421_v22  ;;  %vm1998_vm1 = vcmp.eq.s32.totalorder %v1816_v34, %v6703_v11  ;;  %1911 = vperm.xlu0 %6375, %v5289_v31   ;;  %5829 = vmatprep.mubr.msk.bf16.mxu1 %vm479_vm5, %v1290_v32  ;;  %v5204_v31 = vld [vmem:[%s8623_s0 + $0x378] sm:$0xff] }
 0x118   :  { %v2062_v37 = vsel %vm1998_vm1, 1.0, %v6421_v22 }
 0x119   :  { %v2124_v39 = vpack.c.bf16 %v2063_v35, %v2062_v37  ;;  %v991_v40 = vpop.permute.xlu1 %990 }
 0x11a   :  { %vm1167_vm2 = vcmp.eq.s32.totalorder %v991_v40, %v6703_v11  ;;  %v988_v41 = vpop.permute.xlu0 %987  ;;  %1086 = vperm.xlu1 %6376, %v5196_v36   ;;  %v5299_v40 = vld [vmem:[%s8623_s0 + $0x570] sm:$0xff] }
 0x11b   :  { %v1231_v42 = vsel %vm1167_vm2, 1.0, %v6421_v22  ;;  %vm1166_vm3 = vcmp.eq.s32.totalorder %v988_v41, %v6703_v11  ;;  %1083 = vperm.xlu0 %6375, %v5195_v38   ;;  %5903 = vmatprep.mubr.msk.bf16.mxu0 %vm479_vm5, %v2124_v39  ;;  %v5300_v38 = vld [vmem:[%s8623_s0 + $0x578] sm:$0xff] }
 0x11c   :  { %v1230_v44 = vsel %vm1166_vm3, 1.0, %v6421_v22 }
 0x11d   :  { %v1291_v46 = vpack.c.bf16 %v1231_v42, %v1230_v44  ;;  %v1825_v47 = vpop.permute.xlu1 %1824 }
 0x11e   :  { %vm2001_vm4 = vcmp.eq.s32.totalorder %v1825_v47, %v6703_v11  ;;  %v1822_v48 = vpop.permute.xlu0 %1821  ;;  %1920 = vperm.xlu1 %6376, %v5292_v43   ;;  %v5205_v47 = vld [vmem:[%s8623_s0 + $0x380] sm:$0xff] }
 0x11f   :  { %v2065_v49 = vsel %vm2001_vm4, 1.0, %v6421_v22  ;;  %vm2000_vm6 = vcmp.eq.s32.totalorder %v1822_v48, %v6703_v11  ;;  %1917 = vperm.xlu0 %6375, %v5291_v45   ;;  %5830 = vmatmul.mubr.msk.bf16.gmra.mrb[36].mxu1 %vm479_vm5, %v1291_v46  ;;  %v5206_v45 = vld [vmem:[%s8623_s0 + $0x388] sm:$0xff] }
 0x120   :  { %v2064_v51 = vsel %vm2000_vm6, 1.0, %v6421_v22 }
 0x121   :  { %v2125_v53 = vpack.c.bf16 %v2065_v49, %v2064_v51  ;;  %v997_v54 = vpop.permute.xlu1 %996 }
 0x122   :  { %vm1169_vm7 = vcmp.eq.s32.totalorder %v997_v54, %v6703_v11  ;;  %v994_v13 = vpop.permute.xlu0 %993  ;;  %1092 = vperm.xlu1 %6376, %v5198_v50   ;;  %v5301_v54 = vld [vmem:[%s8623_s0 + $0x580] sm:$0xff] }
 0x123   :  { %v1233_v55 = vsel %vm1169_vm7, 1.0, %v6421_v22  ;;  %vm1168_vm8 = vcmp.eq.s32.totalorder %v994_v13, %v6703_v11  ;;  %1089 = vperm.xlu0 %6375, %v5197_v52   ;;  %5904 = vmatmul.mubr.msk.bf16.gmra.mrb[36].mxu0 %vm479_vm5, %v2125_v53  ;;  %v5302_v52 = vld [vmem:[%s8623_s0 + $0x588] sm:$0xff] }
 0x124   :  { %v1232_v57 = vsel %vm1168_vm8, 1.0, %v6421_v22 }
 0x125   :  { %v1292_v59 = vpack.c.bf16 %v1233_v55, %v1232_v57  ;;  %v1831_v60 = vpop.permute.xlu1 %1830 }
 0x126   :  { %vm2003_vm9 = vcmp.eq.s32.totalorder %v1831_v60, %v6703_v11  ;;  %v1828_v16 = vpop.permute.xlu0 %1827  ;;  %1926 = vperm.xlu1 %6376, %v5294_v56   ;;  %v5207_v60 = vld [vmem:[%s8623_s0 + $0x390] sm:$0xff] }
 0x127   :  { %v2067_v61 = vsel %vm2003_vm9, 1.0, %v6421_v22  ;;  %vm2002_vm10 = vcmp.eq.s32.totalorder %v1828_v16, %v6703_v11  ;;  %1923 = vperm.xlu0 %6375, %v5293_v58   ;;  %5833 = vmatprep.mubr.msk.bf16.mxu1 %vm479_vm5, %v1292_v59  ;;  %v5208_v58 = vld [vmem:[%s8623_s0 + $0x398] sm:$0xff] }
 0x128   :  { %v2066_v63 = vsel %vm2002_vm10, 1.0, %v6421_v22 }
 0x129   :  { %v2126_v1 = vpack.c.bf16 %v2067_v61, %v2066_v63  ;;  %v1003_v2 = vpop.permute.xlu1 %1002 }
 0x12a   :  { %vm1171_vm11 = vcmp.eq.s32.totalorder %v1003_v2, %v6703_v11  ;;  %v1000_v17 = vpop.permute.xlu0 %999  ;;  %1098 = vperm.xlu1 %6376, %v5200_v62   ;;  %v5303_v2 = vld [vmem:[%s8623_s0 + $0x590] sm:$0xff] }
 0x12b   :  { %v1235_v3 = vsel %vm1171_vm11, 1.0, %v6421_v22  ;;  %vm1170_vm12 = vcmp.eq.s32.totalorder %v1000_v17, %v6703_v11  ;;  %1095 = vperm.xlu0 %6375, %v5199_v0   ;;  %5907 = vmatprep.mubr.msk.bf16.mxu0 %vm479_vm5, %v2126_v1  ;;  %v5304_v0 = vld [vmem:[%s8623_s0 + $0x598] sm:$0xff] }
 0x12c   :  { %v1234_v5 = vsel %vm1170_vm12, 1.0, %v6421_v22 }
 0x12d   :  { %v1293_v7 = vpack.c.bf16 %v1235_v3, %v1234_v5  ;;  %v1837_v9 = vpop.permute.xlu1 %1836 }
 0x12e   :  { %vm2005_vm13 = vcmp.eq.s32.totalorder %v1837_v9, %v6703_v11  ;;  %v1834_v21 = vpop.permute.xlu0 %1833  ;;  %1932 = vperm.xlu1 %6376, %v5296_v4   ;;  %v5209_v9 = vld [vmem:[%s8623_s0 + $0x3a0] sm:$0xff] }
 0x12f   :  { %v2069_v10 = vsel %vm2005_vm13, 1.0, %v6421_v22  ;;  %vm2004_vm14 = vcmp.eq.s32.totalorder %v1834_v21, %v6703_v11  ;;  %1929 = vperm.xlu0 %6375, %v5295_v6   ;;  %5834 = vmatmul.mubr.msk.bf16.gmra.mrb[40].mxu1 %vm479_vm5, %v1293_v7  ;;  %v5210_v6 = vld [vmem:[%s8623_s0 + $0x3a8] sm:$0xff] }
 0x130   :  { %v2068_v14 = vsel %vm2004_vm14, 1.0, %v6421_v22 }
 0x131   :  { %v2127_v18 = vpack.c.bf16 %v2069_v10, %v2068_v14  ;;  %v1009_v19 = vpop.permute.xlu1 %1008 }
 0x132   :  { %vm1173_vm15 = vcmp.eq.s32.totalorder %v1009_v19, %v6703_v11  ;;  %v1006_v20 = vpop.permute.xlu0 %1005  ;;  %1104 = vperm.xlu1 %6376, %v5202_v12   ;;  %v5305_v19 = vld [vmem:[%s8623_s0 + $0x5a0] sm:$0xff] }
 0x133   :  { %v1237_v23 = vsel %vm1173_vm15, 1.0, %v6421_v22  ;;  %vm1172_vm0 = vcmp.eq.s32.totalorder %v1006_v20, %v6703_v11  ;;  %1101 = vperm.xlu0 %6375, %v5201_v15   ;;  %5908 = vmatmul.mubr.msk.bf16.gmra.mrb[40].mxu0 %vm479_vm5, %v2127_v18  ;;  %v5306_v15 = vld [vmem:[%s8623_s0 + $0x5a8] sm:$0xff] }
 0x134   :  { %v1236_v24 = vsel %vm1172_vm0, 1.0, %v6421_v22 }
 0x135   :  { %v1294_v27 = vpack.c.bf16 %v1237_v23, %v1236_v24  ;;  %v1843_v28 = vpop.permute.xlu1 %1842 }
 0x136   :  { %vm2007_vm1 = vcmp.eq.s32.totalorder %v1843_v28, %v6703_v11  ;;  %v1840_v29 = vpop.permute.xlu0 %1839  ;;  %1938 = vperm.xlu1 %6376, %v5298_v25   ;;  %v5211_v28 = vld [vmem:[%s8623_s0 + $0x3b0] sm:$0xff] }
 0x137   :  { %v2071_v30 = vsel %vm2007_vm1, 1.0, %v6421_v22  ;;  %vm2006_vm2 = vcmp.eq.s32.totalorder %v1840_v29, %v6703_v11  ;;  %1935 = vperm.xlu0 %6375, %v5297_v26   ;;  %5837 = vmatprep.mubr.msk.bf16.mxu1 %vm479_vm5, %v1294_v27  ;;  %v5212_v26 = vld [vmem:[%s8623_s0 + $0x3b8] sm:$0xff] }
 0x138   :  { %v2070_v32 = vsel %vm2006_vm2, 1.0, %v6421_v22 }
 0x139   :  { %v2128_v34 = vpack.c.bf16 %v2071_v30, %v2070_v32  ;;  %v1015_v35 = vpop.permute.xlu1 %1014 }
 0x13a   :  { %vm1175_vm3 = vcmp.eq.s32.totalorder %v1015_v35, %v6703_v11  ;;  %v1012_v36 = vpop.permute.xlu0 %1011  ;;  %1110 = vperm.xlu1 %6376, %v5204_v31   ;;  %v5307_v35 = vld [vmem:[%s8623_s0 + $0x5b0] sm:$0xff] }
 0x13b   :  { %v1239_v37 = vsel %vm1175_vm3, 1.0, %v6421_v22  ;;  %vm1174_vm4 = vcmp.eq.s32.totalorder %v1012_v36, %v6703_v11  ;;  %1107 = vperm.xlu0 %6375, %v5203_v33   ;;  %5911 = vmatprep.mubr.msk.bf16.mxu0 %vm479_vm5, %v2128_v34  ;;  %v5308_v33 = vld [vmem:[%s8623_s0 + $0x5b8] sm:$0xff] }
 0x13c   :  { %v1238_v39 = vsel %vm1174_vm4, 1.0, %v6421_v22 }
 0x13d   :  { %v1295_v41 = vpack.c.bf16 %v1239_v37, %v1238_v39  ;;  %v1849_v42 = vpop.permute.xlu1 %1848 }
 0x13e   :  { %vm2009_vm6 = vcmp.eq.s32.totalorder %v1849_v42, %v6703_v11  ;;  %v1846_v43 = vpop.permute.xlu0 %1845  ;;  %1944 = vperm.xlu1 %6376, %v5300_v38   ;;  %v5213_v42 = vld [vmem:[%s8623_s0 + $0x3c0] sm:$0xff] }
 0x13f   :  { %v2073_v44 = vsel %vm2009_vm6, 1.0, %v6421_v22  ;;  %vm2008_vm7 = vcmp.eq.s32.totalorder %v1846_v43, %v6703_v11  ;;  %1941 = vperm.xlu0 %6375, %v5299_v40   ;;  %5838 = vmatmul.mubr.msk.bf16.gmra.mrb[44].mxu1 %vm479_vm5, %v1295_v41  ;;  %v5214_v40 = vld [vmem:[%s8623_s0 + $0x3c8] sm:$0xff] }
 0x140   :  { %v2072_v46 = vsel %vm2008_vm7, 1.0, %v6421_v22 }
 0x141   :  { %v2129_v48 = vpack.c.bf16 %v2073_v44, %v2072_v46  ;;  %v1021_v49 = vpop.permute.xlu1 %1020 }
 0x142   :  { %vm1177_vm8 = vcmp.eq.s32.totalorder %v1021_v49, %v6703_v11  ;;  %v1018_v50 = vpop.permute.xlu0 %1017  ;;  %1116 = vperm.xlu1 %6376, %v5206_v45  }
 0x143   :  { %v1241_v51 = vsel %vm1177_vm8, 1.0, %v6421_v22  ;;  %vm1176_vm9 = vcmp.eq.s32.totalorder %v1018_v50, %v6703_v11  ;;  %1113 = vperm.xlu0 %6375, %v5205_v47   ;;  %5912 = vmatmul.mubr.msk.bf16.gmra.mrb[44].mxu0 %vm479_vm5, %v2129_v48  ;;  %v5310_v50 = vld [vmem:[%s8623_s0 + $0x5c8] sm:$0xff] }
 0x144   :  { %v1240_v53 = vsel %vm1176_vm9, 1.0, %v6421_v22 }
 0x145   :  { %v1296_v13 = vpack.c.bf16 %v1241_v51, %v1240_v53  ;;  %v1855_v55 = vpop.permute.xlu1 %1854 }
 0x146   :  { %vm2011_vm10 = vcmp.eq.s32.totalorder %v1855_v55, %v6703_v11  ;;  %v1852_v56 = vpop.permute.xlu0 %1851  ;;  %1950 = vperm.xlu1 %6376, %v5302_v52  }
 0x147   :  { %v2075_v57 = vsel %vm2011_vm10, 1.0, %v6421_v22  ;;  %vm2010_vm11 = vcmp.eq.s32.totalorder %v1852_v56, %v6703_v11  ;;  %1947 = vperm.xlu0 %6375, %v5301_v54   ;;  %5841 = vmatprep.mubr.msk.bf16.mxu1 %vm479_vm5, %v1296_v13  ;;  %v5309_v54 = vld [vmem:[%s8623_s0 + $0x5c0] sm:$0xff] }
 0x148   :  { %v2074_v59 = vsel %vm2010_vm11, 1.0, %v6421_v22 }
 0x149   :  { %v2130_v16 = vpack.c.bf16 %v2075_v57, %v2074_v59  ;;  %v1027_v61 = vpop.permute.xlu1 %1026 }
 0x14a   :  { %vm1179_vm12 = vcmp.eq.s32.totalorder %v1027_v61, %v6703_v11  ;;  %v1024_v62 = vpop.permute.xlu0 %1023  ;;  %1122 = vperm.xlu1 %6376, %v5208_v58   ;;  %v5216_v58 = vld [vmem:[%s8623_s0 + $0x3d8] sm:$0xff]  ;;  %v6382_v61 = vld [vmem:[%s8624_s2 + $0x10] sm:$0xff]  }
 0x14b   :  { %v1243_v63 = vsel %vm1179_vm12, 1.0, %v6421_v22  ;;  %vm1178_vm13 = vcmp.eq.s32.totalorder %v1024_v62, %v6703_v11  ;;  %1119 = vperm.xlu0 %6375, %v5207_v60   ;;  %5915 = vmatprep.mubr.msk.bf16.mxu0 %vm479_vm5, %v2130_v16  ;;  %v5215_v16 = vld [vmem:[%s8623_s0 + $0x3d0] sm:$0xff] }
 0x14c   :  { %v1242_v1 = vsel %vm1178_vm13, 1.0, %v6421_v22  ;;  %5963 = vmatprep.subr.bf16.mxu1 %v6382_v61  ;;  %6099 = vmatprep.subr.bf16.mxu0 %v6382_v61 }
 0x14d   :  { %v1297_v17 = vpack.c.bf16 %v1243_v63, %v1242_v1  ;;  %v1861_v3 = vpop.permute.xlu1 %1860  ;;  %5964 = vmatpush3.bf16.msra.mxu1 %v6382_v61  ;;  %6100 = vmatpush3.bf16.msra.mxu0 %v6382_v61  ;;  %v5315_v61 = vld [vmem:[%s8623_s0 + $0x5f0] sm:$0xff] }
 0x14e   :  { %vm2013_vm14 = vcmp.eq.s32.totalorder %v1861_v3, %v6703_v11  ;;  %v1858_v4 = vpop.permute.xlu0 %1857  ;;  %1956 = vperm.xlu1 %6376, %v5304_v0  }
 0x14f   :  { %v2077_v5 = vsel %vm2013_vm14, 1.0, %v6421_v22  ;;  %vm2012_vm15 = vcmp.eq.s32.totalorder %v1858_v4, %v6703_v11  ;;  %1953 = vperm.xlu0 %6375, %v5303_v2   ;;  %5842 = vmatmul.mubr.msk.bf16.gmra.mrb[48].mxu1 %vm479_vm5, %v1297_v17 }
 0x150   :  { %v2076_v7 = vsel %vm2012_vm15, 1.0, %v6421_v22 }
 0x151   :  { %v2131_v21 = vpack.c.bf16 %v2077_v5, %v2076_v7  ;;  %v1033_v10 = vpop.permute.xlu1 %1032  ;;  %v5312_v7 = vld [vmem:[%s8623_s0 + $0x5d8] sm:$0xff] }
 0x152   :  { %vm1181_vm0 = vcmp.eq.s32.totalorder %v1033_v10, %v6703_v11  ;;  %v1030_v12 = vpop.permute.xlu0 %1029  ;;  %1128 = vperm.xlu1 %6376, %v5210_v6  }
 0x153   :  { %v1245_v14 = vsel %vm1181_vm0, 1.0, %v6421_v22  ;;  %vm1180_vm1 = vcmp.eq.s32.totalorder %v1030_v12, %v6703_v11  ;;  %1125 = vperm.xlu0 %6375, %v5209_v9   ;;  %5916 = vmatmul.mubr.msk.bf16.gmra.mrb[48].mxu0 %vm479_vm5, %v2131_v21  ;;  %v5311_v21 = vld [vmem:[%s8623_s0 + $0x5d0] sm:$0xff] }
 0x154   :  { %v1244_v18 = vsel %vm1180_vm1, 1.0, %v6421_v22 }
 0x155   :  { %v1298_v20 = vpack.c.bf16 %v1245_v14, %v1244_v18  ;;  %v1867_v23 = vpop.permute.xlu1 %1866  ;;  %v5218_v18 = vld [vmem:[%s8623_s0 + $0x3e8] sm:$0xff] }
 0x156   :  { %vm2015_vm2 = vcmp.eq.s32.totalorder %v1867_v23, %v6703_v11  ;;  %v1864_v25 = vpop.permute.xlu0 %1863  ;;  %1962 = vperm.xlu1 %6376, %v5306_v15  }
 0x157   :  { %v2079_v24 = vsel %vm2015_vm2, 1.0, %v6421_v22  ;;  %vm2014_vm3 = vcmp.eq.s32.totalorder %v1864_v25, %v6703_v11  ;;  %1959 = vperm.xlu0 %6375, %v5305_v19   ;;  %5845 = vmatprep.mubr.msk.bf16.mxu1 %vm479_vm5, %v1298_v20  ;;  %v5217_v20 = vld [vmem:[%s8623_s0 + $0x3e0] sm:$0xff] }
 0x158   :  { %v2078_v27 = vsel %vm2014_vm3, 1.0, %v6421_v22 }
 0x159   :  { %v2132_v29 = vpack.c.bf16 %v2079_v24, %v2078_v27  ;;  %v1039_v30 = vpop.permute.xlu1 %1038 }
 0x15a   :  { %vm1183_vm4 = vcmp.eq.s32.totalorder %v1039_v30, %v6703_v11  ;;  %v1036_v31 = vpop.permute.xlu0 %1035  ;;  %1134 = vperm.xlu1 %6376, %v5212_v26   ;;  %v5314_v30 = vld [vmem:[%s8623_s0 + $0x5e8] sm:$0xff] }
 0x15b   :  { %v1247_v32 = vsel %vm1183_vm4, 1.0, %v6421_v22  ;;  %vm1182_vm6 = vcmp.eq.s32.totalorder %v1036_v31, %v6703_v11  ;;  %1131 = vperm.xlu0 %6375, %v5211_v28   ;;  %5919 = vmatprep.mubr.msk.bf16.mxu0 %vm479_vm5, %v2132_v29 }
 0x15c   :  { %v1246_v34 = vsel %vm1182_vm6, 1.0, %v6421_v22 }
 0x15d   :  { %v1299_v36 = vpack.c.bf16 %v1247_v32, %v1246_v34  ;;  %v1873_v37 = vpop.permute.xlu1 %1872  ;;  %v5313_v34 = vld [vmem:[%s8623_s0 + $0x5e0] sm:$0xff] }
 0x15e   :  { %vm2017_vm7 = vcmp.eq.s32.totalorder %v1873_v37, %v6703_v11  ;;  %v1870_v38 = vpop.permute.xlu0 %1869  ;;  %1968 = vperm.xlu1 %6376, %v5308_v33  }
 0x15f   :  { %v2081_v39 = vsel %vm2017_vm7, 1.0, %v6421_v22  ;;  %vm2016_vm8 = vcmp.eq.s32.totalorder %v1870_v38, %v6703_v11  ;;  %1965 = vperm.xlu0 %6375, %v5307_v35   ;;  %5846 = vmatmul.mubr.msk.bf16.gmra.mrb[52].mxu1 %vm479_vm5, %v1299_v36 }
 0x160   :  { %v2080_v41 = vsel %vm2016_vm8, 1.0, %v6421_v22 }
 0x161   :  { %v2133_v43 = vpack.c.bf16 %v2081_v39, %v2080_v41  ;;  %v1045_v44 = vpop.permute.xlu1 %1044 }
 0x162   :  { %v7338_v45 = vpop.f32.mrb[0].mxu0  ;;  %vm1185_vm9 = vcmp.eq.s32.totalorder %v1045_v44, %v6703_v11  ;;  %v1042_v46 = vpop.permute.xlu0 %1041  ;;  %1140 = vperm.xlu1 %6376, %v5214_v40  }
 0x163   :  { %v7341_v47 = vpop.f32.mrb[1].mxu0  ;;  %v1249_v48 = vsel %vm1185_vm9, 1.0, %v6421_v22  ;;  %vm1184_vm10 = vcmp.eq.s32.totalorder %v1042_v46, %v6703_v11  ;;  %1137 = vperm.xlu0 %6375, %v5213_v42   ;;  %5920 = vmatmul.mubr.msk.bf16.gmra.mrb[52].mxu0 %vm479_vm5, %v2133_v43  ;;  %v5220_v43 = vld [vmem:[%s8623_s0 + $0x3f8] sm:$0xff] }
 0x164   :  { %v7346_v49 = vpop.f32.mrb[2].mxu0  ;;  %v1248_v51 = vsel %vm1184_vm10, 1.0, %v6421_v22 }
 0x165   :  { %v7354_v53 = vpop.f32.mrb[3].mxu0  ;;  %v1300_v13 = vpack.c.bf16 %v1249_v48, %v1248_v51  ;;  %v1879_v56 = vpop.permute.xlu1 %1878 }
 0x166   :  { %v7361_v57 = vpop.f32.mrb[0].mxu1  ;;  %vm2019_vm11 = vcmp.eq.s32.totalorder %v1879_v56, %v6703_v11  ;;  %v1876_v59 = vpop.permute.xlu0 %1875  ;;  %1974 = vperm.xlu1 %6376, %v5310_v50   ;;  %v5219_v50 = vld [vmem:[%s8623_s0 + $0x3f0] sm:$0xff] }
 0x167   :  { %8676 = vst [vmem:[#allocation4_spill] sm:$0xff] %v7361_v57  ;;  %v7367_v60 = vpop.f32.mrb[1].mxu1  ;;  %v2083_v62 = vsel %vm2019_vm11, 1.0, %v6421_v22  ;;  %vm2018_vm12 = vcmp.eq.s32.totalorder %v1876_v59, %v6703_v11  ;;  %1971 = vperm.xlu0 %6375, %v5309_v54   ;;  %5849 = vmatprep.mubr.msk.bf16.mxu1 %vm479_vm5, %v1300_v13  ;;  %v5316_v59 = vld [vmem:[%s8623_s0 + $0x5f8] sm:$0xff] }
 0x168   :  { %v7378_v63 = vpop.f32.mrb[2].mxu1  ;;  %v2082_v0 = vsel %vm2018_vm12, 1.0, %v6421_v22 }
 0x169   :  { %8677 = vst [vmem:[#allocation5_spill] sm:$0xff] %v7378_v63  ;;  %v7383_v2 = vpop.f32.mrb[3].mxu1  ;;  %v2134_v17 = vpack.c.bf16 %v2083_v62, %v2082_v0  ;;  %v1051_v4 = vpop.permute.xlu1 %1050 }
 0x16a   :  { %vm1187_vm13 = vcmp.eq.s32.totalorder %v1051_v4, %v6703_v11  ;;  %v1048_v5 = vpop.permute.xlu0 %1047  ;;  %1146 = vperm.xlu1 %6376, %v5216_v58  }
 0x16b   :  { %v1251_v6 = vsel %vm1187_vm13, 1.0, %v6421_v22  ;;  %vm1186_vm14 = vcmp.eq.s32.totalorder %v1048_v5, %v6703_v11  ;;  %1143 = vperm.xlu0 %6375, %v5215_v16   ;;  %5923 = vmatprep.mubr.msk.bf16.mxu0 %vm479_vm5, %v2134_v17 }
 0x16c   :  { %v1250_v9 = vsel %vm1186_vm14, 1.0, %v6421_v22 }
 0x16d   :  { %v1301_v10 = vpack.c.bf16 %v1251_v6, %v1250_v9  ;;  %v1885_v12 = vpop.permute.xlu1 %1884 }
 0x16e   :  { %vm2021_vm15 = vcmp.eq.s32.totalorder %v1885_v12, %v6703_v11  ;;  %v1882_v14 = vpop.permute.xlu0 %1881  ;;  %1980 = vperm.xlu1 %6376, %v5312_v7  }
 0x16f   :  { %v2085_v15 = vsel %vm2021_vm15, 1.0, %v6421_v22  ;;  %vm2020_vm0 = vcmp.eq.s32.totalorder %v1882_v14, %v6703_v11  ;;  %1977 = vperm.xlu0 %6375, %v5311_v21   ;;  %5850 = vmatmul.mubr.msk.bf16.gmra.mrb[56].mxu1 %vm479_vm5, %v1301_v10  ;;  %v6383_v21 = vld [vmem:[%s8624_s2 + $0x18] sm:$0xff]  }
 0x170   :  { %v2084_v19 = vsel %vm2020_vm0, 1.0, %v6421_v22  ;;  %5965 = vmatprep.subr.bf16.mxu1 %v6383_v21  ;;  %6101 = vmatprep.subr.bf16.mxu0 %v6383_v21 }
 0x171   :  { %v2135_v23 = vpack.c.bf16 %v2085_v15, %v2084_v19  ;;  %v1057_v25 = vpop.permute.xlu1 %1056  ;;  %5966 = vmatpush3.bf16.msra.mxu1 %v6383_v21  ;;  %6102 = vmatpush3.bf16.msra.mxu0 %v6383_v21 }
 0x172   :  { %v7409_v24 = vpop.f32.mrb[4].mxu0  ;;  %vm1189_vm1 = vcmp.eq.s32.totalorder %v1057_v25, %v6703_v11  ;;  %v1054_v26 = vpop.permute.xlu0 %1053  ;;  %1152 = vperm.xlu1 %6376, %v5218_v18  }
 0x173   :  { %v7412_v27 = vpop.f32.mrb[5].mxu0  ;;  %v1253_v28 = vsel %vm1189_vm1, 1.0, %v6421_v22  ;;  %vm1188_vm2 = vcmp.eq.s32.totalorder %v1054_v26, %v6703_v11  ;;  %1149 = vperm.xlu0 %6375, %v5217_v20   ;;  %5924 = vmatmul.mubr.msk.bf16.gmra.mrb[56].mxu0 %vm479_vm5, %v2135_v23 }
 0x174   :  { %v7417_v29 = vpop.f32.mrb[6].mxu0  ;;  %v1252_v31 = vsel %vm1188_vm2, 1.0, %v6421_v22 }
 0x175   :  { %v7425_v33 = vpop.f32.mrb[7].mxu0  ;;  %v1302_v35 = vpack.c.bf16 %v1253_v28, %v1252_v31  ;;  %v1891_v37 = vpop.permute.xlu1 %1890 }
 0x176   :  { %v7432_v38 = vpop.f32.mrb[4].mxu1  ;;  %vm2023_vm3 = vcmp.eq.s32.totalorder %v1891_v37, %v6703_v11  ;;  %v1888_v39 = vpop.permute.xlu0 %1887  ;;  %1986 = vperm.xlu1 %6376, %v5314_v30  }
 0x177   :  { %8678 = vst [vmem:[#allocation6_spill] sm:$0xff] %v7432_v38  ;;  %v7435_v40 = vpop.f32.mrb[5].mxu1  ;;  %v2087_v41 = vsel %vm2023_vm3, 1.0, %v6421_v22  ;;  %vm2022_vm4 = vcmp.eq.s32.totalorder %v1888_v39, %v6703_v11  ;;  %1983 = vperm.xlu0 %6375, %v5313_v34   ;;  %5853 = vmatprep.mubr.msk.bf16.mxu1 %vm479_vm5, %v1302_v35 }
 0x178   :  { %8679 = vst [vmem:[#allocation7_spill] sm:$0xff] %v7435_v40  ;;  %v7440_v42 = vpop.f32.mrb[6].mxu1  ;;  %v2086_v44 = vsel %vm2022_vm4, 1.0, %v6421_v22 }
 0x179   :  { %8680 = vst [vmem:[#allocation8_spill] sm:$0xff] %v7440_v42  ;;  %v7448_v48 = vpop.f32.mrb[7].mxu1  ;;  %v2136_v51 = vpack.c.bf16 %v2087_v41, %v2086_v44  ;;  %v1063_v13 = vpop.permute.xlu1 %1062 }
 0x17a   :  { %8681 = vst [vmem:[#allocation9_spill] sm:$0xff] %v7448_v48  ;;  %vm1191_vm6 = vcmp.eq.s32.totalorder %v1063_v13, %v6703_v11  ;;  %v1060_v56 = vpop.permute.xlu0 %1059  ;;  %1158 = vperm.xlu1 %6376, %v5220_v43  }
 0x17b   :  { %v1255_v58 = vsel %vm1191_vm6, 1.0, %v6421_v22  ;;  %vm1190_vm7 = vcmp.eq.s32.totalorder %v1060_v56, %v6703_v11  ;;  %1155 = vperm.xlu0 %6375, %v5219_v50   ;;  %5927 = vmatprep.mubr.msk.bf16.mxu0 %vm479_vm5, %v2136_v51 }
 0x17c   :  { %v1254_v16 = vsel %vm1190_vm7, 1.0, %v6421_v22 }
 0x17d   :  { %v1303_v62 = vpack.c.bf16 %v1255_v58, %v1254_v16  ;;  %v1897_v0 = vpop.permute.xlu1 %1896 }
 0x17e   :  { %vm2025_vm8 = vcmp.eq.s32.totalorder %v1897_v0, %v6703_v11  ;;  %v1894_v17 = vpop.permute.xlu0 %1893  ;;  %1992 = vperm.xlu1 %6376, %v5316_v59  }
 0x17f   :  { %v2089_v4 = vsel %vm2025_vm8, 1.0, %v6421_v22  ;;  %vm2024_vm9 = vcmp.eq.s32.totalorder %v1894_v17, %v6703_v11  ;;  %1989 = vperm.xlu0 %6375, %v5315_v61   ;;  %5854 = vmatmul.mubr.msk.bf16.gmra.mrb[60].mxu1 %vm479_vm5, %v1303_v62 }
 0x180   :  { %v2088_v5 = vsel %vm2024_vm9, 1.0, %v6421_v22 }
 0x181   :  { %v2137_v6 = vpack.c.bf16 %v2089_v4, %v2088_v5  ;;  %v1069_v7 = vpop.permute.xlu1 %1068 }
 0x182   :  { %v7471_v9 = vpop.f32.mrb[8].mxu0  ;;  %vm1193_vm10 = vcmp.eq.s32.totalorder %v1069_v7, %v6703_v11  ;;  %v1066_v10 = vpop.permute.xlu0 %1065 }
 0x183   :  { %v7477_v12 = vpop.f32.mrb[9].mxu0  ;;  %v1257_v14 = vsel %vm1193_vm10, 1.0, %v6421_v22  ;;  %vm1192_vm11 = vcmp.eq.s32.totalorder %v1066_v10, %v6703_v11  ;;  %5928 = vmatmul.mubr.msk.bf16.gmra.mrb[60].mxu0 %vm479_vm5, %v2137_v6 }
 0x184   :  { %v7482_v15 = vpop.f32.mrb[10].mxu0  ;;  %v1256_v18 = vsel %vm1192_vm11, 1.0, %v6421_v22 }
 0x185   :  { %v7487_v20 = vpop.f32.mrb[11].mxu0  ;;  %v1304_v23 = vpack.c.bf16 %v1257_v14, %v1256_v18  ;;  %v1903_v26 = vpop.permute.xlu1 %1902 }
 0x186   :  { %v7491_v28 = vpop.f32.mrb[8].mxu1  ;;  %vm2027_vm12 = vcmp.eq.s32.totalorder %v1903_v26, %v6703_v11  ;;  %v1900_v30 = vpop.permute.xlu0 %1899 }
 0x187   :  { %8682 = vst [vmem:[#allocation10_spill] sm:$0xff] %v7491_v28  ;;  %v7494_v31 = vpop.f32.mrb[9].mxu1  ;;  %v2091_v34 = vsel %vm2027_vm12, 1.0, %v6421_v22  ;;  %vm2026_vm13 = vcmp.eq.s32.totalorder %v1900_v30, %v6703_v11  ;;  %5857 = vmatprep.mubr.msk.bf16.mxu1 %vm479_vm5, %v1304_v23 }
 0x188   :  { %8683 = vst [vmem:[#allocation11_spill] sm:$0xff] %v7494_v31  ;;  %v7499_v35 = vpop.f32.mrb[10].mxu1  ;;  %v2090_v37 = vsel %vm2026_vm13, 1.0, %v6421_v22 }
 0x189   :  { %8684 = vst [vmem:[#allocation12_spill] sm:$0xff] %v7499_v35  ;;  %v7504_v41 = vpop.f32.mrb[11].mxu1  ;;  %v2138_v43 = vpack.c.bf16 %v2091_v34, %v2090_v37  ;;  %v1075_v50 = vpop.permute.xlu1 %1074 }
 0x18a   :  { %8685 = vst [vmem:[#allocation13_spill] sm:$0xff] %v7504_v41  ;;  %vm1195_vm14 = vcmp.eq.s32.totalorder %v1075_v50, %v6703_v11  ;;  %v1072_v51 = vpop.permute.xlu0 %1071 }
 0x18b   :  { %v1259_v13 = vsel %vm1195_vm14, 1.0, %v6421_v22  ;;  %vm1194_vm15 = vcmp.eq.s32.totalorder %v1072_v51, %v6703_v11  ;;  %5931 = vmatprep.mubr.msk.bf16.mxu0 %vm479_vm5, %v2138_v43 }
 0x18c   :  { %v1258_v56 = vsel %vm1194_vm15, 1.0, %v6421_v22 }
 0x18d   :  { %v1305_v58 = vpack.c.bf16 %v1259_v13, %v1258_v56  ;;  %v1909_v59 = vpop.permute.xlu1 %1908 }
 0x18e   :  { %vm2029_vm0 = vcmp.eq.s32.totalorder %v1909_v59, %v6703_v11  ;;  %v1906_v16 = vpop.permute.xlu0 %1905 }
 0x18f   :  { %v2093_v61 = vsel %vm2029_vm0, 1.0, %v6421_v22  ;;  %vm2028_vm1 = vcmp.eq.s32.totalorder %v1906_v16, %v6703_v11  ;;  %5858 = vmatmul.mubr.msk.bf16.gmra.mrb[64].mxu1 %vm479_vm5, %v1305_v58 }
 0x190   :  { %v2092_v62 = vsel %vm2028_vm1, 1.0, %v6421_v22 }
 0x191   :  { %v2139_v0 = vpack.c.bf16 %v2093_v61, %v2092_v62  ;;  %v1081_v17 = vpop.permute.xlu1 %1080 }
 0x192   :  { %v7518_v4 = vpop.f32.mrb[12].mxu0  ;;  %vm1197_vm2 = vcmp.eq.s32.totalorder %v1081_v17, %v6703_v11  ;;  %v1078_v5 = vpop.permute.xlu0 %1077 }
 0x193   :  { %v7521_v6 = vpop.f32.mrb[13].mxu0  ;;  %v1261_v7 = vsel %vm1197_vm2, 1.0, %v6421_v22  ;;  %vm1196_vm3 = vcmp.eq.s32.totalorder %v1078_v5, %v6703_v11  ;;  %5932 = vmatmul.mubr.msk.bf16.gmra.mrb[64].mxu0 %vm479_vm5, %v2139_v0 }
 0x194   :  { %v7526_v21 = vpop.f32.mrb[14].mxu0  ;;  %v1260_v10 = vsel %vm1196_vm3, 1.0, %v6421_v22 }
 0x195   :  { %v7531_v18 = vpop.f32.mrb[15].mxu0  ;;  %v1306_v23 = vpack.c.bf16 %v1261_v7, %v1260_v10  ;;  %v1915_v30 = vpop.permute.xlu1 %1914 }
 0x196   :  { %v7535_v34 = vpop.f32.mrb[12].mxu1  ;;  %vm2031_vm4 = vcmp.eq.s32.totalorder %v1915_v30, %v6703_v11  ;;  %v1912_v37 = vpop.permute.xlu0 %1911 }
 0x197   :  { %8686 = vst [vmem:[#allocation14_spill] sm:$0xff] %v7535_v34  ;;  %v7538_v43 = vpop.f32.mrb[13].mxu1  ;;  %v2095_v50 = vsel %vm2031_vm4, 1.0, %v6421_v22  ;;  %vm2030_vm6 = vcmp.eq.s32.totalorder %v1912_v37, %v6703_v11  ;;  %5861 = vmatprep.mubr.msk.bf16.mxu1 %vm479_vm5, %v1306_v23 }
 0x198   :  { %8687 = vst [vmem:[#allocation15_spill] sm:$0xff] %v7538_v43  ;;  %v7543_v51 = vpop.f32.mrb[14].mxu1  ;;  %v2094_v13 = vsel %vm2030_vm6, 1.0, %v6421_v22 }
 0x199   :  { %8688 = vst [vmem:[#allocation16_spill] sm:$0xff] %v7543_v51  ;;  %v7548_v58 = vpop.f32.mrb[15].mxu1  ;;  %v2140_v59 = vpack.c.bf16 %v2095_v50, %v2094_v13  ;;  %v1087_v61 = vpop.permute.xlu1 %1086 }
 0x19a   :  { %8689 = vst [vmem:[#allocation17_spill] sm:$0xff] %v7548_v58  ;;  %vm1199_vm7 = vcmp.eq.s32.totalorder %v1087_v61, %v6703_v11  ;;  %v1084_v62 = vpop.permute.xlu0 %1083 }
 0x19b   :  { %v1263_v0 = vsel %vm1199_vm7, 1.0, %v6421_v22  ;;  %vm1198_vm8 = vcmp.eq.s32.totalorder %v1084_v62, %v6703_v11  ;;  %5935 = vmatprep.mubr.msk.bf16.mxu0 %vm479_vm5, %v2140_v59 }
 0x19c   :  { %v1262_v17 = vsel %vm1198_vm8, 1.0, %v6421_v22 }
 0x19d   :  { %v1307_v5 = vpack.c.bf16 %v1263_v0, %v1262_v17  ;;  %v1921_v7 = vpop.permute.xlu1 %1920 }
 0x19e   :  { %vm2033_vm9 = vcmp.eq.s32.totalorder %v1921_v7, %v6703_v11  ;;  %v1918_v10 = vpop.permute.xlu0 %1917 }
 0x19f   :  { %v2097_v23 = vsel %vm2033_vm9, 1.0, %v6421_v22  ;;  %vm2032_vm10 = vcmp.eq.s32.totalorder %v1918_v10, %v6703_v11  ;;  %5862 = vmatmul.mubr.msk.bf16.gmra.mrb[68].mxu1 %vm479_vm5, %v1307_v5 }
 0x1a0   :  { %v2096_v30 = vsel %vm2032_vm10, 1.0, %v6421_v22 }
 0x1a1   :  { %v2141_v37 = vpack.c.bf16 %v2097_v23, %v2096_v30  ;;  %v1093_v50 = vpop.permute.xlu1 %1092 }
 0x1a2   :  { %v7562_v13 = vpop.f32.mrb[16].mxu0  ;;  %vm1201_vm11 = vcmp.eq.s32.totalorder %v1093_v50, %v6703_v11  ;;  %v1090_v59 = vpop.permute.xlu0 %1089 }
 0x1a3   :  { %v7565_v61 = vpop.f32.mrb[17].mxu0  ;;  %v1265_v62 = vsel %vm1201_vm11, 1.0, %v6421_v22  ;;  %vm1200_vm12 = vcmp.eq.s32.totalorder %v1090_v59, %v6703_v11  ;;  %5936 = vmatmul.mubr.msk.bf16.gmra.mrb[68].mxu0 %vm479_vm5, %v2141_v37 }
 0x1a4   :  { %v7570_v0 = vpop.f32.mrb[18].mxu0  ;;  %v1264_v17 = vsel %vm1200_vm12, 1.0, %v6421_v22 }
 0x1a5   :  { %v7575_v7 = vpop.f32.mrb[19].mxu0  ;;  %v1308_v10 = vpack.c.bf16 %v1265_v62, %v1264_v17  ;;  %v1927_v30 = vpop.permute.xlu1 %1926 }
 0x1a6   :  { %v7579_v50 = vpop.f32.mrb[16].mxu1  ;;  %vm2035_vm13 = vcmp.eq.s32.totalorder %v1927_v30, %v6703_v11  ;;  %v1924_v59 = vpop.permute.xlu0 %1923 }
 0x1a7   :  { %8690 = vst [vmem:[#allocation18_spill] sm:$0xff] %v7579_v50  ;;  %v7582_v37 = vpop.f32.mrb[17].mxu1  ;;  %v2099_v8 = vsel %vm2035_vm13, 1.0, %v6421_v22  ;;  %vm2034_vm14 = vcmp.eq.s32.totalorder %v1924_v59, %v6703_v11  ;;  %5865 = vmatprep.mubr.msk.bf16.mxu1 %vm479_vm5, %v1308_v10 }
 0x1a8   :  { %8691 = vst [vmem:[#allocation19_spill] sm:$0xff] %v7582_v37  ;;  %v7587_v56 = vpop.f32.mrb[18].mxu1  ;;  %v2098_v62 = vsel %vm2034_vm14, 1.0, %v6421_v22 }
 0x1a9   :  { %8692 = vst [vmem:[#allocation20_spill] sm:$0xff] %v7587_v56  ;;  %v7592_v16 = vpop.f32.mrb[19].mxu1  ;;  %v2142_v39 = vpack.c.bf16 %v2099_v8, %v2098_v62  ;;  %v1099_v44 = vpop.permute.xlu1 %1098 }
 0x1aa   :  { %8693 = vst [vmem:[#allocation21_spill] sm:$0xff] %v7592_v16  ;;  %vm1203_vm15 = vcmp.eq.s32.totalorder %v1099_v44, %v6703_v11  ;;  %v1096_v46 = vpop.permute.xlu0 %1095 }
 0x1ab   :  { %v1267_v59 = vsel %vm1203_vm15, 1.0, %v6421_v22  ;;  %vm1202_vm0 = vcmp.eq.s32.totalorder %v1096_v46, %v6703_v11  ;;  %5939 = vmatprep.mubr.msk.bf16.mxu0 %vm479_vm5, %v2142_v39 }
 0x1ac   :  { %v1266_v10 = vsel %vm1202_vm0, 1.0, %v6421_v22 }
 0x1ad   :  { %v1309_v54 = vpack.c.bf16 %v1267_v59, %v1266_v10  ;;  %v1933_v17 = vpop.permute.xlu1 %1932 }
 0x1ae   :  { %vm2037_vm1 = vcmp.eq.s32.totalorder %v1933_v17, %v6703_v11  ;;  %v1930_v8 = vpop.permute.xlu0 %1929 }
 0x1af   :  { %v2101_v62 = vsel %vm2037_vm1, 1.0, %v6421_v22  ;;  %vm2036_vm2 = vcmp.eq.s32.totalorder %v1930_v8, %v6703_v11  ;;  %5866 = vmatmul.mubr.msk.bf16.gmra.mrb[72].mxu1 %vm479_vm5, %v1309_v54 }
 0x1b0   :  { %v2100_v44 = vsel %vm2036_vm2, 1.0, %v6421_v22 }
 0x1b1   :  { %v2143_v30 = vpack.c.bf16 %v2101_v62, %v2100_v44  ;;  %v1105_v1 = vpop.permute.xlu1 %1104 }
 0x1b2   :  { %v7606_v46 = vpop.f32.mrb[20].mxu0  ;;  %vm1205_vm3 = vcmp.eq.s32.totalorder %v1105_v1, %v6703_v11  ;;  %v1102_v39 = vpop.permute.xlu0 %1101 }
 0x1b3   :  { %v7609_v59 = vpop.f32.mrb[21].mxu0  ;;  %v1269_v17 = vsel %vm1205_vm3, 1.0, %v6421_v22  ;;  %vm1204_vm4 = vcmp.eq.s32.totalorder %v1102_v39, %v6703_v11  ;;  %5940 = vmatmul.mubr.msk.bf16.gmra.mrb[72].mxu0 %vm479_vm5, %v2143_v30 }
 0x1b4   :  { %v7614_v10 = vpop.f32.mrb[22].mxu0  ;;  %v1268_v54 = vsel %vm1204_vm4, 1.0, %v6421_v22 }
 0x1b5   :  { %v7619_v62 = vpop.f32.mrb[23].mxu0  ;;  %v1310_v44 = vpack.c.bf16 %v1269_v17, %v1268_v54  ;;  %v1939_v3 = vpop.permute.xlu1 %1938 }
 0x1b6   :  { %v7623_v5 = vpop.f32.mrb[20].mxu1  ;;  %vm2039_vm6 = vcmp.eq.s32.totalorder %v1939_v3, %v6703_v11  ;;  %v1936_v39 = vpop.permute.xlu0 %1935 }
 0x1b7   :  { %8694 = vst [vmem:[#allocation22_spill] sm:$0xff] %v7623_v5  ;;  %v7626_v30 = vpop.f32.mrb[21].mxu1  ;;  %v2103_v23 = vsel %vm2039_vm6, 1.0, %v6421_v22  ;;  %vm2038_vm7 = vcmp.eq.s32.totalorder %v1936_v39, %v6703_v11  ;;  %5869 = vmatprep.mubr.msk.bf16.mxu1 %vm479_vm5, %v1310_v44 }
 0x1b8   :  { %8695 = vst [vmem:[#allocation23_spill] sm:$0xff] %v7626_v30  ;;  %v7631_v8 = vpop.f32.mrb[22].mxu1  ;;  %v2102_v17 = vsel %vm2038_vm7, 1.0, %v6421_v22 }
 0x1b9   :  { %8696 = vst [vmem:[#allocation24_spill] sm:$0xff] %v7631_v8  ;;  %v7636_v1 = vpop.f32.mrb[23].mxu1  ;;  %v2144_v14 = vpack.c.bf16 %v2103_v23, %v2102_v17  ;;  %v1111_v26 = vpop.permute.xlu1 %1110 }
 0x1ba   :  { %8697 = vst [vmem:[#allocation25_spill] sm:$0xff] %v7636_v1  ;;  %vm1207_vm8 = vcmp.eq.s32.totalorder %v1111_v26, %v6703_v11  ;;  %v1108_v19 = vpop.permute.xlu0 %1107 }
 0x1bb   :  { %v1271_v39 = vsel %vm1207_vm8, 1.0, %v6421_v22  ;;  %vm1206_vm9 = vcmp.eq.s32.totalorder %v1108_v19, %v6703_v11  ;;  %5943 = vmatprep.mubr.msk.bf16.mxu0 %vm479_vm5, %v2144_v14 }
 0x1bc   :  { %v1270_v44 = vsel %vm1206_vm9, 1.0, %v6421_v22 }
 0x1bd   :  { %v1311_v25 = vpack.c.bf16 %v1271_v39, %v1270_v44  ;;  %v1945_v54 = vpop.permute.xlu1 %1944 }
 0x1be   :  { %vm2041_vm10 = vcmp.eq.s32.totalorder %v1945_v54, %v6703_v11  ;;  %v1942_v23 = vpop.permute.xlu0 %1941 }
 0x1bf   :  { %v2105_v17 = vsel %vm2041_vm10, 1.0, %v6421_v22  ;;  %vm2040_vm11 = vcmp.eq.s32.totalorder %v1942_v23, %v6703_v11  ;;  %5870 = vmatmul.mubr.msk.bf16.gmra.mrb[76].mxu1 %vm479_vm5, %v1311_v25 }
 0x1c0   :  { %v2104_v26 = vsel %vm2040_vm11, 1.0, %v6421_v22 }
 0x1c1   :  { %v2145_v3 = vpack.c.bf16 %v2105_v17, %v2104_v26  ;;  %v1117_v32 = vpop.permute.xlu1 %1116 }
 0x1c2   :  { %v7650_v19 = vpop.f32.mrb[24].mxu0  ;;  %vm1209_vm12 = vcmp.eq.s32.totalorder %v1117_v32, %v6703_v11  ;;  %v1114_v14 = vpop.permute.xlu0 %1113 }
 0x1c3   :  { %v7653_v39 = vpop.f32.mrb[25].mxu0  ;;  %v1273_v54 = vsel %vm1209_vm12, 1.0, %v6421_v22  ;;  %vm1208_vm13 = vcmp.eq.s32.totalorder %v1114_v14, %v6703_v11  ;;  %5944 = vmatmul.mubr.msk.bf16.gmra.mrb[76].mxu0 %vm479_vm5, %v2145_v3 }
 0x1c4   :  { %v7658_v44 = vpop.f32.mrb[26].mxu0  ;;  %v1272_v25 = vsel %vm1208_vm13, 1.0, %v6421_v22 }
 0x1c5   :  { %v7663_v17 = vpop.f32.mrb[27].mxu0  ;;  %v1312_v26 = vpack.c.bf16 %v1273_v54, %v1272_v25  ;;  %v1951_v36 = vpop.permute.xlu1 %1950 }
 0x1c6   :  { %v7667_v52 = vpop.f32.mrb[24].mxu1  ;;  %vm2043_vm14 = vcmp.eq.s32.totalorder %v1951_v36, %v6703_v11  ;;  %v1948_v14 = vpop.permute.xlu0 %1947 }
 0x1c7   :  { %8698 = vst [vmem:[#allocation26_spill] sm:$0xff] %v7667_v52  ;;  %v7670_v3 = vpop.f32.mrb[25].mxu1  ;;  %v2107_v55 = vsel %vm2043_vm14, 1.0, %v6421_v22  ;;  %vm2042_vm15 = vcmp.eq.s32.totalorder %v1948_v14, %v6703_v11  ;;  %5873 = vmatprep.mubr.msk.bf16.mxu1 %vm479_vm5, %v1312_v26 }
 0x1c8   :  { %8699 = vst [vmem:[#allocation27_spill] sm:$0xff] %v7670_v3  ;;  %v7675_v23 = vpop.f32.mrb[26].mxu1  ;;  %v2106_v54 = vsel %vm2042_vm15, 1.0, %v6421_v22 }
 0x1c9   :  { %8700 = vst [vmem:[#allocation28_spill] sm:$0xff] %v7675_v23  ;;  %v7680_v32 = vpop.f32.mrb[27].mxu1  ;;  %v2146_v5 = vpack.c.bf16 %v2107_v55, %v2106_v54  ;;  %v1123_v8 = vpop.permute.xlu1 %1122 }
 0x1ca   :  { %8701 = vst [vmem:[#allocation29_spill] sm:$0xff] %v7680_v32  ;;  %vm1211_vm0 = vcmp.eq.s32.totalorder %v1123_v8, %v6703_v11  ;;  %v1120_v30 = vpop.permute.xlu0 %1119 }
 0x1cb   :  { %v1275_v14 = vsel %vm1211_vm0, 1.0, %v6421_v22  ;;  %vm1210_vm1 = vcmp.eq.s32.totalorder %v1120_v30, %v6703_v11  ;;  %5947 = vmatprep.mubr.msk.bf16.mxu0 %vm479_vm5, %v2146_v5 }
 0x1cc   :  { %v1274_v26 = vsel %vm1210_vm1, 1.0, %v6421_v22 }
 0x1cd   :  { %v1313_v1 = vpack.c.bf16 %v1275_v14, %v1274_v26  ;;  %v1957_v25 = vpop.permute.xlu1 %1956 }
 0x1ce   :  { %vm2045_vm2 = vcmp.eq.s32.totalorder %v1957_v25, %v6703_v11  ;;  %v1954_v55 = vpop.permute.xlu0 %1953 }
 0x1cf   :  { %v2109_v54 = vsel %vm2045_vm2, 1.0, %v6421_v22  ;;  %vm2044_vm3 = vcmp.eq.s32.totalorder %v1954_v55, %v6703_v11  ;;  %5874 = vmatmul.mubr.msk.bf16.gmra.mrb[80].mxu1 %vm479_vm5, %v1313_v1 }
 0x1d0   :  { %v2108_v8 = vsel %vm2044_vm3, 1.0, %v6421_v22 }
 0x1d1   :  { %v2147_v36 = vpack.c.bf16 %v2109_v54, %v2108_v8  ;;  %v1129_v52 = vpop.permute.xlu1 %1128 }
 0x1d2   :  { %v7694_v30 = vpop.f32.mrb[28].mxu0  ;;  %vm1213_vm4 = vcmp.eq.s32.totalorder %v1129_v52, %v6703_v11  ;;  %v1126_v5 = vpop.permute.xlu0 %1125 }
 0x1d3   :  { %v7697_v14 = vpop.f32.mrb[29].mxu0  ;;  %v1277_v25 = vsel %vm1213_vm4, 1.0, %v6421_v22  ;;  %vm1212_vm6 = vcmp.eq.s32.totalorder %v1126_v5, %v6703_v11  ;;  %5948 = vmatmul.mubr.msk.bf16.gmra.mrb[80].mxu0 %vm479_vm5, %v2147_v36 }
 0x1d4   :  { %v7702_v26 = vpop.f32.mrb[30].mxu0  ;;  %v1276_v1 = vsel %vm1212_vm6, 1.0, %v6421_v22 }
 0x1d5   :  { %v7707_v54 = vpop.f32.mrb[31].mxu0  ;;  %v1314_v8 = vpack.c.bf16 %v1277_v25, %v1276_v1  ;;  %v1963_v23 = vpop.permute.xlu1 %1962 }
 0x1d6   :  { %v7711_v3 = vpop.f32.mrb[28].mxu1  ;;  %vm2047_vm7 = vcmp.eq.s32.totalorder %v1963_v23, %v6703_v11  ;;  %v1960_v5 = vpop.permute.xlu0 %1959 }
 0x1d7   :  { %8702 = vst [vmem:[#allocation30_spill] sm:$0xff] %v7711_v3  ;;  %v7714_v36 = vpop.f32.mrb[29].mxu1  ;;  %v2111_v32 = vsel %vm2047_vm7, 1.0, %v6421_v22  ;;  %vm2046_vm8 = vcmp.eq.s32.totalorder %v1960_v5, %v6703_v11  ;;  %5877 = vmatprep.mubr.msk.bf16.mxu1 %vm479_vm5, %v1314_v8 }
 0x1d8   :  { %8703 = vst [vmem:[#allocation31_spill] sm:$0xff] %v7714_v36  ;;  %v7719_v55 = vpop.f32.mrb[30].mxu1  ;;  %v2110_v25 = vsel %vm2046_vm8, 1.0, %v6421_v22 }
 0x1d9   :  { %8704 = vst [vmem:[#allocation32_spill] sm:$0xff] %v7719_v55  ;;  %v7724_v52 = vpop.f32.mrb[31].mxu1  ;;  %v2148_v50 = vpack.c.bf16 %v2111_v32, %v2110_v25  ;;  %v1135_v56 = vpop.permute.xlu1 %1134 }
 0x1da   :  { %8705 = vst [vmem:[#allocation33_spill] sm:$0xff] %v7724_v52  ;;  %vm1215_vm9 = vcmp.eq.s32.totalorder %v1135_v56, %v6703_v11  ;;  %v1132_v37 = vpop.permute.xlu0 %1131 }
 0x1db   :  { %v1279_v5 = vsel %vm1215_vm9, 1.0, %v6421_v22  ;;  %vm1214_vm10 = vcmp.eq.s32.totalorder %v1132_v37, %v6703_v11  ;;  %5951 = vmatprep.mubr.msk.bf16.mxu0 %vm479_vm5, %v2148_v50 }
 0x1dc   :  { %v1278_v8 = vsel %vm1214_vm10, 1.0, %v6421_v22 }
 0x1dd   :  { %v1315_v16 = vpack.c.bf16 %v1279_v5, %v1278_v8  ;;  %v1969_v1 = vpop.permute.xlu1 %1968 }
 0x1de   :  { %vm2049_vm11 = vcmp.eq.s32.totalorder %v1969_v1, %v6703_v11  ;;  %v1966_v32 = vpop.permute.xlu0 %1965 }
 0x1df   :  { %v2113_v25 = vsel %vm2049_vm11, 1.0, %v6421_v22  ;;  %vm2048_vm12 = vcmp.eq.s32.totalorder %v1966_v32, %v6703_v11  ;;  %5878 = vmatmul.mubr.msk.bf16.gmra.mrb[84].mxu1 %vm479_vm5, %v1315_v16 }
 0x1e0   :  { %v2112_v56 = vsel %vm2048_vm12, 1.0, %v6421_v22  ;;  %vm2593_vm12 = vcmask 261120  }
 0x1e1   :  { %v2149_v23 = vpack.c.bf16 %v2113_v25, %v2112_v56  ;;  %v1141_v3 = vpop.permute.xlu1 %1140 }
 0x1e2   :  { %vm1217_vm13 = vcmp.eq.s32.totalorder %v1141_v3, %v6703_v11  ;;  %v5827_v50 = vpop.f32.mrb[32].mxu1  ;;  %v1138_v37 = vpop.permute.xlu0 %1137  ;;  %v7748_v3 = vld [vmem:[%s8624_s2] sm:$0xff]  }
 0x1e3   :  { %v1281_v5 = vsel %vm1217_vm13, 1.0, %v6421_v22  ;;  %vm1216_vm14 = vcmp.eq.s32.totalorder %v1138_v37, %v6703_v11  ;;  %v1450_v1 = vpop.f32.mrb[33].mxu1  ;;  %5952 = vmatmul.mubr.msk.bf16.gmra.mrb[84].mxu0 %vm479_vm5, %v2149_v23  ;;  %6031 = vmatprep.subr.bf16.mxu1 %v7748_v3 }
 0x1e4   :  { %v1280_v8 = vsel %vm1216_vm14, 1.0, %v6421_v22  ;;  %v5828_v32 = vpop.f32.mrb[34].mxu1  ;;  %6167 = vmatprep.subr.bf16.mxu0 %v7748_v3 }
 0x1e5   :  { %v1316_v55 = vpack.c.bf16 %v1281_v5, %v1280_v8  ;;  %v7743_v16 = vpack.c.bf16 %v5828_v32, %v5827_v50  ;;  %v1453_v36 = vpop.f32.mrb[35].mxu1  ;;  %v1975_v25 = vpop.permute.xlu1 %1974 }
 0x1e6   :  { %v7750_v56 = vpack.c.bf16 %v1453_v36, %v1450_v1  ;;  %vm2051_vm15 = vcmp.eq.s32.totalorder %v1975_v25, %v6703_v11  ;;  %v7753_v37 = vpop.f32.mrb[32].mxu0  ;;  %v1972_v23 = vpop.permute.xlu0 %1971 }
 0x1e7   :  { %v2115_v52 = vsel %vm2051_vm15, 1.0, %v6421_v22  ;;  %vm2050_vm0 = vcmp.eq.s32.totalorder %v1972_v23, %v6703_v11  ;;  %5881 = vmatprep.mubr.msk.bf16.mxu1 %vm479_vm5, %v1316_v55  ;;  %v7758_v50 = vpop.f32.mrb[33].mxu0  ;;  %vm4955_vm15 = vcmask 1042434  }
 0x1e8   :  { %v2114_v5 = vsel %vm2050_vm0, 1.0, %v6421_v22  ;;  %v7762_v8 = vpop.f32.mrb[34].mxu0  ;;  %vm4957_vm0 = vcmask 1043459  }
 0x1e9   :  { %v2150_v36 = vpack.c.bf16 %v2115_v52, %v2114_v5  ;;  %v7767_v32 = vpop.f32.mrb[35].mxu0  ;;  %v1147_v25 = vpop.permute.xlu1 %1146 }
 0x1ea   :  { %vm1219_vm1 = vcmp.eq.s32.totalorder %v1147_v25, %v6703_v11  ;;  %v1144_v23 = vpop.permute.xlu0 %1143 }
 0x1eb   :  { %v1283_v34 = vsel %vm1219_vm1, 1.0, %v6421_v22  ;;  %vm1218_vm2 = vcmp.eq.s32.totalorder %v1144_v23, %v6703_v11  ;;  %5955 = vmatprep.mubr.msk.bf16.mxu0 %vm479_vm5, %v2150_v36  ;;  %vm4959_vm1 = vcmask 1044484  }
 0x1ec   :  { %v1282_v52 = vsel %vm1218_vm2, 1.0, %v6421_v22  ;;  %vm4961_vm2 = vcmask 1045509  }
 0x1ed   :  { %v1317_v5 = vpack.c.bf16 %v1283_v34, %v1282_v52  ;;  %v1981_v51 = vpop.permute.xlu1 %1980 }
 0x1ee   :  { %vm2053_vm3 = vcmp.eq.s32.totalorder %v1981_v51, %v6703_v11  ;;  %v1978_v1 = vpop.permute.xlu0 %1977 }
 0x1ef   :  { %v2117_v43 = vsel %vm2053_vm3, 1.0, %v6421_v22  ;;  %vm2052_vm4 = vcmp.eq.s32.totalorder %v1978_v1, %v6703_v11  ;;  %5882 = vmatmul.mubr.msk.bf16.gmra.mrb[88].mxu1 %vm479_vm5, %v1317_v5  ;;  %vm4963_vm3 = vcmask 1046534  }
 0x1f0   :  { %v2116_v25 = vsel %vm2052_vm4, 1.0, %v6421_v22  ;;  %vm4965_vm4 = vcmask 1047559  }
 0x1f1   :  { %v2151_v55 = vpack.c.bf16 %v2117_v43, %v2116_v25  ;;  %v1153_v58 = vpop.permute.xlu1 %1152 }
 0x1f2   :  { %vm1221_vm6 = vcmp.eq.s32.totalorder %v1153_v58, %v6703_v11  ;;  %v5831_v36 = vpop.f32.mrb[36].mxu1  ;;  %v1150_v23 = vpop.permute.xlu0 %1149 }
 0x1f3   :  { %v1285_v34 = vsel %vm1221_vm6, 1.0, %v6421_v22  ;;  %vm1220_vm7 = vcmp.eq.s32.totalorder %v1150_v23, %v6703_v11  ;;  %v1466_v51 = vpop.f32.mrb[37].mxu1  ;;  %5956 = vmatmul.mubr.msk.bf16.gmra.mrb[88].mxu0 %vm479_vm5, %v2151_v55  ;;  %vm5024_vm6 = vcmask 64512  }
 0x1f4   :  { %v1284_v52 = vsel %vm1220_vm7, 1.0, %v6421_v22  ;;  %v5832_v1 = vpop.f32.mrb[38].mxu1  ;;  %vm5107_vm7 = vcmask 7168  }
 0x1f5   :  { %v1318_v28 = vpack.c.bf16 %v1285_v34, %v1284_v52  ;;  %v7786_v5 = vpack.c.bf16 %v5832_v1, %v5831_v36  ;;  %v1469_v35 = vpop.f32.mrb[39].mxu1  ;;  %v1987_v43 = vpop.permute.xlu1 %1986 }
 0x1f6   :  { %v7788_v25 = vpack.c.bf16 %v1469_v35, %v1466_v51  ;;  %vm2055_vm8 = vcmp.eq.s32.totalorder %v1987_v43, %v6703_v11  ;;  %v5905_v58 = vpop.f32.mrb[36].mxu0  ;;  %v1984_v31 = vpop.permute.xlu0 %1983 }
 0x1f7   :  { %v2119_v41 = vsel %vm2055_vm8, 1.0, %v6421_v22  ;;  %vm2054_vm9 = vcmp.eq.s32.totalorder %v1984_v31, %v6703_v11  ;;  %5885 = vmatprep.mubr.msk.bf16.mxu1 %vm479_vm5, %v1318_v28  ;;  %v2300_v55 = vpop.f32.mrb[37].mxu0 }
 0x1f8   :  { %v2118_v23 = vsel %vm2054_vm9, 1.0, %v6421_v22  ;;  %v5906_v34 = vpop.f32.mrb[38].mxu0 }
 0x1f9   :  { %v2152_v36 = vpack.c.bf16 %v2119_v41, %v2118_v23  ;;  %v2542_v52 = vpack.c.bf16 %v5906_v34, %v5905_v58  ;;  %v2303_v1 = vpop.f32.mrb[39].mxu0  ;;  %v1159_v38 = vpop.permute.xlu1 %1158 }
 0x1fa   :  { %v2541_v35 = vpack.c.bf16 %v2303_v1, %v2300_v55  ;;  %vm1223_vm10 = vcmp.eq.s32.totalorder %v1159_v38, %v6703_v11  ;;  %v1156_v51 = vpop.permute.xlu0 %1155 }
 0x1fb   :  { %v1287_v43 = vsel %vm1223_vm10, 1.0, %v6421_v22  ;;  %vm1222_vm11 = vcmp.eq.s32.totalorder %v1156_v51, %v6703_v11  ;;  %5959 = vmatprep.mubr.msk.bf16.mxu0 %vm479_vm5, %v2152_v36 }
 0x1fc   :  { %v1286_v28 = vsel %vm1222_vm11, 1.0, %v6421_v22 }
 0x1fd   :  { %v1319_v31 = vpack.c.bf16 %v1287_v43, %v1286_v28  ;;  %v1993_v42 = vpop.permute.xlu1 %1992 }
 0x1fe   :  { %vm2057_vm13 = vcmp.eq.s32.totalorder %v1993_v42, %v6703_v11  ;;  %v1990_v41 = vpop.permute.xlu0 %1989  ;;  %v8706_v42 = vpack.c.bf16 %v7767_v32, %v7758_v50 }
 0x1ff   :  { %v2121_v58 = vsel %vm2057_vm13, 1.0, %v6421_v22  ;;  %vm2056_vm14 = vcmp.eq.s32.totalorder %v1990_v41, %v6703_v11  ;;  %5886 = vmatmul.mubr.msk.bf16.gmra.mrb[92].mxu1 %vm479_vm5, %v1319_v31 }
 0x200   :  { %v2120_v38 = vsel %vm2056_vm14, 1.0, %v6421_v22  ;;  %5967 = vmatprep.mubr.msk.bf16.mxu1 %vm2593_vm12, %v7750_v56 }
 0x201   :  { %v2153_v55 = vpack.c.bf16 %v2121_v58, %v2120_v38  ;;  %v8707_v58 = vpack.c.bf16 %v7762_v8, %v7753_v37 }
 0x202   :  { %v5835_v23 = vpop.f32.mrb[40].mxu1 }
 0x203   :  { %v1482_v34 = vpop.f32.mrb[41].mxu1  ;;  %5960 = vmatmul.mubr.msk.bf16.gmra.mrb[92].mxu0 %vm479_vm5, %v2153_v55  ;;  %vm4953_vm5 = vcmask 1041409  }
 0x204   :  { %v5836_v36 = vpop.f32.mrb[42].mxu1  ;;  %6103 = vmatprep.mubr.msk.bf16.mxu0 %vm2593_vm12, %v8706_v42 }
 0x205   :  { %v7812_v1 = vpack.c.bf16 %v5836_v36, %v5835_v23  ;;  %v1485_v51 = vpop.f32.mrb[43].mxu1 }
 0x206   :  { %v7814_v43 = vpack.c.bf16 %v1485_v51, %v1482_v34  ;;  %v5909_v22 = vpop.f32.mrb[40].mxu0 }
 0x207   :  { %v2316_v28 = vpop.f32.mrb[41].mxu0  ;;  %5968 = vmatmul.mubr.msk.bf16.vlgmr.msra.gmra.mrb[96].mxu1 %vm2593_vm12, %v7743_v16 }
 0x208   :  { %v5910_v31 = vpop.f32.mrb[42].mxu0  ;;  %5971 = vmatprep.mubr.msk.bf16.mxu1 %vm2593_vm12, %v7788_v25  ;;  %6032 = vmatpush3.bf16.msra.mxu1 %v7748_v3 }
 0x209   :  { %v2544_v41 = vpack.c.bf16 %v5910_v31, %v5909_v22  ;;  %v2319_v50 = vpop.f32.mrb[43].mxu0 }
 0x20a   :  { %v2543_v32 = vpack.c.bf16 %v2319_v50, %v2316_v28 }
 0x20b   :  { %6104 = vmatmul.mubr.msk.bf16.vlgmr.msra.gmra.mrb[96].mxu0 %vm2593_vm12, %v8707_v58  ;;  %v6385_v58 = vld [vmem:[%s8624_s2 + $0x8] sm:$0xff]  }
 0x20c   :  { %6107 = vmatprep.mubr.msk.bf16.mxu0 %vm2593_vm12, %v2541_v35  ;;  %6168 = vmatpush3.bf16.msra.mxu0 %v7748_v3 }
 0x20d   :  { %6033 = vmatprep.subr.bf16.mxu1 %v6385_v58  ;;  %6169 = vmatprep.subr.bf16.mxu0 %v6385_v58 }
 0x20e   :  { %6034 = vmatpush3.bf16.msra.mxu1 %v6385_v58 }
 0x20f   :  { %5972 = vmatmul.mubr.msk.bf16.gmra.mrb[100].mxu1 %vm2593_vm12, %v7786_v5 }
 0x210   :  { %5975 = vmatprep.mubr.msk.bf16.mxu1 %vm2593_vm12, %v7814_v43  ;;  %6170 = vmatpush3.bf16.msra.mxu0 %v6385_v58 }
 0x212   :  { %v5839_v38 = vpop.f32.mrb[44].mxu1 }
 0x213   :  { %v1498_v55 = vpop.f32.mrb[45].mxu1  ;;  %6108 = vmatmul.mubr.msk.bf16.gmra.mrb[100].mxu0 %vm2593_vm12, %v2542_v52 }
 0x214   :  { %v5840_v23 = vpop.f32.mrb[46].mxu1  ;;  %6111 = vmatprep.mubr.msk.bf16.mxu0 %vm2593_vm12, %v2543_v32 }
 0x215   :  { %v7833_v37 = vpack.c.bf16 %v5840_v23, %v5839_v38  ;;  %v1501_v8 = vpop.f32.mrb[47].mxu1 }
 0x216   :  { %v7835_v34 = vpack.c.bf16 %v1501_v8, %v1498_v55  ;;  %v5913_v35 = vpop.f32.mrb[44].mxu0 }
 0x217   :  { %v2332_v3 = vpop.f32.mrb[45].mxu0  ;;  %5976 = vmatmul.mubr.msk.bf16.gmra.mrb[104].mxu1 %vm2593_vm12, %v7812_v1 }
 0x218   :  { %v5914_v36 = vpop.f32.mrb[46].mxu0  ;;  %5979 = vmatprep.mubr.msk.bf16.mxu1 %vm2593_vm12, %v7835_v34 }
 0x219   :  { %v2546_v42 = vpack.c.bf16 %v5914_v36, %v5913_v35  ;;  %v2335_v51 = vpop.f32.mrb[47].mxu0 }
 0x21a   :  { %v2545_v52 = vpack.c.bf16 %v2335_v51, %v2332_v3 }
 0x21b   :  { %6112 = vmatmul.mubr.msk.bf16.gmra.mrb[104].mxu0 %vm2593_vm12, %v2544_v41 }
 0x21c   :  { %6115 = vmatprep.mubr.msk.bf16.mxu0 %vm2593_vm12, %v2545_v52 }
 0x21f   :  { %5980 = vmatmul.mubr.msk.bf16.gmra.mrb[108].mxu1 %vm2593_vm12, %v7833_v37 }
 0x222   :  { %v5843_v22 = vpop.f32.mrb[48].mxu1 }
 0x223   :  { %v1514_v28 = vpop.f32.mrb[49].mxu1  ;;  %6116 = vmatmul.mubr.msk.bf16.gmra.mrb[108].mxu0 %vm2593_vm12, %v2546_v42 }
 0x224   :  { %v5844_v31 = vpop.f32.mrb[50].mxu1 }
 0x225   :  { %v7846_v50 = vpack.c.bf16 %v5844_v31, %v5843_v22  ;;  %v1517_v32 = vpop.f32.mrb[51].mxu1 }
 0x226   :  { %v7851_v38 = vpack.c.bf16 %v1517_v32, %v1514_v28  ;;  %v5917_v41 = vpop.f32.mrb[48].mxu0 }
 0x227   :  { %v2348_v55 = vpop.f32.mrb[49].mxu0 }
 0x228   :  { %v5918_v23 = vpop.f32.mrb[50].mxu0  ;;  %5983 = vmatprep.mubr.msk.bf16.mxu1 %vm2593_vm12, %v7851_v38 }
 0x229   :  { %v2548_v8 = vpack.c.bf16 %v5918_v23, %v5917_v41  ;;  %v2351_v35 = vpop.f32.mrb[51].mxu0  ;;  %5984 = vmatmul.mubr.msk.bf16.gmra.mrb[112].mxu1 %vm2593_vm12, %v7846_v50 }
 0x22a   :  { %v2547_v3 = vpack.c.bf16 %v2351_v35, %v2348_v55 }
 0x22c   :  { %6119 = vmatprep.mubr.msk.bf16.mxu0 %vm2593_vm12, %v2547_v3 }
 0x22d   :  { %6120 = vmatmul.mubr.msk.bf16.gmra.mrb[112].mxu0 %vm2593_vm12, %v2548_v8 }
 0x232   :  { %v5847_v36 = vpop.f32.mrb[52].mxu1 }
 0x233   :  { %v1530_v42 = vpop.f32.mrb[53].mxu1 }
 0x234   :  { %v5848_v51 = vpop.f32.mrb[54].mxu1 }
 0x235   :  { %v7859_v52 = vpack.c.bf16 %v5848_v51, %v5847_v36  ;;  %v1533_v22 = vpop.f32.mrb[55].mxu1 }
 0x236   :  { %v7861_v28 = vpack.c.bf16 %v1533_v22, %v1530_v42  ;;  %v5921_v31 = vpop.f32.mrb[52].mxu0 }
 0x237   :  { %v2364_v32 = vpop.f32.mrb[53].mxu0 }
 0x238   :  { %v5922_v41 = vpop.f32.mrb[54].mxu0  ;;  %5987 = vmatprep.mubr.msk.bf16.mxu1 %vm2593_vm12, %v7861_v28 }
 0x239   :  { %v2550_v58 = vpack.c.bf16 %v5922_v41, %v5921_v31  ;;  %v2367_v55 = vpop.f32.mrb[55].mxu0  ;;  %5988 = vmatmul.mubr.msk.bf16.gmra.mrb[116].mxu1 %vm2593_vm12, %v7859_v52 }
 0x23a   :  { %v2549_v23 = vpack.c.bf16 %v2367_v55, %v2364_v32 }
 0x23c   :  { %6123 = vmatprep.mubr.msk.bf16.mxu0 %vm2593_vm12, %v2549_v23 }
 0x23d   :  { %6124 = vmatmul.mubr.msk.bf16.gmra.mrb[116].mxu0 %vm2593_vm12, %v2550_v58 }
 0x242   :  { %v5851_v8 = vpop.f32.mrb[56].mxu1 }
 0x243   :  { %v1546_v35 = vpop.f32.mrb[57].mxu1 }
 0x244   :  { %v5852_v3 = vpop.f32.mrb[58].mxu1 }
 0x245   :  { %v7869_v36 = vpack.c.bf16 %v5852_v3, %v5851_v8  ;;  %v1549_v42 = vpop.f32.mrb[59].mxu1 }
 0x246   :  { %v7871_v51 = vpack.c.bf16 %v1549_v42, %v1546_v35  ;;  %v5925_v22 = vpop.f32.mrb[56].mxu0 }
 0x247   :  { %v2380_v11 = vpop.f32.mrb[57].mxu0 }
 0x248   :  { %v5926_v31 = vpop.f32.mrb[58].mxu0  ;;  %5991 = vmatprep.mubr.msk.bf16.mxu1 %vm2593_vm12, %v7871_v51 }
 0x249   :  { %v2552_v41 = vpack.c.bf16 %v5926_v31, %v5925_v22  ;;  %v2383_v32 = vpop.f32.mrb[59].mxu0  ;;  %5992 = vmatmul.mubr.msk.bf16.gmra.mrb[120].mxu1 %vm2593_vm12, %v7869_v36 }
 0x24a   :  { %v2551_v58 = vpack.c.bf16 %v2383_v32, %v2380_v11 }
 0x24c   :  { %6127 = vmatprep.mubr.msk.bf16.mxu0 %vm2593_vm12, %v2551_v58 }
 0x24d   :  { %6128 = vmatmul.mubr.msk.bf16.gmra.mrb[120].mxu0 %vm2593_vm12, %v2552_v41 }
 0x252   :  { %v5855_v55 = vpop.f32.mrb[60].mxu1 }
 0x253   :  { %v1562_v23 = vpop.f32.mrb[61].mxu1 }
 0x254   :  { %v5856_v8 = vpop.f32.mrb[62].mxu1 }
 0x255   :  { %v7879_v35 = vpack.c.bf16 %v5856_v8, %v5855_v55  ;;  %v1565_v3 = vpop.f32.mrb[63].mxu1 }
 0x256   :  { %v7881_v42 = vpack.c.bf16 %v1565_v3, %v1562_v23  ;;  %v5929_v40 = vpop.f32.mrb[60].mxu0 }
 0x257   :  { %8708 = vst [vmem:[#allocation34_spill] sm:$0xff] %v7879_v35  ;;  %v2396_v48 = vpop.f32.mrb[61].mxu0 }
 0x258   :  { %v5930_v22 = vpop.f32.mrb[62].mxu0  ;;  %5995 = vmatprep.mubr.msk.bf16.mxu1 %vm2593_vm12, %v7881_v42 }
 0x259   :  { %v2554_v31 = vpack.c.bf16 %v5930_v22, %v5929_v40  ;;  %v2399_v11 = vpop.f32.mrb[63].mxu0  ;;  %5996 = vmatmul.mubr.msk.bf16.gmra.mrb[124].mxu1 %vm2593_vm12, %v7879_v35 }
 0x25a   :  { %v2553_v41 = vpack.c.bf16 %v2399_v11, %v2396_v48 }
 0x25c   :  { %6131 = vmatprep.mubr.msk.bf16.mxu0 %vm2593_vm12, %v2553_v41 }
 0x25d   :  { %6132 = vmatmul.mubr.msk.bf16.gmra.mrb[124].mxu0 %vm2593_vm12, %v2554_v31 }
 0x262   :  { %v5859_v32 = vpop.f32.mrb[64].mxu1 }
 0x263   :  { %v1578_v58 = vpop.f32.mrb[65].mxu1 }
 0x264   :  { %v5860_v55 = vpop.f32.mrb[66].mxu1 }
 0x265   :  { %v7889_v23 = vpack.c.bf16 %v5860_v55, %v5859_v32  ;;  %v1581_v8 = vpop.f32.mrb[67].mxu1 }
 0x266   :  { %v7891_v3 = vpack.c.bf16 %v1581_v8, %v1578_v58  ;;  %v5933_v57 = vpop.f32.mrb[64].mxu0 }
 0x267   :  { %8709 = vst [vmem:[#allocation35_spill] sm:$0xff] %v7889_v23  ;;  %v2412_v63 = vpop.f32.mrb[65].mxu0 }
 0x268   :  { %8710 = vst [vmem:[#allocation36_spill] sm:$0xff] %v7891_v3  ;;  %v5934_v40 = vpop.f32.mrb[66].mxu0  ;;  %5999 = vmatprep.mubr.msk.bf16.mxu1 %vm2593_vm12, %v7891_v3 }
 0x269   :  { %v2556_v22 = vpack.c.bf16 %v5934_v40, %v5933_v57  ;;  %v2415_v48 = vpop.f32.mrb[67].mxu0  ;;  %6000 = vmatmul.mubr.msk.bf16.gmra.mrb[128].mxu1 %vm2593_vm12, %v7889_v23 }
 0x26a   :  { %v2555_v31 = vpack.c.bf16 %v2415_v48, %v2412_v63 }
 0x26c   :  { %6135 = vmatprep.mubr.msk.bf16.mxu0 %vm2593_vm12, %v2555_v31 }
 0x26d   :  { %6136 = vmatmul.mubr.msk.bf16.gmra.mrb[128].mxu0 %vm2593_vm12, %v2556_v22 }
 0x272   :  { %v5863_v11 = vpop.f32.mrb[68].mxu1 }
 0x273   :  { %v1594_v41 = vpop.f32.mrb[69].mxu1 }
 0x274   :  { %v5864_v32 = vpop.f32.mrb[70].mxu1 }
 0x275   :  { %v7899_v58 = vpack.c.bf16 %v5864_v32, %v5863_v11  ;;  %v1597_v55 = vpop.f32.mrb[71].mxu1 }
 0x276   :  { %v7901_v8 = vpack.c.bf16 %v1597_v55, %v1594_v41  ;;  %v5937_v35 = vpop.f32.mrb[68].mxu0 }
 0x277   :  { %8711 = vst [vmem:[#allocation37_spill] sm:$0xff] %v7899_v58  ;;  %v2428_v3 = vpop.f32.mrb[69].mxu0 }
 0x278   :  { %8712 = vst [vmem:[#allocation38_spill] sm:$0xff] %v7901_v8  ;;  %v5938_v57 = vpop.f32.mrb[70].mxu0  ;;  %6003 = vmatprep.mubr.msk.bf16.mxu1 %vm2593_vm12, %v7901_v8 }
 0x279   :  { %v2558_v40 = vpack.c.bf16 %v5938_v57, %v5937_v35  ;;  %v2431_v63 = vpop.f32.mrb[71].mxu0  ;;  %6004 = vmatmul.mubr.msk.bf16.gmra.mrb[132].mxu1 %vm2593_vm12, %v7899_v58 }
 0x27a   :  { %v2557_v22 = vpack.c.bf16 %v2431_v63, %v2428_v3 }
 0x27c   :  { %6139 = vmatprep.mubr.msk.bf16.mxu0 %vm2593_vm12, %v2557_v22 }
 0x27d   :  { %6140 = vmatmul.mubr.msk.bf16.gmra.mrb[132].mxu0 %vm2593_vm12, %v2558_v40 }
 0x282   :  { %v5867_v48 = vpop.f32.mrb[72].mxu1 }
 0x283   :  { %v1610_v31 = vpop.f32.mrb[73].mxu1 }
 0x284   :  { %v5868_v11 = vpop.f32.mrb[74].mxu1 }
 0x285   :  { %v7909_v41 = vpack.c.bf16 %v5868_v11, %v5867_v48  ;;  %v1613_v32 = vpop.f32.mrb[75].mxu1 }
 0x286   :  { %v7911_v55 = vpack.c.bf16 %v1613_v32, %v1610_v31  ;;  %v5941_v23 = vpop.f32.mrb[72].mxu0 }
 0x287   :  { %8713 = vst [vmem:[#allocation39_spill] sm:$0xff] %v7909_v41  ;;  %v2444_v8 = vpop.f32.mrb[73].mxu0 }
 0x288   :  { %8714 = vst [vmem:[#allocation40_spill] sm:$0xff] %v7911_v55  ;;  %v5942_v35 = vpop.f32.mrb[74].mxu0  ;;  %6007 = vmatprep.mubr.msk.bf16.mxu1 %vm2593_vm12, %v7911_v55 }
 0x289   :  { %v2560_v57 = vpack.c.bf16 %v5942_v35, %v5941_v23  ;;  %v2447_v3 = vpop.f32.mrb[75].mxu0  ;;  %6008 = vmatmul.mubr.msk.bf16.gmra.mrb[136].mxu1 %vm2593_vm12, %v7909_v41 }
 0x28a   :  { %v2559_v40 = vpack.c.bf16 %v2447_v3, %v2444_v8 }
 0x28c   :  { %6143 = vmatprep.mubr.msk.bf16.mxu0 %vm2593_vm12, %v2559_v40 }
 0x28d   :  { %6144 = vmatmul.mubr.msk.bf16.gmra.mrb[136].mxu0 %vm2593_vm12, %v2560_v57 }
 0x292   :  { %v5871_v63 = vpop.f32.mrb[76].mxu1 }
 0x293   :  { %v1626_v22 = vpop.f32.mrb[77].mxu1 }
 0x294   :  { %v5872_v48 = vpop.f32.mrb[78].mxu1 }
 0x295   :  { %v7919_v31 = vpack.c.bf16 %v5872_v48, %v5871_v63  ;;  %v1629_v11 = vpop.f32.mrb[79].mxu1 }
 0x296   :  { %v7921_v32 = vpack.c.bf16 %v1629_v11, %v1626_v22  ;;  %v5945_v58 = vpop.f32.mrb[76].mxu0 }
 0x297   :  { %8715 = vst [vmem:[#allocation41_spill] sm:$0xff] %v7919_v31  ;;  %v2460_v55 = vpop.f32.mrb[77].mxu0 }
 0x298   :  { %8716 = vst [vmem:[#allocation42_spill] sm:$0xff] %v7921_v32  ;;  %v5946_v23 = vpop.f32.mrb[78].mxu0  ;;  %6011 = vmatprep.mubr.msk.bf16.mxu1 %vm2593_vm12, %v7921_v32 }
 0x299   :  { %v2562_v35 = vpack.c.bf16 %v5946_v23, %v5945_v58  ;;  %v2463_v8 = vpop.f32.mrb[79].mxu0  ;;  %6012 = vmatmul.mubr.msk.bf16.gmra.mrb[140].mxu1 %vm2593_vm12, %v7919_v31 }
 0x29a   :  { %v2561_v57 = vpack.c.bf16 %v2463_v8, %v2460_v55 }
 0x29c   :  { %6147 = vmatprep.mubr.msk.bf16.mxu0 %vm2593_vm12, %v2561_v57 }
 0x29d   :  { %6148 = vmatmul.mubr.msk.bf16.gmra.mrb[140].mxu0 %vm2593_vm12, %v2562_v35 }
 0x2a2   :  { %v5875_v3 = vpop.f32.mrb[80].mxu1 }
 0x2a3   :  { %v1642_v40 = vpop.f32.mrb[81].mxu1 }
 0x2a4   :  { %v5876_v63 = vpop.f32.mrb[82].mxu1 }
 0x2a5   :  { %v7929_v22 = vpack.c.bf16 %v5876_v63, %v5875_v3  ;;  %v1645_v48 = vpop.f32.mrb[83].mxu1 }
 0x2a6   :  { %v7931_v11 = vpack.c.bf16 %v1645_v48, %v1642_v40  ;;  %v5949_v41 = vpop.f32.mrb[80].mxu0 }
 0x2a7   :  { %8717 = vst [vmem:[#allocation43_spill] sm:$0xff] %v7929_v22  ;;  %v2476_v32 = vpop.f32.mrb[81].mxu0 }
 0x2a8   :  { %8718 = vst [vmem:[#allocation44_spill] sm:$0xff] %v7931_v11  ;;  %v5950_v58 = vpop.f32.mrb[82].mxu0  ;;  %6015 = vmatprep.mubr.msk.bf16.mxu1 %vm2593_vm12, %v7931_v11 }
 0x2a9   :  { %v2564_v23 = vpack.c.bf16 %v5950_v58, %v5949_v41  ;;  %v2479_v55 = vpop.f32.mrb[83].mxu0  ;;  %6016 = vmatmul.mubr.msk.bf16.gmra.mrb[144].mxu1 %vm2593_vm12, %v7929_v22 }
 0x2aa   :  { %v2563_v35 = vpack.c.bf16 %v2479_v55, %v2476_v32 }
 0x2ac   :  { %6151 = vmatprep.mubr.msk.bf16.mxu0 %vm2593_vm12, %v2563_v35 }
 0x2ad   :  { %6152 = vmatmul.mubr.msk.bf16.gmra.mrb[144].mxu0 %vm2593_vm12, %v2564_v23 }
 0x2b2   :  { %v5879_v8 = vpop.f32.mrb[84].mxu1 }
 0x2b3   :  { %v1658_v57 = vpop.f32.mrb[85].mxu1 }
 0x2b4   :  { %v5880_v3 = vpop.f32.mrb[86].mxu1 }
 0x2b5   :  { %v7939_v40 = vpack.c.bf16 %v5880_v3, %v5879_v8  ;;  %v1661_v63 = vpop.f32.mrb[87].mxu1 }
 0x2b6   :  { %v7941_v48 = vpack.c.bf16 %v1661_v63, %v1658_v57  ;;  %v5953_v31 = vpop.f32.mrb[84].mxu0 }
 0x2b7   :  { %8719 = vst [vmem:[#allocation45_spill] sm:$0xff] %v7939_v40  ;;  %v2492_v11 = vpop.f32.mrb[85].mxu0 }
 0x2b8   :  { %8720 = vst [vmem:[#allocation46_spill] sm:$0xff] %v7941_v48  ;;  %v5954_v41 = vpop.f32.mrb[86].mxu0  ;;  %6019 = vmatprep.mubr.msk.bf16.mxu1 %vm2593_vm12, %v7941_v48 }
 0x2b9   :  { %v2566_v58 = vpack.c.bf16 %v5954_v41, %v5953_v31  ;;  %v2495_v32 = vpop.f32.mrb[87].mxu0  ;;  %6020 = vmatmul.mubr.msk.bf16.gmra.mrb[148].mxu1 %vm2593_vm12, %v7939_v40 }
 0x2ba   :  { %v2565_v23 = vpack.c.bf16 %v2495_v32, %v2492_v11 }
 0x2bc   :  { %6155 = vmatprep.mubr.msk.bf16.mxu0 %vm2593_vm12, %v2565_v23 }
 0x2bd   :  { %6156 = vmatmul.mubr.msk.bf16.gmra.mrb[148].mxu0 %vm2593_vm12, %v2566_v58 }
 0x2c2   :  { %v5883_v55 = vpop.f32.mrb[88].mxu1 }
 0x2c3   :  { %v1674_v35 = vpop.f32.mrb[89].mxu1 }
 0x2c4   :  { %v5884_v8 = vpop.f32.mrb[90].mxu1 }
 0x2c5   :  { %v7949_v57 = vpack.c.bf16 %v5884_v8, %v5883_v55  ;;  %v1677_v3 = vpop.f32.mrb[91].mxu1 }
 0x2c6   :  { %v7951_v63 = vpack.c.bf16 %v1677_v3, %v1674_v35  ;;  %v5957_v22 = vpop.f32.mrb[88].mxu0 }
 0x2c7   :  { %v2508_v48 = vpop.f32.mrb[89].mxu0 }
 0x2c8   :  { %8721 = vst [vmem:[#allocation47_spill] sm:$0xff] %v7951_v63  ;;  %v5958_v31 = vpop.f32.mrb[90].mxu0  ;;  %6023 = vmatprep.mubr.msk.bf16.mxu1 %vm2593_vm12, %v7951_v63 }
 0x2c9   :  { %v2568_v41 = vpack.c.bf16 %v5958_v31, %v5957_v22  ;;  %v2511_v11 = vpop.f32.mrb[91].mxu0  ;;  %6024 = vmatmul.mubr.msk.bf16.gmra.mrb[152].mxu1 %vm2593_vm12, %v7949_v57 }
 0x2ca   :  { %v2567_v58 = vpack.c.bf16 %v2511_v11, %v2508_v48  ;;  %v8722_v11 = vpack.c.bf16 %v7354_v53, %v7341_v47  ;;  %v8725_v47 = vpack.c.bf16 %v7417_v29, %v7409_v24  ;;  %v8728_v53 = vpack.c.bf16 %v7531_v18, %v7521_v6  ;;  %v8740_v18 = vld [vmem:[#allocation36_spill] sm:$0xff] }
 0x2cb   :  { %v8729_v24 = vpack.c.bf16 %v7526_v21, %v7518_v4  ;;  %v8731_v29 = vpack.c.bf16 %v7570_v0, %v7562_v13  ;;  %v8737_v4 = vpack.c.bf16 %v7702_v26, %v7694_v30  ;;  %v8738_v6 = vpack.c.bf16 %v7383_v2, %v7367_v60  ;;  %v8739_v21 = vld [vmem:[#allocation34_spill] sm:$0xff]  ;;  %v8741_v13 = vld [vmem:[#allocation5_spill] sm:$0xff]  ;;  %v8749_v2 = vld [vmem:[#allocation8_spill] sm:$0xff] }
 0x2cc   :  { %6159 = vmatprep.mubr.msk.bf16.mxu0 %vm2593_vm12, %v2567_v58  ;;  %v8748_v60 = vld [vmem:[#allocation38_spill] sm:$0xff]  ;;  %v8755_v30 = vld [vmem:[#allocation37_spill] sm:$0xff]  ;;  %v8757_v26 = vld [vmem:[#allocation12_spill] sm:$0xff] }
 0x2cd   :  { %6160 = vmatmul.mubr.msk.bf16.gmra.mrb[152].mxu0 %vm2593_vm12, %v2568_v41  ;;  %v8774_v58 = vld [vmem:[#allocation18_spill] sm:$0xff] }
 0x2d2   :  { %v5887_v32 = vpop.f32.mrb[92].mxu1 }
 0x2d3   :  { %v1690_v23 = vpop.f32.mrb[93].mxu1 }
 0x2d4   :  { %v5888_v55 = vpop.f32.mrb[94].mxu1 }
 0x2d5   :  { %v7959_v35 = vpack.c.bf16 %v5888_v55, %v5887_v32  ;;  %v1693_v8 = vpop.f32.mrb[95].mxu1  ;;  %v8777_v55 = vld [vmem:[#allocation23_spill] sm:$0xff] }
 0x2d6   :  { %v7961_v3 = vpack.c.bf16 %v1693_v8, %v1690_v23  ;;  %v5961_v40 = vpop.f32.mrb[92].mxu0  ;;  %v8776_v23 = vld [vmem:[#allocation25_spill] sm:$0xff] }
 0x2d7   :  { %v2524_v63 = vpop.f32.mrb[93].mxu0  ;;  %v8778_v8 = vpack.c.bf16 %v8776_v23, %v8777_v55 }
 0x2d8   :  { %v5962_v22 = vpop.f32.mrb[94].mxu0  ;;  %6027 = vmatprep.mubr.msk.bf16.mxu1 %vm2593_vm12, %v7961_v3 }
 0x2d9   :  { %v2570_v31 = vpack.c.bf16 %v5962_v22, %v5961_v40  ;;  %v2527_v48 = vpop.f32.mrb[95].mxu0  ;;  %6028 = vmatmul.mubr.msk.bf16.gmra.mrb[156].mxu1 %vm2593_vm12, %v7959_v35  ;;  %v8723_v40 = vpack.c.bf16 %v7346_v49, %v7338_v45  ;;  %v8726_v45 = vpack.c.bf16 %v7487_v20, %v7477_v12  ;;  %v8727_v49 = vpack.c.bf16 %v7482_v15, %v7471_v9  ;;  %v8779_v22 = vld [vmem:[#allocation43_spill] sm:$0xff] }
 0x2da   :  { %v2569_v41 = vpack.c.bf16 %v2527_v48, %v2524_v63  ;;  %6035 = vmatprep.mubr.msk.bf16.mxu1 %vm2593_vm12, %v8722_v11  ;;  %v8724_v63 = vpack.c.bf16 %v7425_v33, %v7412_v27  ;;  %v8730_v27 = vpack.c.bf16 %v7575_v7, %v7565_v61  ;;  %v8732_v33 = vpack.c.bf16 %v7619_v62, %v7609_v59  ;;  %v8742_v61 = vld [vmem:[#allocation4_spill] sm:$0xff]  ;;  %v8744_v7 = vld [vmem:[#allocation9_spill] sm:$0xff]  ;;  %v8750_v62 = vld [vmem:[#allocation6_spill] sm:$0xff] }
 0x2db   :  { %v8733_v9 = vpack.c.bf16 %v7614_v10, %v7606_v46  ;;  %v8734_v12 = vpack.c.bf16 %v7663_v17, %v7653_v39  ;;  %v8735_v15 = vpack.c.bf16 %v7658_v44, %v7650_v19  ;;  %v8736_v20 = vpack.c.bf16 %v7707_v54, %v7697_v14  ;;  %v8745_v46 = vld [vmem:[#allocation7_spill] sm:$0xff]  ;;  %v8752_v39 = vld [vmem:[#allocation13_spill] sm:$0xff]  ;;  %v8756_v14 = vld [vmem:[#allocation40_spill] sm:$0xff] }
 0x2dc   :  { %6163 = vmatprep.mubr.msk.bf16.mxu0 %vm2593_vm12, %v2569_v41  ;;  %v8743_v0 = vpack.c.bf16 %v8741_v13, %v8742_v61  ;;  %v8746_v59 = vpack.c.bf16 %v8744_v7, %v8745_v46  ;;  %v8747_v10 = vld [vmem:[#allocation35_spill] sm:$0xff]  ;;  %v8751_v19 = vpack.c.bf16 %v8749_v2, %v8750_v62  ;;  %v8758_v54 = vld [vmem:[#allocation10_spill] sm:$0xff]  ;;  %v8781_v48 = vld [vmem:[#allocation24_spill] sm:$0xff] }
 0x2dd   :  { %6164 = vmatmul.mubr.msk.bf16.gmra.mrb[156].mxu0 %vm2593_vm12, %v2570_v31  ;;  %v8753_v44 = vld [vmem:[#allocation11_spill] sm:$0xff]  ;;  %v8780_v31 = vld [vmem:[#allocation46_spill] sm:$0xff] }
 0x2de   :  { %6171 = vmatprep.mubr.msk.bf16.mxu0 %vm2593_vm12, %v7750_v56  ;;  %v8754_v17 = vpack.c.bf16 %v8752_v39, %v8753_v44  ;;  %v8760_v56 = vld [vmem:[#allocation17_spill] sm:$0xff]  ;;  %v8782_v41 = vld [vmem:[#allocation22_spill] sm:$0xff] }
 0x2df   :  { %v8783_v11 = vpack.c.bf16 %v8781_v48, %v8782_v41 }
 0x2e1   :  { %6036 = vmatmul.mubr.msk.bf16.vlgmr.msra.gmra.mrb[96].mxu1 %vm2593_vm12, %v8723_v40  ;;  %v8784_v40 = vld [vmem:[#allocation29_spill] sm:$0xff] }
 0x2e2   :  { %6039 = vmatprep.mubr.msk.bf16.mxu1 %vm2593_vm12, %v8724_v63  ;;  %v8785_v63 = vld [vmem:[#allocation27_spill] sm:$0xff] }
 0x2e5   :  { %6172 = vmatmul.mubr.msk.bf16.vlgmr.msra.gmra.mrb[96].mxu0 %vm2593_vm12, %v7743_v16  ;;  %v8759_v16 = vpack.c.bf16 %v8757_v26, %v8758_v54 }
 0x2e6   :  { %6175 = vmatprep.mubr.msk.bf16.mxu0 %vm2593_vm12, %v7788_v25 }
 0x2e9   :  { %6040 = vmatmul.mubr.msk.bf16.gmra.mrb[100].mxu1 %vm2593_vm12, %v8725_v47  ;;  %v8786_v47 = vpack.c.bf16 %v8784_v40, %v8785_v63 }
 0x2ea   :  { %6043 = vmatprep.mubr.msk.bf16.mxu1 %vm2593_vm12, %v8726_v45  ;;  %v8787_v45 = vld [vmem:[#allocation45_spill] sm:$0xff] }
 0x2ed   :  { %6176 = vmatmul.mubr.msk.bf16.gmra.mrb[100].mxu0 %vm2593_vm12, %v7786_v5  ;;  %v8761_v5 = vld [vmem:[#allocation15_spill] sm:$0xff] }
 0x2ee   :  { %6179 = vmatprep.mubr.msk.bf16.mxu0 %vm2593_vm12, %v7814_v43  ;;  %v8762_v25 = vpack.c.bf16 %v8760_v56, %v8761_v5  ;;  %v8764_v43 = vld [vmem:[#allocation42_spill] sm:$0xff] }
 0x2f1   :  { %6044 = vmatmul.mubr.msk.bf16.gmra.mrb[104].mxu1 %vm2593_vm12, %v8727_v49  ;;  %v8788_v49 = vld [vmem:[#allocation47_spill] sm:$0xff] }
 0x2f2   :  { %6047 = vmatprep.mubr.msk.bf16.mxu1 %vm2593_vm12, %v8728_v53  ;;  %v8789_v53 = vld [vmem:[#allocation28_spill] sm:$0xff] }
 0x2f5   :  { %6180 = vmatmul.mubr.msk.bf16.gmra.mrb[104].mxu0 %vm2593_vm12, %v7812_v1  ;;  %v8763_v1 = vld [vmem:[#allocation39_spill] sm:$0xff] }
 0x2f6   :  { %6183 = vmatprep.mubr.msk.bf16.mxu0 %vm2593_vm12, %v7835_v34  ;;  %v8766_v34 = vld [vmem:[#allocation14_spill] sm:$0xff] }
 0x2f9   :  { %6048 = vmatmul.mubr.msk.bf16.gmra.mrb[108].mxu1 %vm2593_vm12, %v8729_v24  ;;  %v8790_v24 = vld [vmem:[#allocation26_spill] sm:$0xff] }
 0x2fa   :  { %6051 = vmatprep.mubr.msk.bf16.mxu1 %vm2593_vm12, %v8730_v27  ;;  %v8791_v27 = vpack.c.bf16 %v8789_v53, %v8790_v24 }
 0x2fd   :  { %6184 = vmatmul.mubr.msk.bf16.gmra.mrb[108].mxu0 %vm2593_vm12, %v7833_v37  ;;  %v8765_v37 = vld [vmem:[#allocation16_spill] sm:$0xff] }
 0x2fe   :  { %6187 = vmatprep.mubr.msk.bf16.mxu0 %vm2593_vm12, %v7851_v38  ;;  %v8768_v38 = vld [vmem:[#allocation21_spill] sm:$0xff] }
 0x301   :  { %6052 = vmatmul.mubr.msk.bf16.gmra.mrb[112].mxu1 %vm2593_vm12, %v8731_v29  ;;  %v8792_v29 = vld [vmem:[#allocation33_spill] sm:$0xff] }
 0x302   :  { %6055 = vmatprep.mubr.msk.bf16.mxu1 %vm2593_vm12, %v8732_v33  ;;  %v8793_v33 = vld [vmem:[#allocation31_spill] sm:$0xff] }
 0x305   :  { %6188 = vmatmul.mubr.msk.bf16.gmra.mrb[112].mxu0 %vm2593_vm12, %v7846_v50  ;;  %v8767_v50 = vpack.c.bf16 %v8765_v37, %v8766_v34 }
 0x306   :  { %6191 = vmatprep.mubr.msk.bf16.mxu0 %vm2593_vm12, %v7861_v28 }
 0x309   :  { %6056 = vmatmul.mubr.msk.bf16.gmra.mrb[116].mxu1 %vm2593_vm12, %v8733_v9  ;;  %v8794_v9 = vpack.c.bf16 %v8792_v29, %v8793_v33 }
 0x30a   :  { %6059 = vmatprep.mubr.msk.bf16.mxu1 %vm2593_vm12, %v8734_v12  ;;  %v8795_v12 = vld [vmem:[#allocation32_spill] sm:$0xff] }
 0x30d   :  { %6192 = vmatmul.mubr.msk.bf16.gmra.mrb[116].mxu0 %vm2593_vm12, %v7859_v52  ;;  %v8769_v52 = vld [vmem:[#allocation19_spill] sm:$0xff] }
 0x30e   :  { %6195 = vmatprep.mubr.msk.bf16.mxu0 %vm2593_vm12, %v7871_v51  ;;  %v8770_v28 = vpack.c.bf16 %v8768_v38, %v8769_v52  ;;  %v8772_v51 = vld [vmem:[#allocation44_spill] sm:$0xff] }
 0x311   :  { %6060 = vmatmul.mubr.msk.bf16.gmra.mrb[120].mxu1 %vm2593_vm12, %v8735_v15  ;;  %v8796_v15 = vld [vmem:[#allocation30_spill] sm:$0xff] }
 0x312   :  { %6063 = vmatprep.mubr.msk.bf16.mxu1 %vm2593_vm12, %v8736_v20  ;;  %v8797_v20 = vpack.c.bf16 %v8795_v12, %v8796_v15 }
 0x315   :  { %6196 = vmatmul.mubr.msk.bf16.gmra.mrb[120].mxu0 %vm2593_vm12, %v7869_v36  ;;  %v8771_v36 = vld [vmem:[#allocation41_spill] sm:$0xff] }
 0x316   :  { %6199 = vmatprep.mubr.msk.bf16.mxu0 %vm2593_vm12, %v7881_v42  ;;  %v8773_v42 = vld [vmem:[#allocation20_spill] sm:$0xff] }
 0x317   :  { %v8775_v32 = vpack.c.bf16 %v8773_v42, %v8774_v58 }
 0x319   :  { %6064 = vmatmul.mubr.msk.bf16.gmra.mrb[124].mxu1 %vm2593_vm12, %v8737_v4  ;;  %v8164_v4 = vld [vmem:[%s8625_s3] ss:$0 sm:$0xff] }
 0x31a   :  { %6067 = vmatprep.mubr.msk.bf16.mxu1 %vm2593_vm12, %v8738_v6 }
 0x31d   :  { %6200 = vmatmul.mubr.msk.bf16.gmra.mrb[124].mxu0 %vm2593_vm12, %v8739_v21 }
 0x31e   :  { %6203 = vmatprep.mubr.msk.bf16.mxu0 %vm2593_vm12, %v8740_v18 }
 0x321   :  { %6068 = vmatmul.mubr.msk.bf16.gmra.mrb[128].mxu1 %vm2593_vm12, %v8743_v0 }
 0x322   :  { %6071 = vmatprep.mubr.msk.bf16.mxu1 %vm2593_vm12, %v8746_v59 }
 0x325   :  { %6204 = vmatmul.mubr.msk.bf16.gmra.mrb[128].mxu0 %vm2593_vm12, %v8747_v10 }
 0x326   :  { %6207 = vmatprep.mubr.msk.bf16.mxu0 %vm2593_vm12, %v8748_v60 }
 0x329   :  { %6072 = vmatmul.mubr.msk.bf16.gmra.mrb[132].mxu1 %vm2593_vm12, %v8751_v19 }
 0x32a   :  { %6075 = vmatprep.mubr.msk.bf16.mxu1 %vm2593_vm12, %v8754_v17 }
 0x32d   :  { %6208 = vmatmul.mubr.msk.bf16.gmra.mrb[132].mxu0 %vm2593_vm12, %v8755_v30 }
 0x32e   :  { %6211 = vmatprep.mubr.msk.bf16.mxu0 %vm2593_vm12, %v8756_v14  ;;  %v8177_v14 = vld [vmem:[%s8626_s4] sm:$0xff] }
 0x331   :  { %6076 = vmatmul.mubr.msk.bf16.gmra.mrb[136].mxu1 %vm2593_vm12, %v8759_v16 }
 0x332   :  { %6079 = vmatprep.mubr.msk.bf16.mxu1 %vm2593_vm12, %v8762_v25 }
 0x335   :  { %6212 = vmatmul.mubr.msk.bf16.gmra.mrb[136].mxu0 %vm2593_vm12, %v8763_v1 }
 0x336   :  { %6215 = vmatprep.mubr.msk.bf16.mxu0 %vm2593_vm12, %v8764_v43 }
 0x339   :  { %6080 = vmatmul.mubr.msk.bf16.gmra.mrb[140].mxu1 %vm2593_vm12, %v8767_v50 }
 0x33a   :  { %6083 = vmatprep.mubr.msk.bf16.mxu1 %vm2593_vm12, %v8770_v28 }
 0x33d   :  { %6216 = vmatmul.mubr.msk.bf16.gmra.mrb[140].mxu0 %vm2593_vm12, %v8771_v36 }
 0x33e   :  { %6219 = vmatprep.mubr.msk.bf16.mxu0 %vm2593_vm12, %v8772_v51 }
 0x341   :  { %6084 = vmatmul.mubr.msk.bf16.gmra.mrb[144].mxu1 %vm2593_vm12, %v8775_v32 }
 0x342   :  { %6087 = vmatprep.mubr.msk.bf16.mxu1 %vm2593_vm12, %v8778_v8 }
 0x345   :  { %6220 = vmatmul.mubr.msk.bf16.gmra.mrb[144].mxu0 %vm2593_vm12, %v8779_v22 }
 0x346   :  { %6223 = vmatprep.mubr.msk.bf16.mxu0 %vm2593_vm12, %v8780_v31 }
 0x349   :  { %6088 = vmatmul.mubr.msk.bf16.gmra.mrb[148].mxu1 %vm2593_vm12, %v8783_v11 }
 0x34a   :  { %6091 = vmatprep.mubr.msk.bf16.mxu1 %vm2593_vm12, %v8786_v47 }
 0x34d   :  { %6224 = vmatmul.mubr.msk.bf16.gmra.mrb[148].mxu0 %vm2593_vm12, %v8787_v45 }
 0x34e   :  { %6227 = vmatprep.mubr.msk.bf16.mxu0 %vm2593_vm12, %v8788_v49 }
 0x351   :  { %6092 = vmatmul.mubr.msk.bf16.gmra.mrb[152].mxu1 %vm2593_vm12, %v8791_v27 }
 0x352   :  { %6095 = vmatprep.mubr.msk.bf16.mxu1 %vm2593_vm12, %v8794_v9 }
 0x355   :  { %6228 = vmatmul.mubr.msk.bf16.gmra.mrb[152].mxu0 %vm2593_vm12, %v7949_v57 }
 0x356   :  { %6231 = vmatprep.mubr.msk.bf16.mxu0 %vm2593_vm12, %v7961_v3 }
 0x359   :  { %6096 = vmatmul.mubr.msk.bf16.gmra.mrb[156].mxu1 %vm2593_vm12, %v8797_v20 }
 0x35d   :  { %6232 = vmatmul.mubr.msk.bf16.gmra.mrb[156].mxu0 %vm2593_vm12, %v7959_v35 }
 0x3b4   :  { %v6037_v6 = vpop.f32.mrb[96].mxu1 }
 0x3b5   :  { %v3121_v21 = vpop.f32.mrb[97].mxu1  ;;  %v3384_v57 = vadd.f32 %v6037_v6, %v8164_v4 }
 0x3b6   :  { %v6038_v18 = vpop.f32.mrb[98].mxu1  ;;  %v3382_v3 = vadd.f32 %v8164_v4, %v3121_v21 }
 0x3b7   :  { %v3124_v13 = vpop.f32.mrb[99].mxu1  ;;  %v3385_v0 = vadd.f32 %v6038_v18, %v8164_v4  ;;  %v3448_v60 = vmax.f32 %v3384_v57, 0.0 }
 0x3b8   :  { %v6173_v61 = vpop.f32.mrb[96].mxu0  ;;  %v3383_v35 = vadd.f32 %v8164_v4, %v3124_v13  ;;  %v3446_v39 = vmax.f32 %v3382_v3, 0.0 }
 0x3b9   :  { %v4186_v7 = vadd.f32 %v6173_v61, %v8164_v4  ;;  %v3929_v46 = vpop.f32.mrb[97].mxu0  ;;  %v3449_v26 = vmax.f32 %v3385_v0, 0.0 }
 0x3ba   :  { %v4184_v59 = vadd.f32 %v8164_v4, %v3929_v46  ;;  %v6174_v10 = vpop.f32.mrb[98].mxu0  ;;  %v3447_v5 = vmax.f32 %v3383_v35, 0.0 }
 0x3bb   :  { %v4250_v2 = vmax.f32 %v4186_v7, 0.0  ;;  %v4187_v62 = vadd.f32 %v6174_v10, %v8164_v4  ;;  %v3932_v19 = vpop.f32.mrb[99].mxu0 }
 0x3bc   :  { %v4248_v44 = vmax.f32 %v4184_v59, 0.0  ;;  %v4185_v17 = vadd.f32 %v8164_v4, %v3932_v19  ;;  %v6041_v30 = vpop.f32.mrb[100].mxu1 }
 0x3bd   :  { %v4314_v54 = vmax.f32 %v3448_v60, %v4250_v2  ;;  %v4251_v16 = vmax.f32 %v4187_v62, 0.0  ;;  %v3137_v56 = vpop.f32.mrb[101].mxu1  ;;  %v3388_v34 = vadd.f32 %v6041_v30, %v8164_v4 }
 0x3be   :  { %v4312_v25 = vmax.f32 %v3446_v39, %v4248_v44  ;;  %v4249_v1 = vmax.f32 %v4185_v17, 0.0  ;;  %v6042_v43 = vpop.f32.mrb[102].mxu1  ;;  %v3386_v28 = vadd.f32 %v8164_v4, %v3137_v56 }
 0x3bf   :  { %v4315_v37 = vmax.f32 %v3449_v26, %v4251_v16  ;;  %v3140_v50 = vpop.f32.mrb[103].mxu1  ;;  %v4379_v38 = vmul.f32 %v8177_v14, %v4314_v54  ;;  %v3389_v36 = vadd.f32 %v6042_v43, %v8164_v4  ;;  %v3452_v41 = vmax.f32 %v3388_v34, 0.0 }
 0x3c0   :  { %v4313_v52 = vmax.f32 %v3447_v5, %v4249_v1  ;;  %v6177_v51 = vpop.f32.mrb[100].mxu0  ;;  %v4377_v42 = vmul.f32 %v8177_v14, %v4312_v25  ;;  %v3387_v8 = vadd.f32 %v8164_v4, %v3140_v50  ;;  %v3450_v47 = vmax.f32 %v3386_v28, 0.0 }
 0x3c1   :  { %v4190_v58 = vadd.f32 %v6177_v51, %v8164_v4  ;;  %v3945_v32 = vpop.f32.mrb[101].mxu0  ;;  %v4447_v23 = vsel %vm2593_vm12, %v4379_v38, 0.0  ;;  %v4380_v55 = vmul.f32 %v8177_v14, %v4315_v37  ;;  %v3453_v45 = vmax.f32 %v3389_v36, 0.0 }
 0x3c2   :  { %v4188_v22 = vadd.f32 %v8164_v4, %v3945_v32  ;;  %4448 = vadd.xlane.f32.xlu1 %v4447_v23  ;;  %v6178_v31 = vpop.f32.mrb[102].mxu0  ;;  %v4441_v48 = vsel %vm2593_vm12, %v4377_v42, 0.0  ;;  %v4378_v12 = vmul.f32 %v8177_v14, %v4313_v52  ;;  %v3451_v15 = vmax.f32 %v3387_v8, 0.0 }
 0x3c3   :  { %v4254_v11 = vmax.f32 %v4190_v58, 0.0  ;;  %v4191_v40 = vadd.f32 %v6178_v31, %v8164_v4  ;;  %4442 = vadd.xlane.f32.xlu0 %v4441_v48  ;;  %v3948_v63 = vpop.f32.mrb[103].mxu0  ;;  %v4450_v9 = vsel %vm2593_vm12, %v4380_v55, 0.0 }
 0x3c4   :  { %v4252_v49 = vmax.f32 %v4188_v22, 0.0  ;;  %v4189_v53 = vadd.f32 %v8164_v4, %v3948_v63  ;;  %v6045_v24 = vpop.f32.mrb[104].mxu1  ;;  %v4444_v59 = vsel %vm2593_vm12, %v4378_v12, 0.0 }
 0x3c5   :  { %v4318_v27 = vmax.f32 %v3452_v41, %v4254_v11  ;;  %v4255_v29 = vmax.f32 %v4191_v40, 0.0  ;;  %v3153_v33 = vpop.f32.mrb[105].mxu1  ;;  %v3392_v57 = vadd.f32 %v6045_v24, %v8164_v4 }
 0x3c6   :  { %v4316_v20 = vmax.f32 %v3450_v47, %v4252_v49  ;;  %v4253_v6 = vmax.f32 %v4189_v53, 0.0  ;;  %v6046_v21 = vpop.f32.mrb[106].mxu1  ;;  %4451 = vadd.xlane.f32.xlu1 %v4450_v9  ;;  %v3390_v61 = vadd.f32 %v8164_v4, %v3153_v33 }
 0x3c7   :  { %v4319_v18 = vmax.f32 %v3453_v45, %v4255_v29  ;;  %v3156_v13 = vpop.f32.mrb[107].mxu1  ;;  %v3393_v7 = vadd.f32 %v6046_v21, %v8164_v4  ;;  %v4383_v10 = vmul.f32 %v8177_v14, %v4318_v27  ;;  %v3456_v19 = vmax.f32 %v3392_v57, 0.0 }
 0x3c8   :  { %v4317_v3 = vmax.f32 %v3451_v15, %v4253_v6  ;;  %v6181_v0 = vpop.f32.mrb[104].mxu0  ;;  %v3391_v60 = vadd.f32 %v8164_v4, %v3156_v13  ;;  %v3454_v30 = vmax.f32 %v3390_v61, 0.0  ;;  %v4381_v56 = vmul.f32 %v8177_v14, %v4316_v20 }
 0x3c9   :  { %v4194_v46 = vadd.f32 %v6181_v0, %v8164_v4  ;;  %v3961_v35 = vpop.f32.mrb[105].mxu0  ;;  %v3457_v5 = vmax.f32 %v3393_v7, 0.0  ;;  %v4459_v37 = vsel %vm2593_vm12, %v4383_v10, 0.0  ;;  %v4384_v58 = vmul.f32 %v8177_v14, %v4319_v18 }
 0x3ca   :  { %v4192_v2 = vadd.f32 %v8164_v4, %v3961_v35  ;;  %4445 = vadd.xlane.f32.xlu1 %v4444_v59  ;;  %v6182_v62 = vpop.f32.mrb[106].mxu0  ;;  %v3455_v34 = vmax.f32 %v3391_v60, 0.0  ;;  %v4453_v48 = vsel %vm2593_vm12, %v4381_v56, 0.0  ;;  %v4382_v45 = vmul.f32 %v8177_v14, %v4317_v3 }
 0x3cb   :  { %v4258_v39 = vmax.f32 %v4194_v46, 0.0  ;;  %v4195_v44 = vadd.f32 %v6182_v62, %v8164_v4  ;;  %v3964_v17 = vpop.f32.mrb[107].mxu0  ;;  %v4462_v29 = vsel %vm2593_vm12, %v4384_v58, 0.0 }
 0x3cc   :  { %v4256_v26 = vmax.f32 %v4192_v2, 0.0  ;;  %v4193_v54 = vadd.f32 %v8164_v4, %v3964_v17  ;;  %v6049_v16 = vpop.f32.mrb[108].mxu1  ;;  %v4456_v17 = vsel %vm2593_vm12, %v4382_v45, 0.0 }
 0x3cd   :  { %v4322_v25 = vmax.f32 %v3456_v19, %v4258_v39  ;;  %v4259_v1 = vmax.f32 %v4195_v44, 0.0  ;;  %v3169_v43 = vpop.f32.mrb[109].mxu1  ;;  %v3396_v36 = vadd.f32 %v6049_v16, %v8164_v4 }
 0x3ce   :  { %v4320_v50 = vmax.f32 %v3454_v30, %v4256_v26  ;;  %v4257_v38 = vmax.f32 %v4193_v54, 0.0  ;;  %v6050_v52 = vpop.f32.mrb[110].mxu1  ;;  %4460 = vadd.xlane.f32.xlu1 %v4459_v37  ;;  %v3394_v23 = vadd.f32 %v8164_v4, %v3169_v43 }
 0x3cf   :  { %v4323_v28 = vmax.f32 %v3457_v5, %v4259_v1  ;;  %v3172_v51 = vpop.f32.mrb[111].mxu1  ;;  %v4387_v42 = vmul.f32 %v8177_v14, %v4322_v25  ;;  %v3397_v55 = vadd.f32 %v6050_v52, %v8164_v4  ;;  %v3460_v49 = vmax.f32 %v3396_v36, 0.0 }
 0x3d0   :  { %v4321_v32 = vmax.f32 %v3455_v34, %v4257_v38  ;;  %v6185_v8 = vpop.f32.mrb[108].mxu0  ;;  %v4385_v11 = vmul.f32 %v8177_v14, %v4320_v50  ;;  %v3395_v40 = vadd.f32 %v8164_v4, %v3172_v51  ;;  %v3458_v33 = vmax.f32 %v3394_v23, 0.0 }
 0x3d1   :  { %v4198_v22 = vadd.f32 %v6185_v8, %v8164_v4  ;;  %v3977_v31 = vpop.f32.mrb[109].mxu0  ;;  %v4471_v41 = vsel %vm2593_vm12, %v4387_v42, 0.0  ;;  %v3461_v9 = vmax.f32 %v3397_v55, 0.0  ;;  %v4388_v13 = vmul.f32 %v8177_v14, %v4323_v28 }
 0x3d2   :  { %v4196_v63 = vadd.f32 %v8164_v4, %v3977_v31  ;;  %4454 = vadd.xlane.f32.xlu1 %v4453_v48  ;;  %4472 = vadd.xlane.f32.xlu0 %v4471_v41  ;;  %v6186_v47 = vpop.f32.mrb[110].mxu0  ;;  %v4465_v57 = vsel %vm2593_vm12, %v4385_v11, 0.0  ;;  %v3459_v3 = vmax.f32 %v3395_v40, 0.0  ;;  %v4386_v62 = vmul.f32 %v8177_v14, %v4321_v32 }
 0x3d3   :  { %v4262_v53 = vmax.f32 %v4198_v22, 0.0  ;;  %v4199_v24 = vadd.f32 %v6186_v47, %v8164_v4  ;;  %v3980_v27 = vpop.f32.mrb[111].mxu0  ;;  %v4474_v30 = vsel %vm2593_vm12, %v4388_v13, 0.0 }
 0x3d4   :  { %v4260_v12 = vmax.f32 %v4196_v63, 0.0  ;;  %v4197_v15 = vadd.f32 %v8164_v4, %v3980_v27  ;;  %v6053_v20 = vpop.f32.mrb[112].mxu1  ;;  %v4468_v38 = vsel %vm2593_vm12, %v4386_v62, 0.0 }
 0x3d5   :  { %v4326_v6 = vmax.f32 %v3460_v49, %v4262_v53  ;;  %v4263_v21 = vmax.f32 %v4199_v24, 0.0  ;;  %v3185_v18 = vpop.f32.mrb[113].mxu1  ;;  %v3400_v35 = vadd.f32 %v6053_v20, %v8164_v4 }
 0x3d6   :  { %v4324_v61 = vmax.f32 %v3458_v33, %v4260_v12  ;;  %v4261_v0 = vmax.f32 %v4197_v15, 0.0  ;;  %v6054_v7 = vpop.f32.mrb[114].mxu1  ;;  %4463 = vadd.xlane.f32.xlu1 %v4462_v29  ;;  %4466 = vadd.xlane.f32.xlu0 %v4465_v57  ;;  %v3398_v60 = vadd.f32 %v8164_v4, %v3185_v18 }
 0x3d7   :  { %v4327_v46 = vmax.f32 %v3461_v9, %v4263_v21  ;;  %v3188_v59 = vpop.f32.mrb[115].mxu1  ;;  %v3401_v19 = vadd.f32 %v6054_v7, %v8164_v4  ;;  %v3464_v56 = vmax.f32 %v3400_v35, 0.0  ;;  %v4391_v42 = vmul.f32 %v8177_v14, %v4326_v6 }
 0x3d8   :  { %v8224_v10 = vmax.f32 %v3459_v3, %v4261_v0  ;;  %v6189_v2 = vpop.f32.mrb[112].mxu0  ;;  %v3399_v26 = vadd.f32 %v8164_v4, %v3188_v59  ;;  %v3462_v43 = vmax.f32 %v3398_v60, 0.0  ;;  %v4389_v41 = vmul.f32 %v8177_v14, %v4324_v61 }
 0x3d9   :  { %v4202_v39 = vadd.f32 %v6189_v2, %v8164_v4  ;;  %v3993_v44 = vpop.f32.mrb[113].mxu0  ;;  %v3465_v52 = vmax.f32 %v3401_v19, 0.0  ;;  %v4483_v53 = vsel %vm2593_vm12, %v4391_v42, 0.0  ;;  %v4392_v12 = vmul.f32 %v8177_v14, %v4327_v46 }
 0x3da   :  { %v4200_v54 = vadd.f32 %v8164_v4, %v3993_v44  ;;  %4457 = vadd.xlane.f32.xlu1 %v4456_v17  ;;  %4475 = vadd.xlane.f32.xlu0 %v4474_v30  ;;  %v6190_v16 = vpop.f32.mrb[114].mxu0  ;;  %v3463_v58 = vmax.f32 %v3399_v26, 0.0  ;;  %v4477_v18 = vsel %vm2593_vm12, %v4389_v41, 0.0  ;;  %v4390_v44 = vmul.f32 %v8177_v14, %v8224_v10 }
 0x3db   :  { %v4266_v5 = vmax.f32 %v4202_v39, 0.0  ;;  %v4203_v25 = vadd.f32 %v6190_v16, %v8164_v4  ;;  %v3996_v1 = vpop.f32.mrb[115].mxu0 }
 0x3dc   :  { %v4264_v37 = vmax.f32 %v4200_v54, 0.0  ;;  %v4201_v34 = vadd.f32 %v8164_v4, %v3996_v1  ;;  %v6057_v50 = vpop.f32.mrb[116].mxu1 }
 0x3dd   :  { %v4330_v28 = vmax.f32 %v3464_v56, %v4266_v5  ;;  %v4267_v36 = vmax.f32 %v4203_v25, 0.0  ;;  %v3201_v51 = vpop.f32.mrb[117].mxu1  ;;  %v3404_v22 = vadd.f32 %v6057_v50, %v8164_v4  ;;  %v4486_v5 = vsel %vm2593_vm12, %v4392_v12, 0.0 }
 0x3de   :  { %v4328_v32 = vmax.f32 %v3462_v43, %v4264_v37  ;;  %v4265_v23 = vmax.f32 %v4201_v34, 0.0  ;;  %v6058_v55 = vpop.f32.mrb[118].mxu1  ;;  %4469 = vadd.xlane.f32.xlu0 %v4468_v38  ;;  %v3402_v40 = vadd.f32 %v8164_v4, %v3201_v51 }
 0x3df   :  { %v4331_v8 = vmax.f32 %v3465_v52, %v4267_v36  ;;  %v3204_v31 = vpop.f32.mrb[119].mxu1  ;;  %v4395_v48 = vmul.f32 %v8177_v14, %v4330_v28  ;;  %v3405_v63 = vadd.f32 %v6058_v55, %v8164_v4  ;;  %v3468_v15 = vmax.f32 %v3404_v22, 0.0 }
 0x3e0   :  { %v4329_v11 = vmax.f32 %v3463_v58, %v4265_v23  ;;  %v6193_v47 = vpop.f32.mrb[116].mxu0  ;;  %v4393_v27 = vmul.f32 %v8177_v14, %v4328_v32  ;;  %v3403_v29 = vadd.f32 %v8164_v4, %v3204_v31  ;;  %v3466_v57 = vmax.f32 %v3402_v40, 0.0 }
 0x3e1   :  { %v4206_v45 = vadd.f32 %v6193_v47, %v8164_v4  ;;  %v4009_v49 = vpop.f32.mrb[117].mxu0  ;;  %v4495_v24 = vsel %vm2593_vm12, %v4395_v48, 0.0  ;;  %v3469_v13 = vmax.f32 %v3405_v63, 0.0  ;;  %v4396_v46 = vmul.f32 %v8177_v14, %v4331_v8 }
 0x3e2   :  { %v4204_v33 = vadd.f32 %v8164_v4, %v4009_v49  ;;  %4484 = vadd.xlane.f32.xlu0 %v4483_v53  ;;  %4496 = vadd.xlane.f32.xlu1 %v4495_v24  ;;  %v6194_v9 = vpop.f32.mrb[118].mxu0  ;;  %v4489_v60 = vsel %vm2593_vm12, %v4393_v27, 0.0  ;;  %v3467_v2 = vmax.f32 %v3403_v29, 0.0  ;;  %v4480_v52 = vsel %vm2593_vm12, %v4390_v44, 0.0 }
 0x3e3   :  { %v4270_v20 = vmax.f32 %v4206_v45, 0.0  ;;  %v4207_v6 = vadd.f32 %v6194_v9, %v8164_v4  ;;  %v4012_v21 = vpop.f32.mrb[119].mxu0  ;;  %v4498_v37 = vsel %vm2593_vm12, %v4396_v46, 0.0  ;;  %v4394_v58 = vmul.f32 %v8177_v14, %v4329_v11 }
 0x3e4   :  { %v4268_v3 = vmax.f32 %v4204_v33, 0.0  ;;  %v4205_v61 = vadd.f32 %v8164_v4, %v4012_v21  ;;  %v6061_v0 = vpop.f32.mrb[120].mxu1 }
 0x3e5   :  { %v4334_v7 = vmax.f32 %v3468_v15, %v4270_v20  ;;  %v4271_v35 = vmax.f32 %v4207_v6, 0.0  ;;  %v3217_v59 = vpop.f32.mrb[121].mxu1  ;;  %v3408_v30 = vadd.f32 %v6061_v0, %v8164_v4  ;;  %v4492_v21 = vsel %vm2593_vm12, %v4394_v58, 0.0 }
 0x3e6   :  { %v4332_v62 = vmax.f32 %v3466_v57, %v4268_v3  ;;  %v4269_v19 = vmax.f32 %v4205_v61, 0.0  ;;  %v6062_v39 = vpop.f32.mrb[122].mxu1  ;;  %4478 = vadd.xlane.f32.xlu0 %v4477_v18  ;;  %4490 = vadd.xlane.f32.xlu1 %v4489_v60  ;;  %v3406_v16 = vadd.f32 %v8164_v4, %v3217_v59 }
 0x3e7   :  { %v4335_v17 = vmax.f32 %v3469_v13, %v4271_v35  ;;  %v3220_v26 = vpop.f32.mrb[123].mxu1  ;;  %v3409_v25 = vadd.f32 %v6062_v39, %v8164_v4  ;;  %v4399_v34 = vmul.f32 %v8177_v14, %v4334_v7  ;;  %v3472_v28 = vmax.f32 %v3408_v30, 0.0 }
 0x3e8   :  { %v4333_v54 = vmax.f32 %v3467_v2, %v4269_v19  ;;  %v6197_v56 = vpop.f32.mrb[120].mxu0  ;;  %v3407_v10 = vadd.f32 %v8164_v4, %v3220_v26  ;;  %v3470_v32 = vmax.f32 %v3406_v16, 0.0  ;;  %v4397_v22 = vmul.f32 %v8177_v14, %v4332_v62 }
 0x3e9   :  { %v4210_v1 = vadd.f32 %v6197_v56, %v8164_v4  ;;  %v4025_v43 = vpop.f32.mrb[121].mxu0  ;;  %v3473_v31 = vmax.f32 %v3409_v25, 0.0  ;;  %v4507_v63 = vsel %vm2593_vm12, %v4399_v34, 0.0  ;;  %v4400_v29 = vmul.f32 %v8177_v14, %v4335_v17 }
 0x3ea   :  { %v4208_v50 = vadd.f32 %v8164_v4, %v4025_v43  ;;  %4487 = vadd.xlane.f32.xlu0 %v4486_v5  ;;  %4499 = vadd.xlane.f32.xlu1 %v4498_v37  ;;  %v6198_v38 = vpop.f32.mrb[122].mxu0  ;;  %v3471_v47 = vmax.f32 %v3407_v10, 0.0  ;;  %v4501_v18 = vsel %vm2593_vm12, %v4397_v22, 0.0  ;;  %v4398_v0 = vmul.f32 %v8177_v14, %v4333_v54 }
 0x3eb   :  { %v4274_v36 = vmax.f32 %v4210_v1, 0.0  ;;  %v4211_v51 = vadd.f32 %v6198_v38, %v8164_v4  ;;  %v4028_v42 = vpop.f32.mrb[123].mxu0  ;;  %v4510_v46 = vsel %vm2593_vm12, %v4400_v29, 0.0 }
 0x3ec   :  { %v4272_v23 = vmax.f32 %v4208_v50, 0.0  ;;  %v4209_v55 = vadd.f32 %v8164_v4, %v4028_v42  ;;  %v6065_v8 = vpop.f32.mrb[124].mxu1  ;;  %v4504_v58 = vsel %vm2593_vm12, %v4398_v0, 0.0 }
 0x3ed   :  { %v4338_v48 = vmax.f32 %v3472_v28, %v4274_v36  ;;  %v4275_v41 = vmax.f32 %v4211_v51, 0.0  ;;  %v3233_v40 = vpop.f32.mrb[125].mxu1  ;;  %v3412_v24 = vadd.f32 %v6065_v8, %v8164_v4 }
 0x3ee   :  { %v4336_v45 = vmax.f32 %v3470_v32, %v4272_v23  ;;  %v4273_v49 = vmax.f32 %v4209_v55, 0.0  ;;  %v6066_v53 = vpop.f32.mrb[126].mxu1  ;;  %4481 = vadd.xlane.f32.xlu0 %v4480_v52  ;;  %4508 = vadd.xlane.f32.xlu1 %v4507_v63  ;;  %v3410_v9 = vadd.f32 %v8164_v4, %v3233_v40 }
 0x3ef   :  { %v4339_v11 = vmax.f32 %v3473_v31, %v4275_v41  ;;  %v3236_v27 = vpop.f32.mrb[127].mxu1  ;;  %v3413_v12 = vadd.f32 %v6066_v53, %v8164_v4  ;;  %v4403_v57 = vmul.f32 %v8177_v14, %v4338_v48  ;;  %v3476_v7 = vmax.f32 %v3412_v24, 0.0 }
 0x3f0   :  { %v4337_v33 = vmax.f32 %v3471_v47, %v4273_v49  ;;  %v6201_v15 = vpop.f32.mrb[124].mxu0  ;;  %v3411_v13 = vadd.f32 %v8164_v4, %v3236_v27  ;;  %v3474_v2 = vmax.f32 %v3410_v9, 0.0  ;;  %v4401_v10 = vmul.f32 %v8177_v14, %v4336_v45 }
 0x3f1   :  { %v4214_v20 = vadd.f32 %v6201_v15, %v8164_v4  ;;  %v4041_v6 = vpop.f32.mrb[125].mxu0  ;;  %v3477_v62 = vmax.f32 %v3413_v12, 0.0  ;;  %v4519_v16 = vsel %vm2593_vm12, %v4403_v57, 0.0  ;;  %v4404_v54 = vmul.f32 %v8177_v14, %v4339_v11 }
 0x3f2   :  { %v4212_v3 = vadd.f32 %v8164_v4, %v4041_v6  ;;  %4493 = vadd.xlane.f32.xlu0 %v4492_v21  ;;  %4502 = vadd.xlane.f32.xlu1 %v4501_v18  ;;  %v6202_v61 = vpop.f32.mrb[126].mxu0  ;;  %v3475_v56 = vmax.f32 %v3411_v13, 0.0  ;;  %v4402_v28 = vmul.f32 %v8177_v14, %v4337_v33  ;;  %v4513_v40 = vsel %vm2593_vm12, %v4401_v10, 0.0 }
 0x3f3   :  { %v4278_v35 = vmax.f32 %v4214_v20, 0.0  ;;  %v4215_v59 = vadd.f32 %v6202_v61, %v8164_v4  ;;  %v4044_v60 = vpop.f32.mrb[127].mxu0  ;;  %v4522_v32 = vsel %vm2593_vm12, %v4404_v54, 0.0 }
 0x3f4   :  { %v4276_v19 = vmax.f32 %v4212_v3, 0.0  ;;  %v4213_v39 = vadd.f32 %v8164_v4, %v4044_v60  ;;  %v6069_v44 = vpop.f32.mrb[128].mxu1  ;;  %v4516_v53 = vsel %vm2593_vm12, %v4402_v28, 0.0 }
 0x3f5   :  { %v4342_v17 = vmax.f32 %v3476_v7, %v4278_v35  ;;  %v4279_v30 = vmax.f32 %v4215_v59, 0.0  ;;  %v3249_v26 = vpop.f32.mrb[129].mxu1  ;;  %v3416_v37 = vadd.f32 %v6069_v44, %v8164_v4 }
 0x3f6   :  { %v4340_v5 = vmax.f32 %v3474_v2, %v4276_v19  ;;  %v4277_v25 = vmax.f32 %v4213_v39, 0.0  ;;  %v6070_v1 = vpop.f32.mrb[130].mxu1  ;;  %4511 = vadd.xlane.f32.xlu1 %v4510_v46  ;;  %4520 = vadd.xlane.f32.xlu0 %v4519_v16  ;;  %v3414_v38 = vadd.f32 %v8164_v4, %v3249_v26 }
 0x3f7   :  { %v4343_v43 = vmax.f32 %v3477_v62, %v4279_v30  ;;  %v3252_v34 = vpop.f32.mrb[131].mxu1  ;;  %v3417_v36 = vadd.f32 %v6070_v1, %v8164_v4  ;;  %v3480_v22 = vmax.f32 %v3416_v37, 0.0  ;;  %v4407_v33 = vmul.f32 %v8177_v14, %v4342_v17 }
 0x3f8   :  { %v8290_v50 = vmax.f32 %v3475_v56, %v4277_v25  ;;  %v6205_v52 = vpop.f32.mrb[128].mxu0  ;;  %v3415_v23 = vadd.f32 %v8164_v4, %v3252_v34  ;;  %v3478_v63 = vmax.f32 %v3414_v38, 0.0  ;;  %v4405_v13 = vmul.f32 %v8177_v14, %v4340_v5 }
 0x3f9   :  { %v4218_v51 = vadd.f32 %v6205_v52, %v8164_v4  ;;  %v4057_v42 = vpop.f32.mrb[129].mxu0  ;;  %v3481_v11 = vmax.f32 %v3417_v36, 0.0  ;;  %v4531_v60 = vsel %vm2593_vm12, %v4407_v33, 0.0  ;;  %v4408_v44 = vmul.f32 %v8177_v14, %v4343_v43 }
 0x3fa   :  { %v4216_v55 = vadd.f32 %v8164_v4, %v4057_v42  ;;  %4505 = vadd.xlane.f32.xlu1 %v4504_v58  ;;  %4523 = vadd.xlane.f32.xlu0 %v4522_v32  ;;  %v6206_v8 = vpop.f32.mrb[130].mxu0  ;;  %v3479_v9 = vmax.f32 %v3415_v23, 0.0  ;;  %v4525_v54 = vsel %vm2593_vm12, %v4405_v13, 0.0  ;;  %v4406_v58 = vmul.f32 %v8177_v14, %v8290_v50 }
 0x3fb   :  { %v4282_v31 = vmax.f32 %v4218_v51, 0.0  ;;  %v4219_v48 = vadd.f32 %v6206_v8, %v8164_v4  ;;  %v4060_v41 = vpop.f32.mrb[131].mxu0 }
 0x3fc   :  { %v4280_v47 = vmax.f32 %v4216_v55, 0.0  ;;  %v4217_v45 = vadd.f32 %v8164_v4, %v4060_v41  ;;  %v6073_v49 = vpop.f32.mrb[132].mxu1 }
 0x3fd   :  { %v4346_v24 = vmax.f32 %v3480_v22, %v4282_v31  ;;  %v4283_v27 = vmax.f32 %v4219_v48, 0.0  ;;  %v3265_v29 = vpop.f32.mrb[133].mxu1  ;;  %v3420_v21 = vadd.f32 %v6073_v49, %v8164_v4  ;;  %v4534_v48 = vsel %vm2593_vm12, %v4408_v44, 0.0 }
 0x3fe   :  { %v4344_v12 = vmax.f32 %v3478_v63, %v4280_v47  ;;  %v4281_v15 = vmax.f32 %v4217_v45, 0.0  ;;  %v6074_v20 = vpop.f32.mrb[134].mxu1  ;;  %4514 = vadd.xlane.f32.xlu1 %v4513_v40  ;;  %4517 = vadd.xlane.f32.xlu0 %v4516_v53  ;;  %v3418_v61 = vadd.f32 %v8164_v4, %v3265_v29 }
 0x3ff   :  { %v4347_v6 = vmax.f32 %v3481_v11, %v4283_v27  ;;  %v3268_v18 = vpop.f32.mrb[135].mxu1  ;;  %v4411_v57 = vmul.f32 %v8177_v14, %v4346_v24  ;;  %v3421_v0 = vadd.f32 %v6074_v20, %v8164_v4  ;;  %v3484_v17 = vmax.f32 %v3420_v21, 0.0 }
 0x400   :  { %v4345_v3 = vmax.f32 %v3479_v9, %v4281_v15  ;;  %v6209_v7 = vpop.f32.mrb[132].mxu0  ;;  %v4409_v2 = vmul.f32 %v8177_v14, %v4344_v12  ;;  %v3419_v62 = vadd.f32 %v8164_v4, %v3268_v18  ;;  %v3482_v56 = vmax.f32 %v3418_v61, 0.0 }
 0x401   :  { %v4222_v35 = vadd.f32 %v6209_v7, %v8164_v4  ;;  %v4073_v59 = vpop.f32.mrb[133].mxu0  ;;  %v4543_v46 = vsel %vm2593_vm12, %v4411_v57, 0.0  ;;  %v3485_v5 = vmax.f32 %v3421_v0, 0.0  ;;  %v4412_v43 = vmul.f32 %v8177_v14, %v4347_v6 }
 0x402   :  { %v4220_v19 = vadd.f32 %v8164_v4, %v4073_v59  ;;  %4532 = vadd.xlane.f32.xlu0 %v4531_v60  ;;  %4544 = vadd.xlane.f32.xlu1 %v4543_v46  ;;  %v6210_v39 = vpop.f32.mrb[134].mxu0  ;;  %v4537_v52 = vsel %vm2593_vm12, %v4409_v2, 0.0  ;;  %v3483_v28 = vmax.f32 %v3419_v62, 0.0  ;;  %v4528_v11 = vsel %vm2593_vm12, %v4406_v58, 0.0 }
 0x403   :  { %v4286_v30 = vmax.f32 %v4222_v35, 0.0  ;;  %v4223_v26 = vadd.f32 %v6210_v39, %v8164_v4  ;;  %v4076_v16 = vpop.f32.mrb[135].mxu0  ;;  %v4546_v47 = vsel %vm2593_vm12, %v4412_v43, 0.0  ;;  %v4410_v9 = vmul.f32 %v8177_v14, %v4345_v3 }
 0x404   :  { %v4284_v25 = vmax.f32 %v4220_v19, 0.0  ;;  %v4221_v1 = vadd.f32 %v8164_v4, %v4076_v16  ;;  %v6077_v37 = vpop.f32.mrb[136].mxu1 }
 0x405   :  { %v4350_v34 = vmax.f32 %v3484_v17, %v4286_v30  ;;  %v4287_v10 = vmax.f32 %v4223_v26, 0.0  ;;  %v3281_v38 = vpop.f32.mrb[137].mxu1  ;;  %v3424_v23 = vadd.f32 %v6077_v37, %v8164_v4  ;;  %v4540_v16 = vsel %vm2593_vm12, %v4410_v9, 0.0 }
 0x406   :  { %v4348_v36 = vmax.f32 %v3482_v56, %v4284_v25  ;;  %v4285_v51 = vmax.f32 %v4221_v1, 0.0  ;;  %v6078_v42 = vpop.f32.mrb[138].mxu1  ;;  %4526 = vadd.xlane.f32.xlu0 %v4525_v54  ;;  %4538 = vadd.xlane.f32.xlu1 %v4537_v52  ;;  %v3422_v22 = vadd.f32 %v8164_v4, %v3281_v38 }
 0x407   :  { %v8324_v32 = vmax.f32 %v3485_v5, %v4287_v10  ;;  %v3284_v55 = vpop.f32.mrb[139].mxu1  ;;  %v3425_v41 = vadd.f32 %v6078_v42, %v8164_v4  ;;  %v4415_v50 = vmul.f32 %v8177_v14, %v4350_v34  ;;  %v3488_v24 = vmax.f32 %v3424_v23, 0.0 }
 0x408   :  { %v4349_v8 = vmax.f32 %v3483_v28, %v4285_v51  ;;  %v6213_v31 = vpop.f32.mrb[136].mxu0  ;;  %v3423_v45 = vadd.f32 %v8164_v4, %v3284_v55  ;;  %v3486_v12 = vmax.f32 %v3422_v22, 0.0  ;;  %v4413_v21 = vmul.f32 %v8177_v14, %v4348_v36 }
 0x409   :  { %v4226_v40 = vadd.f32 %v6213_v31, %v8164_v4  ;;  %v4089_v63 = vpop.f32.mrb[137].mxu0  ;;  %v3489_v18 = vmax.f32 %v3425_v41, 0.0  ;;  %v4555_v0 = vsel %vm2593_vm12, %v4415_v50, 0.0 }
 0x40a   :  { %v4224_v49 = vadd.f32 %v8164_v4, %v4089_v63  ;;  %4535 = vadd.xlane.f32.xlu0 %v4534_v48  ;;  %4547 = vadd.xlane.f32.xlu1 %v4546_v47  ;;  %v6214_v53 = vpop.f32.mrb[138].mxu0  ;;  %v3487_v7 = vmax.f32 %v3423_v45, 0.0  ;;  %v4414_v3 = vmul.f32 %v8177_v14, %v4349_v8  ;;  %v4549_v54 = vsel %vm2593_vm12, %v4413_v21, 0.0 }
 0x40b   :  { %v4290_v27 = vmax.f32 %v4226_v40, 0.0  ;;  %v4227_v29 = vadd.f32 %v6214_v53, %v8164_v4  ;;  %v4092_v33 = vpop.f32.mrb[139].mxu0 }
 0x40c   :  { %v4288_v15 = vmax.f32 %v4224_v49, 0.0  ;;  %v4225_v20 = vadd.f32 %v8164_v4, %v4092_v33  ;;  %v6081_v6 = vpop.f32.mrb[140].mxu1  ;;  %v4552_v37 = vsel %vm2593_vm12, %v4414_v3, 0.0 }
 0x40d   :  { %v4354_v57 = vmax.f32 %v3488_v24, %v4290_v27  ;;  %v4291_v13 = vmax.f32 %v4227_v29, 0.0  ;;  %v3297_v61 = vpop.f32.mrb[141].mxu1  ;;  %v3428_v2 = vadd.f32 %v6081_v6, %v8164_v4 }
 0x40e   :  { %v4352_v35 = vmax.f32 %v3486_v12, %v4288_v15  ;;  %v4289_v59 = vmax.f32 %v4225_v20, 0.0  ;;  %v6082_v60 = vpop.f32.mrb[142].mxu1  ;;  %4529 = vadd.xlane.f32.xlu0 %v4528_v11  ;;  %4556 = vadd.xlane.f32.xlu1 %v4555_v0  ;;  %v3426_v62 = vadd.f32 %v8164_v4, %v3297_v61 }
 0x40f   :  { %v4355_v46 = vmax.f32 %v3489_v18, %v4291_v13  ;;  %v3300_v19 = vpop.f32.mrb[143].mxu1  ;;  %v3429_v44 = vadd.f32 %v6082_v60, %v8164_v4  ;;  %v4419_v56 = vmul.f32 %v8177_v14, %v4354_v57  ;;  %v3492_v34 = vmax.f32 %v3428_v2, 0.0 }
 0x410   :  { %v4353_v39 = vmax.f32 %v3487_v7, %v4289_v59  ;;  %v6217_v17 = vpop.f32.mrb[140].mxu0  ;;  %v3427_v5 = vadd.f32 %v8164_v4, %v3300_v19  ;;  %v3490_v10 = vmax.f32 %v3426_v62, 0.0  ;;  %v4417_v58 = vmul.f32 %v8177_v14, %v4352_v35 }
 0x411   :  { %v4230_v30 = vadd.f32 %v6217_v17, %v8164_v4  ;;  %v4105_v26 = vpop.f32.mrb[141].mxu0  ;;  %v3493_v28 = vmax.f32 %v3429_v44, 0.0  ;;  %v4567_v22 = vsel %vm2593_vm12, %v4419_v56, 0.0  ;;  %v4420_v31 = vmul.f32 %v8177_v14, %v4355_v46 }
 0x412   :  { %v4228_v25 = vadd.f32 %v8164_v4, %v4105_v26  ;;  %4541 = vadd.xlane.f32.xlu0 %v4540_v16  ;;  %4550 = vadd.xlane.f32.xlu1 %v4549_v54  ;;  %v6218_v1 = vpop.f32.mrb[142].mxu0  ;;  %v3491_v48 = vmax.f32 %v3427_v5, 0.0  ;;  %v4418_v24 = vmul.f32 %v8177_v14, %v4353_v39  ;;  %v4561_v9 = vsel %vm2593_vm12, %v4417_v58, 0.0 }
 0x413   :  { %v4294_v38 = vmax.f32 %v4230_v30, 0.0  ;;  %v4231_v52 = vadd.f32 %v6218_v1, %v8164_v4  ;;  %v4108_v43 = vpop.f32.mrb[143].mxu0  ;;  %v4570_v12 = vsel %vm2593_vm12, %v4420_v31, 0.0 }
 0x414   :  { %v4292_v36 = vmax.f32 %v4228_v25, 0.0  ;;  %v4229_v51 = vadd.f32 %v8164_v4, %v4108_v43  ;;  %v6085_v42 = vpop.f32.mrb[144].mxu1  ;;  %v4564_v59 = vsel %vm2593_vm12, %v4418_v24, 0.0 }
 0x415   :  { %v4358_v23 = vmax.f32 %v3492_v34, %v4294_v38  ;;  %v4295_v55 = vmax.f32 %v4231_v52, 0.0  ;;  %v3313_v8 = vpop.f32.mrb[145].mxu1  ;;  %v3432_v50 = vadd.f32 %v6085_v42, %v8164_v4 }
 0x416   :  { %v4356_v41 = vmax.f32 %v3490_v10, %v4292_v36  ;;  %v4293_v40 = vmax.f32 %v4229_v51, 0.0  ;;  %v6086_v63 = vpop.f32.mrb[146].mxu1  ;;  %4553 = vadd.xlane.f32.xlu1 %v4552_v37  ;;  %4568 = vadd.xlane.f32.xlu0 %v4567_v22  ;;  %v3430_v53 = vadd.f32 %v8164_v4, %v3313_v8 }
 0x417   :  { %v8357_v47 = vmax.f32 %v3493_v28, %v4295_v55  ;;  %v3316_v45 = vpop.f32.mrb[147].mxu1  ;;  %v3433_v27 = vadd.f32 %v6086_v63, %v8164_v4  ;;  %v3496_v21 = vmax.f32 %v3432_v50, 0.0  ;;  %v4423_v62 = vmul.f32 %v8177_v14, %v4358_v23  ;;  %v8384_v28 = vld [vmem:[%s8625_s3] ss:$0 sm:$0xff] }
 0x418   :  { %v4357_v49 = vmax.f32 %v3491_v48, %v4293_v40  ;;  %v6221_v11 = vpop.f32.mrb[144].mxu0  ;;  %v3431_v15 = vadd.f32 %v8164_v4, %v3316_v45  ;;  %v3494_v61 = vmax.f32 %v3430_v53, 0.0  ;;  %v4421_v30 = vmul.f32 %v8177_v14, %v4356_v41 }
 0x419   :  { %v4234_v29 = vadd.f32 %v6221_v11, %v8164_v4  ;;  %v4121_v33 = vpop.f32.mrb[145].mxu0  ;;  %v3497_v60 = vmax.f32 %v3433_v27, 0.0  ;;  %v4579_v38 = vsel %vm2593_vm12, %v4423_v62, 0.0 }
 0x41a   :  { %v4232_v20 = vadd.f32 %v8164_v4, %v4121_v33  ;;  %4562 = vadd.xlane.f32.xlu1 %v4561_v9  ;;  %4571 = vadd.xlane.f32.xlu0 %v4570_v12  ;;  %v6222_v6 = vpop.f32.mrb[146].mxu0  ;;  %v3495_v19 = vmax.f32 %v3431_v15, 0.0  ;;  %v4422_v22 = vmul.f32 %v8177_v14, %v4357_v49 }
 0x41b   :  { %v4298_v18 = vmax.f32 %v4234_v29, 0.0  ;;  %v4235_v57 = vadd.f32 %v6222_v6, %v8164_v4  ;;  %v4124_v13 = vpop.f32.mrb[147].mxu0 }
 0x41c   :  { %v4296_v0 = vmax.f32 %v4232_v20, 0.0  ;;  %v4233_v7 = vadd.f32 %v8164_v4, %v4124_v13  ;;  %v6089_v35 = vpop.f32.mrb[148].mxu1  ;;  %v8400_v20 = vld [vmem:[%s8626_s4] sm:$0xff] }
 0x41d   :  { %v4362_v3 = vmax.f32 %v3496_v21, %v4298_v18  ;;  %v4299_v46 = vmax.f32 %v4235_v57, 0.0  ;;  %v3329_v2 = vpop.f32.mrb[149].mxu1  ;;  %v3436_v16 = vadd.f32 %v6089_v35, %v8164_v4  ;;  %v4576_v57 = vsel %vm2593_vm12, %v4422_v22, 0.0 }
 0x41e   :  { %v4360_v39 = vmax.f32 %v3494_v61, %v4296_v0  ;;  %v4297_v44 = vmax.f32 %v4233_v7, 0.0  ;;  %v6090_v17 = vpop.f32.mrb[150].mxu1  ;;  %4565 = vadd.xlane.f32.xlu0 %v4564_v59  ;;  %v3434_v25 = vadd.f32 %v8164_v4, %v3329_v2 }
 0x41f   :  { %v4363_v26 = vmax.f32 %v3497_v60, %v4299_v46  ;;  %v3332_v54 = vpop.f32.mrb[151].mxu1  ;;  %v4427_v56 = vmul.f32 %v8177_v14, %v4362_v3  ;;  %v3437_v1 = vadd.f32 %v6090_v17, %v8164_v4  ;;  %v3500_v58 = vmax.f32 %v3436_v16, 0.0 }
 0x420   :  { %v4361_v5 = vmax.f32 %v3495_v19, %v4297_v44  ;;  %v6225_v37 = vpop.f32.mrb[148].mxu0  ;;  %v4425_v43 = vmul.f32 %v8177_v14, %v4360_v39  ;;  %v3435_v36 = vadd.f32 %v8384_v28, %v3332_v54  ;;  %v3498_v31 = vmax.f32 %v3434_v25, 0.0 }
 0x421   :  { %v4238_v34 = vadd.f32 %v6225_v37, %v8164_v4  ;;  %v4137_v10 = vpop.f32.mrb[149].mxu0  ;;  %v4591_v52 = vsel %vm2593_vm12, %v4427_v56, 0.0  ;;  %v4573_v4 = vsel %vm2593_vm12, %v4421_v30, 0.0  ;;  %v3501_v48 = vmax.f32 %v3437_v1, 0.0 }
 0x422   :  { %v4236_v51 = vadd.f32 %v8384_v28, %v4137_v10  ;;  %4580 = vadd.xlane.f32.xlu0 %v4579_v38  ;;  %4592 = vadd.xlane.f32.xlu1 %v4591_v52  ;;  %v6226_v42 = vpop.f32.mrb[150].mxu0  ;;  %v4585_v11 = vsel %vm2593_vm12, %v4425_v43, 0.0  ;;  %v4428_v24 = vmul.f32 %v8177_v14, %v4363_v26  ;;  %v3499_v27 = vmax.f32 %v3435_v36, 0.0 }
 0x423   :  { %v4302_v23 = vmax.f32 %v4238_v34, 0.0  ;;  %v4239_v55 = vadd.f32 %v8384_v28, %v6226_v42  ;;  %v4140_v8 = vpop.f32.mrb[151].mxu0  ;;  %v4426_v6 = vmul.f32 %v8400_v20, %v4361_v5  ;;  %v4424_v52 = vmul.f32 %v8400_v20, %v8357_v47 }
 0x424   :  { %v4300_v41 = vmax.f32 %v4236_v51, 0.0  ;;  %v4237_v40 = vadd.f32 %v8384_v28, %v4140_v8  ;;  %v6093_v63 = vpop.f32.mrb[152].mxu1  ;;  %v4594_v7 = vsel %vm2593_vm12, %v4428_v24, 0.0 }
 0x425   :  { %v4366_v50 = vmax.f32 %v3500_v58, %v4302_v23  ;;  %v4303_v45 = vmax.f32 %v4239_v55, 0.0  ;;  %v3345_v53 = vpop.f32.mrb[153].mxu1  ;;  %v3440_v12 = vadd.f32 %v8384_v28, %v6093_v63  ;;  %v4588_v39 = vsel %vm2593_vm12, %v4426_v6, 0.0 }
 0x426   :  { %v4364_v29 = vmax.f32 %v3498_v31, %v4300_v41  ;;  %v4301_v33 = vmax.f32 %v4237_v40, 0.0  ;;  %v6094_v9 = vpop.f32.mrb[154].mxu1  ;;  %4574 = vadd.xlane.f32.xlu0 %v4573_v4  ;;  %4586 = vadd.xlane.f32.xlu1 %v4585_v11  ;;  %v3438_v14 = vadd.f32 %v8384_v28, %v3345_v53 }
 0x427   :  { %v8394_v49 = vmax.f32 %v3501_v48, %v4303_v45  ;;  %v3348_v15 = vpop.f32.mrb[155].mxu1  ;;  %v3441_v13 = vadd.f32 %v8384_v28, %v6094_v9  ;;  %v4431_v35 = vmul.f32 %v8400_v20, %v4366_v50  ;;  %v3504_v46 = vmax.f32 %v3440_v12, 0.0 }
 0x428   :  { %v4365_v21 = vmax.f32 %v3499_v27, %v4301_v33  ;;  %v6229_v18 = vpop.f32.mrb[152].mxu0  ;;  %v3439_v59 = vadd.f32 %v8384_v28, %v3348_v15  ;;  %v3502_v44 = vmax.f32 %v3438_v14, 0.0  ;;  %v4429_v16 = vmul.f32 %v8400_v20, %v4364_v29 }
 0x429   :  { %v4242_v61 = vadd.f32 %v8384_v28, %v6229_v18  ;;  %v4153_v0 = vpop.f32.mrb[153].mxu0  ;;  %v3505_v54 = vmax.f32 %v3441_v13, 0.0  ;;  %v4603_v1 = vsel %vm2593_vm12, %v4431_v35, 0.0  ;;  %v4582_v50 = vsel %vm2593_vm12, %v4424_v52, 0.0 }
 0x42a   :  { %v4240_v60 = vadd.f32 %v8384_v28, %v4153_v0  ;;  %4577 = vadd.xlane.f32.xlu0 %v4576_v57  ;;  %4595 = vadd.xlane.f32.xlu1 %v4594_v7  ;;  %v6230_v3 = vpop.f32.mrb[154].mxu0  ;;  %v3503_v37 = vmax.f32 %v3439_v59, 0.0  ;;  %v4430_v4 = vmul.f32 %v8400_v20, %v4365_v21  ;;  %v4597_v48 = vsel %vm2593_vm12, %v4429_v16, 0.0 }
 0x42b   :  { %v4306_v2 = vmax.f32 %v4242_v61, 0.0  ;;  %v4243_v62 = vadd.f32 %v8384_v28, %v6230_v3  ;;  %v4156_v19 = vpop.f32.mrb[155].mxu0 }
 0x42c   :  { %v4304_v17 = vmax.f32 %v4240_v60, 0.0  ;;  %v4241_v30 = vadd.f32 %v8384_v28, %v4156_v19  ;;  %v6097_v26 = vpop.f32.mrb[156].mxu1  ;;  %v4600_v27 = vsel %vm2593_vm12, %v4430_v4, 0.0 }
 0x42d   :  { %v4370_v56 = vmax.f32 %v3504_v46, %v4306_v2  ;;  %v4307_v5 = vmax.f32 %v4243_v62, 0.0  ;;  %v3361_v25 = vpop.f32.mrb[157].mxu1  ;;  %v3444_v36 = vadd.f32 %v8384_v28, %v6097_v26  ;;  %v4432_v46 = vmul.f32 %v8400_v20, %v8394_v49 }
 0x42e   :  { %v4368_v34 = vmax.f32 %v3502_v44, %v4304_v17  ;;  %v4305_v10 = vmax.f32 %v4241_v30, 0.0  ;;  %v6098_v38 = vpop.f32.mrb[158].mxu1  ;;  %4589 = vadd.xlane.f32.xlu0 %v4588_v39  ;;  %4604 = vadd.xlane.f32.xlu1 %v4603_v1  ;;  %v3442_v23 = vadd.f32 %v8384_v28, %v3361_v25 }
 0x42f   :  { %v4371_v43 = vmax.f32 %v3505_v54, %v4307_v5  ;;  %v3364_v51 = vpop.f32.mrb[159].mxu1  ;;  %v4435_v42 = vmul.f32 %v8400_v20, %v4370_v56  ;;  %v3445_v8 = vadd.f32 %v8384_v28, %v6098_v38  ;;  %v3508_v45 = vmax.f32 %v3444_v36, 0.0 }
 0x430   :  { %v4369_v58 = vmax.f32 %v3503_v37, %v4305_v10  ;;  %v6233_v55 = vpop.f32.mrb[156].mxu0  ;;  %v3443_v41 = vadd.f32 %v8384_v28, %v3364_v51  ;;  %v3506_v29 = vmax.f32 %v3442_v23, 0.0  ;;  %v4433_v12 = vmul.f32 %v8400_v20, %v4368_v34  ;;  %v8799_v37 = vld [vmem:[#allocation3_spill] sm:$0xff] }
 0x431   :  { %v4246_v22 = vadd.f32 %v8384_v28, %v6233_v55  ;;  %v4169_v31 = vpop.f32.mrb[157].mxu0  ;;  %v4615_v47 = vsel %vm2593_vm12, %v4435_v42, 0.0  ;;  %v3509_v15 = vmax.f32 %v3445_v8, 0.0  ;;  %v4436_v14 = vmul.f32 %v8400_v20, %v4371_v43 }
 0x432   :  { %v4244_v40 = vadd.f32 %v8384_v28, %v4169_v31  ;;  %4598 = vadd.xlane.f32.xlu1 %v4597_v48  ;;  %4616 = vadd.xlane.f32.xlu0 %v4615_v47  ;;  %v6234_v63 = vpop.f32.mrb[158].mxu0  ;;  %v3507_v18 = vmax.f32 %v3443_v41, 0.0  ;;  %v4609_v7 = vsel %vm2593_vm12, %v4433_v12, 0.0  ;;  %v4434_v59 = vmul.f32 %v8400_v20, %v4369_v58 }
 0x433   :  { %v4310_v53 = vmax.f32 %v4246_v22, 0.0  ;;  %v4247_v11 = vadd.f32 %v8384_v28, %v6234_v63  ;;  %v4172_v24 = vpop.f32.mrb[159].mxu0  ;;  %v4618_v35 = vsel %vm2593_vm12, %v4436_v14, 0.0  ;;  %v4606_v62 = vsel %vm2593_vm12, %v4432_v46, 0.0 }
 0x434   :  { %v4308_v33 = vmax.f32 %v4244_v40, 0.0  ;;  %v4245_v9 = vadd.f32 %v8384_v28, %v4172_v24  ;;  %v4416_v28 = vmul.f32 %v8400_v20, %v8324_v32  ;;  %v4612_v3 = vsel %vm2593_vm12, %v4434_v59, 0.0 }
 0x435   :  { %v4374_v6 = vmax.f32 %v3508_v45, %v4310_v53  ;;  %v4311_v21 = vmax.f32 %v4247_v11, 0.0  ;;  %v8798_v56 = vlaneseq }
 0x436   :  { %v4372_v57 = vmax.f32 %v3506_v29, %v4308_v33  ;;  %v4309_v13 = vmax.f32 %v4245_v9, 0.0  ;;  %4601 = vadd.xlane.f32.xlu1 %v4600_v27  ;;  %4583 = vadd.xlane.f32.xlu0 %v4582_v50  ;;  %v4558_v60 = vsel %vm2593_vm12, %v4416_v28, 0.0 }
 0x437   :  { %v4375_v61 = vmax.f32 %v3509_v15, %v4311_v21  ;;  %v4439_v2 = vmul.f32 %v8400_v20, %v4374_v6  ;;  %v4698_v5 = vshrl.u32 %v8798_v56, 7 }
 0x438   :  { %v4373_v0 = vmax.f32 %v3507_v18, %v4309_v13  ;;  %v4437_v32 = vmul.f32 %v8400_v20, %v4372_v57 }
 0x439   :  { %v4627_v19 = vsel %vm2593_vm12, %v4439_v2, 0.0  ;;  %v4440_v49 = vmul.f32 %v8400_v20, %v4375_v61  ;;  %v8454_v34 = vsub.s32 %v8799_v37, %v4698_v5 }
 0x43a   :  { %4610 = vadd.xlane.f32.xlu1 %v4609_v7  ;;  %4619 = vadd.xlane.f32.xlu0 %v4618_v35  ;;  %v4621_v39 = vsel %vm2593_vm12, %v4437_v32, 0.0  ;;  %v4438_v44 = vmul.f32 %v8400_v20, %v4373_v0 }
 0x43b   :  { %v4630_v30 = vsel %vm2593_vm12, %v4440_v49, 0.0 }
 0x43c   :  { %v4624_v17 = vsel %vm2593_vm12, %v4438_v44, 0.0 }
 0x43e   :  { %4559 = vadd.xlane.f32.xlu1 %v4558_v60  ;;  %4613 = vadd.xlane.f32.xlu0 %v4612_v3 }
 0x442   :  { %4607 = vadd.xlane.f32.xlu1 %v4606_v62  ;;  %4628 = vadd.xlane.f32.xlu0 %v4627_v19 }
 0x446   :  { %4622 = vadd.xlane.f32.xlu0 %v4621_v39 }
 0x44a   :  { %4625 = vadd.xlane.f32.xlu0 %v4624_v17 }
 0x44e   :  { %4631 = vadd.xlane.f32.xlu0 %v4630_v30 }
 0x44f   :  { %v4449_v26 = vpop.xlane.xlu1 %4448 }
 0x450   :  { %v4443_v25 = vpop.xlane.xlu0 %4442  ;;  %v4708_v36 = vrot.slane %v4449_v26, %v8454_v34 }
 0x451   :  { %v4700_v20 = vrot.slane %v4443_v25, %v8454_v34 }
 0x453   :  { %v4452_v16 = vpop.xlane.xlu1 %4451 }
 0x454   :  { %v4712_v23 = vrot.slane %v4452_v16, %v8454_v34 }
 0x457   :  { %v4446_v54 = vpop.xlane.xlu1 %4445 }
 0x458   :  { %v4704_v10 = vrot.slane %v4446_v54, %v8454_v34 }
 0x45a   :  { %v4954_v43 = vsel %vm4953_vm5, %v4704_v10, %v4700_v20 }
 0x45b   :  { %v4461_v1 = vpop.xlane.xlu1 %4460  ;;  %v4956_v4 = vsel %vm4955_vm15, %v4708_v36, %v4954_v43 }
 0x45c   :  { %v4958_v22 = vsel %vm4957_vm0, %v4712_v23, %v4956_v4  ;;  %v4724_v48 = vrot.slane %v4461_v1, %v8454_v34 }
 0x45f   :  { %v4455_v38 = vpop.xlane.xlu1 %4454  ;;  %v4473_v52 = vpop.xlane.xlu0 %4472 }
 0x460   :  { %v4716_v58 = vrot.slane %v4455_v38, %v8454_v34  ;;  %v4740_v15 = vrot.slane %v4473_v52, %v8454_v34 }
 0x462   :  { %v4960_v47 = vsel %vm4959_vm1, %v4716_v58, %v4958_v22 }
 0x463   :  { %v4464_v51 = vpop.xlane.xlu1 %4463  ;;  %v4467_v42 = vpop.xlane.xlu0 %4466 }
 0x464   :  { %v4728_v41 = vrot.slane %v4464_v51, %v8454_v34  ;;  %v4732_v9 = vrot.slane %v4467_v42, %v8454_v34 }
 0x467   :  { %v4458_v55 = vpop.xlane.xlu1 %4457  ;;  %v4476_v8 = vpop.xlane.xlu0 %4475 }
 0x468   :  { %v4720_v31 = vrot.slane %v4458_v55, %v8454_v34  ;;  %v4744_v57 = vrot.slane %v4476_v8, %v8454_v34 }
 0x46a   :  { %v4962_v40 = vsel %vm4961_vm2, %v4720_v31, %v4960_v47 }
 0x46b   :  { %v4470_v63 = vpop.xlane.xlu0 %4469  ;;  %v4964_v50 = vsel %vm4963_vm3, %v4724_v48, %v4962_v40 }
 0x46c   :  { %v4966_v45 = vsel %vm4965_vm4, %v4728_v41, %v4964_v50  ;;  %v4736_v27 = vrot.slane %v4470_v63, %v8454_v34 }
 0x46d   :  { %v5025_v53 = vsel %vm5024_vm6, %v4966_v45, 0.0 }
 0x46e   :  { %5026 = vadd.xlane.f32.xlu1 %v5025_v53  ;;  %v4967_v12 = vsel %vm4953_vm5, %v4736_v27, %v4732_v9 }
 0x46f   :  { %v4485_v11 = vpop.xlane.xlu0 %4484  ;;  %v4497_v24 = vpop.xlane.xlu1 %4496  ;;  %v4968_v14 = vsel %vm4955_vm15, %v4740_v15, %v4967_v12 }
 0x470   :  { %v4969_v0 = vsel %vm4957_vm0, %v4744_v57, %v4968_v14  ;;  %v4756_v35 = vrot.slane %v4485_v11, %v8454_v34  ;;  %v4772_v39 = vrot.slane %v4497_v24, %v8454_v34 }
 0x473   :  { %v4479_v29 = vpop.xlane.xlu0 %4478  ;;  %v4491_v33 = vpop.xlane.xlu1 %4490 }
 0x474   :  { %v4748_v18 = vrot.slane %v4479_v29, %v8454_v34  ;;  %v4764_v62 = vrot.slane %v4491_v33, %v8454_v34 }
 0x476   :  { %v4970_v28 = vsel %vm4959_vm1, %v4748_v18, %v4969_v0 }
 0x477   :  { %v4488_v6 = vpop.xlane.xlu0 %4487  ;;  %v4500_v21 = vpop.xlane.xlu1 %4499 }
 0x478   :  { %v4760_v59 = vrot.slane %v4488_v6, %v8454_v34  ;;  %v4776_v16 = vrot.slane %v4500_v21, %v8454_v34 }
 0x47b   :  { %v4482_v13 = vpop.xlane.xlu0 %4481  ;;  %v4509_v61 = vpop.xlane.xlu1 %4508 }
 0x47c   :  { %v4752_v7 = vrot.slane %v4482_v13, %v8454_v34  ;;  %v4788_v37 = vrot.slane %v4509_v61, %v8454_v34 }
 0x47e   :  { %v4971_v60 = vsel %vm4961_vm2, %v4752_v7, %v4970_v28 }
 0x47f   :  { %v4494_v3 = vpop.xlane.xlu0 %4493  ;;  %v4503_v46 = vpop.xlane.xlu1 %4502  ;;  %v4972_v2 = vsel %vm4963_vm3, %v4756_v35, %v4971_v60 }
 0x480   :  { %v4768_v19 = vrot.slane %v4494_v3, %v8454_v34  ;;  %v4973_v32 = vsel %vm4965_vm4, %v4760_v59, %v4972_v2  ;;  %v4780_v56 = vrot.slane %v4503_v46, %v8454_v34 }
 0x481   :  { %v5028_v44 = vsel %vm5024_vm6, %v4973_v32, 0.0 }
 0x482   :  { %v4974_v17 = vsel %vm4953_vm5, %v4768_v19, %v4764_v62  ;;  %5029 = vadd.xlane.f32.xlu0 %v5028_v44 }
 0x483   :  { %v4975_v49 = vsel %vm4955_vm15, %v4772_v39, %v4974_v17  ;;  %v4512_v30 = vpop.xlane.xlu1 %4511  ;;  %v4521_v26 = vpop.xlane.xlu0 %4520 }
 0x484   :  { %v4976_v54 = vsel %vm4957_vm0, %v4776_v16, %v4975_v49  ;;  %v4792_v38 = vrot.slane %v4512_v30, %v8454_v34  ;;  %v4804_v48 = vrot.slane %v4521_v26, %v8454_v34 }
 0x485   :  { %v4977_v10 = vsel %vm4959_vm1, %v4780_v56, %v4976_v54 }
 0x487   :  { %v4506_v5 = vpop.xlane.xlu1 %4505  ;;  %v4524_v25 = vpop.xlane.xlu0 %4523 }
 0x488   :  { %v4784_v1 = vrot.slane %v4506_v5, %v8454_v34  ;;  %v4808_v50 = vrot.slane %v4524_v25, %v8454_v34 }
 0x48a   :  { %v4978_v52 = vsel %vm4961_vm2, %v4784_v1, %v4977_v10 }
 0x48b   :  { %v4515_v20 = vpop.xlane.xlu1 %4514  ;;  %v4518_v43 = vpop.xlane.xlu0 %4517  ;;  %v4979_v36 = vsel %vm4963_vm3, %v4788_v37, %v4978_v52 }
 0x48c   :  { %v4980_v51 = vsel %vm4965_vm4, %v4792_v38, %v4979_v36  ;;  %v4796_v23 = vrot.slane %v4515_v20, %v8454_v34  ;;  %v4800_v55 = vrot.slane %v4518_v43, %v8454_v34 }
 0x48d   :  { %v5031_v42 = vsel %vm5024_vm6, %v4980_v51, 0.0 }
 0x48e   :  { %5032 = vadd.xlane.f32.xlu1 %v5031_v42  ;;  %v4981_v31 = vsel %vm4953_vm5, %v4800_v55, %v4796_v23 }
 0x48f   :  { %v4533_v4 = vpop.xlane.xlu0 %4532  ;;  %v4545_v58 = vpop.xlane.xlu1 %4544  ;;  %v4982_v40 = vsel %vm4955_vm15, %v4804_v48, %v4981_v31 }
 0x490   :  { %v4983_v11 = vsel %vm4957_vm0, %v4808_v50, %v4982_v40  ;;  %v4820_v27 = vrot.slane %v4533_v4, %v8454_v34  ;;  %v4836_v56 = vrot.slane %v4545_v58, %v8454_v34 }
 0x493   :  { %v4527_v8 = vpop.xlane.xlu0 %4526  ;;  %v4539_v22 = vpop.xlane.xlu1 %4538 }
 0x494   :  { %v4812_v63 = vrot.slane %v4527_v8, %v8454_v34  ;;  %v4828_v17 = vrot.slane %v4539_v22, %v8454_v34 }
 0x496   :  { %v4984_v29 = vsel %vm4959_vm1, %v4812_v63, %v4983_v11 }
 0x497   :  { %v4536_v47 = vpop.xlane.xlu0 %4535  ;;  %v4548_v41 = vpop.xlane.xlu1 %4547 }
 0x498   :  { %v4824_v33 = vrot.slane %v4536_v47, %v8454_v34  ;;  %v4840_v52 = vrot.slane %v4548_v41, %v8454_v34 }
 0x49b   :  { %v4530_v45 = vpop.xlane.xlu0 %4529  ;;  %v8511_v53 = vpop.xlane.xlu1 %4556 }
 0x49c   :  { %v4816_v24 = vrot.slane %v4530_v45, %v8454_v34 }
 0x49e   :  { %v4985_v9 = vsel %vm4961_vm2, %v4816_v24, %v4984_v29 }
 0x49f   :  { %v4542_v12 = vpop.xlane.xlu0 %4541  ;;  %v4551_v15 = vpop.xlane.xlu1 %4550  ;;  %v4986_v6 = vsel %vm4963_vm3, %v4820_v27, %v4985_v9 }
 0x4a0   :  { %v4987_v21 = vsel %vm4965_vm4, %v4824_v33, %v4986_v6  ;;  %v4832_v62 = vrot.slane %v4542_v12, %v8454_v34  ;;  %v4844_v55 = vrot.slane %v4551_v15, %v8454_v34  ;;  %v4852_v33 = vrot.slane %v8511_v53, %v8454_v34 }
 0x4a1   :  { %v5034_v14 = vsel %vm5024_vm6, %v4987_v21, 0.0 }
 0x4a2   :  { %5035 = vadd.xlane.f32.xlu0 %v5034_v14  ;;  %v4988_v26 = vsel %vm4953_vm5, %v4832_v62, %v4828_v17 }
 0x4a3   :  { %v4569_v18 = vpop.xlane.xlu0 %4568  ;;  %v4554_v57 = vpop.xlane.xlu1 %4553  ;;  %v4989_v10 = vsel %vm4955_vm15, %v4836_v56, %v4988_v26 }
 0x4a4   :  { %v4868_v32 = vrot.slane %v4569_v18, %v8454_v34  ;;  %v4990_v4 = vsel %vm4957_vm0, %v4840_v52, %v4989_v10  ;;  %v4848_v31 = vrot.slane %v4554_v57, %v8454_v34 }
 0x4a5   :  { %v4991_v47 = vsel %vm4959_vm1, %v4844_v55, %v4990_v4 }
 0x4a6   :  { %v4992_v24 = vsel %vm4961_vm2, %v4848_v31, %v4991_v47 }
 0x4a7   :  { %v4572_v13 = vpop.xlane.xlu0 %4571  ;;  %v4563_v61 = vpop.xlane.xlu1 %4562  ;;  %v4993_v21 = vsel %vm4963_vm3, %v4852_v33, %v4992_v24 }
 0x4a8   :  { %v4860_v2 = vrot.slane %v4563_v61, %v8454_v34  ;;  %v4872_v16 = vrot.slane %v4572_v13, %v8454_v34 }
 0x4ab   :  { %v4566_v0 = vpop.xlane.xlu0 %4565 }
 0x4ac   :  { %v4864_v60 = vrot.slane %v4566_v0, %v8454_v34 }
 0x4ae   :  { %v4995_v19 = vsel %vm4953_vm5, %v4864_v60, %v4860_v2 }
 0x4af   :  { %v4581_v7 = vpop.xlane.xlu0 %4580  ;;  %v4593_v35 = vpop.xlane.xlu1 %4592  ;;  %v4996_v49 = vsel %vm4955_vm15, %v4868_v32, %v4995_v19 }
 0x4b0   :  { %v4997_v1 = vsel %vm4957_vm0, %v4872_v16, %v4996_v49  ;;  %v4884_v36 = vrot.slane %v4581_v7, %v8454_v34  ;;  %v4900_v8 = vrot.slane %v4593_v35, %v8454_v34 }
 0x4b3   :  { %v4575_v28 = vpop.xlane.xlu0 %4574  ;;  %v4587_v59 = vpop.xlane.xlu1 %4586 }
 0x4b4   :  { %v4876_v30 = vrot.slane %v4575_v28, %v8454_v34  ;;  %v4892_v20 = vrot.slane %v4587_v59, %v8454_v34 }
 0x4b6   :  { %v4998_v38 = vsel %vm4959_vm1, %v4876_v30, %v4997_v1  ;;  %v5050_v1 = vstv %s8627_s5 }
 0x4b7   :  { %v4578_v3 = vpop.xlane.xlu0 %4577  ;;  %v4596_v46 = vpop.xlane.xlu1 %4595 }
 0x4b8   :  { %v4880_v54 = vrot.slane %v4578_v3, %v8454_v34  ;;  %v4904_v45 = vrot.slane %v4596_v46, %v8454_v34 }
 0x4ba   :  { %v4999_v43 = vsel %vm4961_vm2, %v4880_v54, %v4998_v38 }
 0x4bb   :  { %v4590_v39 = vpop.xlane.xlu0 %4589  ;;  %v4605_v44 = vpop.xlane.xlu1 %4604  ;;  %v5000_v22 = vsel %vm4963_vm3, %v4884_v36, %v4999_v43 }
 0x4bc   :  { %v4896_v37 = vrot.slane %v4590_v39, %v8454_v34  ;;  %v4916_v13 = vrot.slane %v4605_v44, %v8454_v34 }
 0x4be   :  { %v5002_v58 = vsel %vm4953_vm5, %v4896_v37, %v4892_v20 }
 0x4bf   :  { %v4599_v5 = vpop.xlane.xlu1 %4598  ;;  %v4617_v25 = vpop.xlane.xlu0 %4616  ;;  %v5003_v41 = vsel %vm4955_vm15, %v4900_v8, %v5002_v58 }
 0x4c0   :  { %v4908_v11 = vrot.slane %v4599_v5, %v8454_v34  ;;  %v5004_v27 = vsel %vm4957_vm0, %v4904_v45, %v5003_v41  ;;  %v4932_v3 = vrot.slane %v4617_v25, %v8454_v34 }
 0x4c2   :  { %v5005_v6 = vsel %vm4959_vm1, %v4908_v11, %v5004_v27 }
 0x4c3   :  { %v4602_v51 = vpop.xlane.xlu1 %4601  ;;  %v4584_v42 = vpop.xlane.xlu0 %4583 }
 0x4c4   :  { %v4888_v23 = vrot.slane %v4584_v42, %v8454_v34  ;;  %v4912_v29 = vrot.slane %v4602_v51, %v8454_v34 }
 0x4c6   :  { %v5001_v48 = vsel %vm4965_vm4, %v4888_v23, %v5000_v22  ;;  %v5006_v14 = vsel %vm4961_vm2, %v4912_v29, %v5005_v6 }
 0x4c7   :  { %v4611_v40 = vpop.xlane.xlu1 %4610  ;;  %v4620_v63 = vpop.xlane.xlu0 %4619  ;;  %v5040_v50 = vsel %vm5024_vm6, %v5001_v48, 0.0  ;;  %v5007_v28 = vsel %vm4963_vm3, %v4916_v13, %v5006_v14 }
 0x4c8   :  { %5041 = vadd.xlane.f32.xlu0 %v5040_v50  ;;  %v4924_v7 = vrot.slane %v4611_v40, %v8454_v34  ;;  %v4936_v32 = vrot.slane %v4620_v63, %v8454_v34 }
 0x4cb   :  { %v4560_v9 = vpop.xlane.xlu1 %4559  ;;  %v4614_v12 = vpop.xlane.xlu0 %4613 }
 0x4cc   :  { %v4856_v15 = vrot.slane %v4560_v9, %v8454_v34  ;;  %v4928_v18 = vrot.slane %v4614_v12, %v8454_v34 }
 0x4ce   :  { %v4994_v57 = vsel %vm4965_vm4, %v4856_v15, %v4993_v21  ;;  %v5009_v59 = vsel %vm4953_vm5, %v4928_v18, %v4924_v7 }
 0x4cf   :  { %v4608_v61 = vpop.xlane.xlu1 %4607  ;;  %v4629_v0 = vpop.xlane.xlu0 %4628  ;;  %v5037_v53 = vsel %vm5024_vm6, %v4994_v57, 0.0  ;;  %v5010_v62 = vsel %vm4955_vm15, %v4932_v3, %v5009_v59 }
 0x4d0   :  { %v4920_v35 = vrot.slane %v4608_v61, %v8454_v34  ;;  %5038 = vadd.xlane.f32.xlu1 %v5037_v53  ;;  %v5011_v44 = vsel %vm4957_vm0, %v4936_v32, %v5010_v62  ;;  %v4948_v26 = vrot.slane %v4629_v0, %v8454_v34 }
 0x4d2   :  { %v5008_v60 = vsel %vm4965_vm4, %v4920_v35, %v5007_v28 }
 0x4d3   :  { %v4623_v46 = vpop.xlane.xlu0 %4622  ;;  %v5043_v2 = vsel %vm5024_vm6, %v5008_v60, 0.0 }
 0x4d4   :  { %5044 = vadd.xlane.f32.xlu1 %v5043_v2  ;;  %v4940_v19 = vrot.slane %v4623_v46, %v8454_v34 }
 0x4d6   :  { %v5012_v49 = vsel %vm4959_vm1, %v4940_v19, %v5011_v44 }
 0x4d7   :  { %v4626_v39 = vpop.xlane.xlu0 %4625 }
 0x4d8   :  { %v4944_v17 = vrot.slane %v4626_v39, %v8454_v34 }
 0x4da   :  { %v5013_v30 = vsel %vm4961_vm2, %v4944_v17, %v5012_v49 }
 0x4db   :  { %v4632_v16 = vpop.xlane.xlu0 %4631  ;;  %v5014_v56 = vsel %vm4963_vm3, %v4948_v26, %v5013_v30 }
 0x4dc   :  { %v4952_v54 = vrot.slane %v4632_v16, %v8454_v34 }
 0x4de   :  { %v5015_v5 = vsel %vm4965_vm4, %v4952_v54, %v5014_v56 }
 0x4df   :  { %v5046_v25 = vsel %vm5024_vm6, %v5015_v5, 0.0 }
 0x4e0   :  { %5047 = vadd.xlane.f32.xlu0 %v5046_v25 }
 0x4fb   :  { %v5027_v37 = vpop.xlane.xlu1 %5026 }
 0x4fc   :  { %v5051_v10 = vadd.f32 %v5050_v1, %v5027_v37 }
 0x4fe   :  { %v5486_v38 = vmul.f32 -1.442695, %v5051_v10 }
 0x500   :  { %6386 = vpow2.f32 %v5486_v38 }
 0x50a   :  { %v6387_v52 = vpop.eup %6386 }
 0x50b   :  { %v5083_v20 = vadd.f32 1.0, %v6387_v52 }
 0x50d   :  { %6388 = vrcp.f32 %v5083_v20 }
 0x50f   :  { %v5030_v43 = vpop.xlane.xlu0 %5029 }
 0x510   :  { %v5052_v34 = vadd.f32 %v5050_v1, %v5030_v43 }
 0x512   :  { %v5487_v36 = vmul.f32 -1.442695, %v5052_v34 }
 0x514   :  { %6390 = vpow2.f32 %v5487_v36 }
 0x517   :  { %v6389_v51 = vpop.eup %6388 }
 0x518   :  { %5108 = vst.msk [vmem:[%s8628_s6] sm:$0xff] %vm5107_vm7, %v6389_v51 }
 0x51b   :  { %v5033_v42 = vpop.xlane.xlu1 %5032 }
 0x51c   :  { %v5053_v4 = vadd.f32 %v5050_v1, %v5033_v42 }
 0x51e   :  { %v6391_v58 = vpop.eup %6390  ;;  %v5488_v23 = vmul.f32 -1.442695, %v5053_v4 }
 0x51f   :  { %v5084_v55 = vadd.f32 1.0, %v6391_v58 }
 0x520   :  { %6392 = vpow2.f32 %v5488_v23 }
 0x521   :  { %6394 = vrcp.f32 %v5084_v55 }
 0x52a   :  { %v6393_v8 = vpop.eup %6392 }
 0x52b   :  { %v6395_v22 = vpop.eup %6394  ;;  %v5085_v31 = vadd.f32 1.0, %v6393_v8 }
 0x52c   :  { %5109 = vst.msk [vmem:[%s8628_s6 + $0x8] sm:$0xff] %vm5107_vm7, %v6395_v22 }
 0x52d   :  { %6396 = vrcp.f32 %v5085_v31 }
 0x52f   :  { %v5036_v48 = vpop.xlane.xlu0 %5035 }
 0x530   :  { %v5054_v47 = vadd.f32 %v5050_v1, %v5036_v48 }
 0x532   :  { %v5489_v41 = vmul.f32 -1.442695, %v5054_v47 }
 0x534   :  { %6398 = vpow2.f32 %v5489_v41 }
 0x537   :  { %v6397_v40 = vpop.eup %6396 }
 0x538   :  { %5110 = vst.msk [vmem:[%s8628_s6 + $0x10] sm:$0xff] %vm5107_vm7, %v6397_v40 }
 0x53e   :  { %v6399_v63 = vpop.eup %6398 }
 0x53f   :  { %v5086_v50 = vadd.f32 1.0, %v6399_v63 }
 0x541   :  { %6400 = vrcp.f32 %v5086_v50 }
 0x54b   :  { %v6401_v45 = vpop.eup %6400 }
 0x54c   :  { %5111 = vst.msk [vmem:[%s8628_s6 + $0x18] sm:$0xff] %vm5107_vm7, %v6401_v45 }
 0x555   :  { %v5042_v11 = vpop.xlane.xlu0 %5041 }
 0x556   :  { %v5056_v24 = vadd.f32 %v5050_v1, %v5042_v11 }
 0x558   :  { %v5491_v27 = vmul.f32 -1.442695, %v5056_v24 }
 0x55a   :  { %6402 = vpow2.f32 %v5491_v27 }
 0x55d   :  { %v5039_v29 = vpop.xlane.xlu1 %5038 }
 0x55e   :  { %v5055_v33 = vadd.f32 %v5050_v1, %v5039_v29 }
 0x560   :  { %v5490_v9 = vmul.f32 -1.442695, %v5055_v33 }
 0x561   :  { %v5045_v12 = vpop.xlane.xlu1 %5044 }
 0x562   :  { %6404 = vpow2.f32 %v5490_v9  ;;  %v5057_v15 = vadd.f32 %v5050_v1, %v5045_v12 }
 0x564   :  { %v6403_v6 = vpop.eup %6402  ;;  %v5492_v21 = vmul.f32 -1.442695, %v5057_v15 }
 0x565   :  { %v5088_v14 = vadd.f32 1.0, %v6403_v6 }
 0x566   :  { %6406 = vpow2.f32 %v5492_v21 }
 0x567   :  { %6408 = vrcp.f32 %v5088_v14 }
 0x56c   :  { %v6405_v18 = vpop.eup %6404 }
 0x56d   :  { %v5087_v57 = vadd.f32 1.0, %v6405_v18  ;;  %v5048_v13 = vpop.xlane.xlu0 %5047 }
 0x56e   :  { %v5058_v61 = vadd.f32 %v5050_v1, %v5048_v13 }
 0x56f   :  { %6410 = vrcp.f32 %v5087_v57 }
 0x570   :  { %v6407_v0 = vpop.eup %6406  ;;  %v5493_v53 = vmul.f32 -1.442695, %v5058_v61 }
 0x571   :  { %v6409_v7 = vpop.eup %6408  ;;  %v5089_v35 = vadd.f32 1.0, %v6407_v0 }
 0x572   :  { %5113 = vst.msk [vmem:[%s8628_s6 + $0x28] sm:$0xff] %vm5107_vm7, %v6409_v7  ;;  %6412 = vpow2.f32 %v5493_v53 }
 0x573   :  { %6414 = vrcp.f32 %v5089_v35 }
 0x579   :  { %v6411_v28 = vpop.eup %6410 }
 0x57a   :  { %5112 = vst.msk [vmem:[%s8628_s6 + $0x20] sm:$0xff] %vm5107_vm7, %v6411_v28 }
 0x57c   :  { %v6413_v59 = vpop.eup %6412 }
 0x57d   :  { %v6415_v60 = vpop.eup %6414  ;;  %v5090_v3 = vadd.f32 1.0, %v6413_v59 }
 0x57e   :  { %5114 = vst.msk [vmem:[%s8628_s6 + $0x30] sm:$0xff] %vm5107_vm7, %v6415_v60 }
 0x57f   :  { %6416 = vrcp.f32 %v5090_v3 }
 0x589   :  { %v6417_v46 = vpop.eup %6416 }
 0x58a   :  { %5115 = vst.msk [vmem:[%s8628_s6 + $0x38] sm:$0xff] %vm5107_vm7, %v6417_v46 }

</bundles_post_ra>
